<compile_context>
chip_gen: v7x
topology: tpu7x:2x2x1
jax: 0.10.0
libtpu: 0.0.40
codegen_flags: <defaults>
</compile_context>

<pallas_src>
import functools
import math

import jax
import jax.numpy as jnp
from jax import lax
from jax.experimental import pallas as pl
from jax.experimental.pallas import tpu as pltpu


# ----------------------------------------------------------------------------
# In-kernel helpers (plain jnp on loaded values; shared by encoder/decoder kernels)
# ----------------------------------------------------------------------------
def _layer_norm(x, gamma, beta, eps):
    """x: [B, S, D] f32; gamma/beta: [1, D] f32 (broadcast)."""
    mean = jnp.mean(x, axis=-1, keepdims=True)
    var = jnp.mean((x - mean) ** 2, axis=-1, keepdims=True)
    return (x - mean) * lax.rsqrt(var + eps) * gamma + beta


def _mha_core(q_bf, k_bf, v_bf, wo_bf, *, num_heads, causal):
    """Multi-head attention with the output projection fused into the head loop.

    q_bf: [B, Sq, D] bf16, k_bf/v_bf: [B, Sk, D] bf16 (1/sqrt(dh) already folded into Q).
    wo_bf: [H, dh, D] bf16.  Returns f32 [B, Sq, D] = concat_h(softmax(qk)v_h) @ Wo
    accumulated per head (no lane-concat, no separate full out-proj matmul).
    """
    B, Sq, D = q_bf.shape
    Sk = k_bf.shape[1]
    dh = D // num_heads

    if causal:
        row = lax.broadcasted_iota(jnp.int32, (Sq, Sk), 0)
        col = lax.broadcasted_iota(jnp.int32, (Sq, Sk), 1)
        ok = (col <= row)[None, :, :]                       # [1, Sq, Sk]

    acc = jnp.zeros((B, Sq, D), jnp.float32)
    for h in range(num_heads):                              # static head loop
        sl = slice(h * dh, (h + 1) * dh)
        qh = q_bf[:, :, sl]                                 # [B, Sq, dh]
        kh = k_bf[:, :, sl]                                 # [B, Sk, dh]
        vh = v_bf[:, :, sl]                                 # [B, Sk, dh]
        s = jnp.einsum('bqd,bkd->bqk', qh, kh,
                       preferred_element_type=jnp.float32)  # [B, Sq, Sk] f32
        if causal:
            s = jnp.where(ok, s, -jnp.inf)                  # exact zero after exp
        s = s - jnp.max(s, axis=-1, keepdims=True)          # f32 softmax stats
        p = jnp.exp(s)
        p = p * pl.reciprocal(jnp.sum(p, axis=-1, keepdims=True), approx=True)
        ho = jnp.einsum('bqk,bkd->bqd', p.astype(jnp.bfloat16), vh,
                        preferred_element_type=jnp.float32)  # [B, Sq, dh]
        acc = acc + jnp.dot(ho.astype(jnp.bfloat16), wo_bf[h],
                            preferred_element_type=jnp.float32)  # += head @ Wo[h]
    return acc


def _ffn_addln(x, w1_bf, b1, w2_bf, b2, gamma, beta, eps):
    """linear -> ReLU -> linear -> residual -> LayerNorm.  x: [B, S, D] f32."""
    h = jnp.dot(x.astype(jnp.bfloat16), w1_bf,
                preferred_element_type=jnp.float32) + b1
    h = jnp.maximum(h, 0.0)
    y = jnp.dot(h.astype(jnp.bfloat16), w2_bf,
                preferred_element_type=jnp.float32) + b2
    return _layer_norm(y + x, gamma, beta, eps)


# ----------------------------------------------------------------------------
# Fused-stack kernels
# ----------------------------------------------------------------------------
def _encoder_stack_kernel(x_ref,
                          wqkv_ref, bqkv_ref, wo_ref, bo_ref, g1_ref, bt1_ref,
                          w1_ref, b1_ref, w2_ref, b2_ref, g2_ref, bt2_ref,
                          o_ref, *, num_heads, eps):
    """One grid step == one encoder layer; activation lives in the resident out block."""
    @pl.when(pl.program_id(0) == 0)
    def _():
        o_ref[...] = x_ref[...]

    x = o_ref[...].astype(jnp.float32)                      # [B, S, D] (residual copy)
    D = x.shape[-1]

    # --- self-attention + Add&LN ---
    qkv = jnp.dot(x.astype(jnp.bfloat16), wqkv_ref[0],
                  preferred_element_type=jnp.float32) + bqkv_ref[0]
    qkv_bf = qkv.astype(jnp.bfloat16)
    attn = _mha_core(qkv_bf[..., :D], qkv_bf[..., D:2 * D], qkv_bf[..., 2 * D:],
                     wo_ref[0], num_heads=num_heads, causal=False)
    y1 = _layer_norm(attn + bo_ref[0] + x, g1_ref[0], bt1_ref[0], eps)

    # --- FFN + Add&LN ---
    out = _ffn_addln(y1, w1_ref[0], b1_ref[0], w2_ref[0], b2_ref[0],
                     g2_ref[0], bt2_ref[0], eps)
    o_ref[...] = out.astype(o_ref.dtype)


def _decoder_stack_kernel(x_ref, enc_ref,
                          s_wqkv_ref, s_bqkv_ref, s_wo_ref, s_bo_ref, g1_ref, bt1_ref,
                          c_wq_ref, c_bq_ref, c_wkv_ref, c_bkv_ref, c_wo_ref, c_bo_ref,
                          g2_ref, bt2_ref,
                          w1_ref, b1_ref, w2_ref, b2_ref, g3_ref, bt3_ref,
                          o_ref, *, num_heads, eps):
    """One grid step == one decoder layer (masked self-attn, cross-attn, FFN)."""
    @pl.when(pl.program_id(0) == 0)
    def _():
        o_ref[...] = x_ref[...]

    x = o_ref[...].astype(jnp.float32)                      # [B, S, D]
    D = x.shape[-1]

    # --- masked self-attention + Add&LN ---
    qkv = jnp.dot(x.astype(jnp.bfloat16), s_wqkv_ref[0],
                  preferred_element_type=jnp.float32) + s_bqkv_ref[0]
    qkv_bf = qkv.astype(jnp.bfloat16)
    attn = _mha_core(qkv_bf[..., :D], qkv_bf[..., D:2 * D], qkv_bf[..., 2 * D:],
                     s_wo_ref[0], num_heads=num_heads, causal=True)
    y1 = _layer_norm(attn + s_bo_ref[0] + x, g1_ref[0], bt1_ref[0], eps)

    # --- cross-attention (Q from decoder, K/V from encoder output) + Add&LN ---
    q = jnp.dot(y1.astype(jnp.bfloat16), c_wq_ref[0],
                preferred_element_type=jnp.float32) + c_bq_ref[0]
    kv = jnp.dot(enc_ref[...].astype(jnp.bfloat16), c_wkv_ref[0],
                 preferred_element_type=jnp.float32) + c_bkv_ref[0]
    q_bf = q.astype(jnp.bfloat16)
    kv_bf = kv.astype(jnp.bfloat16)
    attn2 = _mha_core(q_bf, kv_bf[..., :D], kv_bf[..., D:],
                      c_wo_ref[0], num_heads=num_heads, causal=False)
    y2 = _layer_norm(attn2 + c_bo_ref[0] + y1, g2_ref[0], bt2_ref[0], eps)

    # --- FFN + Add&LN ---
    out = _ffn_addln(y2, w1_ref[0], b1_ref[0], w2_ref[0], b2_ref[0],
                     g3_ref[0], bt3_ref[0], eps)
    o_ref[...] = out.astype(o_ref.dtype)


# ----------------------------------------------------------------------------
# pallas_call wrappers
# ----------------------------------------------------------------------------
def _full_spec(shape):
    n = len(shape)
    return pl.BlockSpec(shape, lambda l, n=n: (0,) * n)


def _layer_spec(*tail):
    n = len(tail)
    return pl.BlockSpec((1,) + tuple(tail), lambda l, n=n: (l,) + (0,) * n)


def encoder_stack(p, x, *, num_heads, eps):
    """Full encoder stack in ONE pallas_call.  x: [B, S, D] -> [B, S, D]."""
    B, S, D = x.shape
    L = p["wqkv"].shape[0]
    F = p["w1"].shape[2]
    H = num_heads
    dh = D // H
    kernel = functools.partial(_encoder_stack_kernel, num_heads=num_heads, eps=eps)
    return pl.pallas_call(
        kernel,
        out_shape=jax.ShapeDtypeStruct((B, S, D), jnp.float32),
        grid=(L,),
        in_specs=[
            _full_spec((B, S, D)),
            _layer_spec(D, 3 * D), _layer_spec(1, 3 * D),
            _layer_spec(H, dh, D), _layer_spec(1, D),
            _layer_spec(1, D), _layer_spec(1, D),
            _layer_spec(D, F), _layer_spec(1, F),
            _layer_spec(F, D), _layer_spec(1, D),
            _layer_spec(1, D), _layer_spec(1, D),
        ],
        out_specs=_full_spec((B, S, D)),
        compiler_params=pltpu.CompilerParams(dimension_semantics=("arbitrary",)),
    )(x, p["wqkv"], p["bqkv"], p["wo"], p["bo"], p["g1"], p["bt1"],
      p["w1"], p["b1"], p["w2"], p["b2"], p["g2"], p["bt2"])


def decoder_stack(p, x, enc, *, num_heads, eps):
    """Full decoder stack in ONE pallas_call.  x, enc: [B, S, D] -> [B, S, D]."""
    B, S, D = x.shape
    L = p["s_wqkv"].shape[0]
    F = p["w1"].shape[2]
    H = num_heads
    dh = D // H
    kernel = functools.partial(_decoder_stack_kernel, num_heads=num_heads, eps=eps)
    return pl.pallas_call(
        kernel,
        out_shape=jax.ShapeDtypeStruct((B, S, D), jnp.float32),
        grid=(L,),
        in_specs=[
            _full_spec((B, S, D)),                      # decoder input embedding
            _full_spec((B, S, D)),                      # encoder output (resident)
            _layer_spec(D, 3 * D), _layer_spec(1, 3 * D),
            _layer_spec(H, dh, D), _layer_spec(1, D),
            _layer_spec(1, D), _layer_spec(1, D),
            _layer_spec(D, D), _layer_spec(1, D),
            _layer_spec(D, 2 * D), _layer_spec(1, 2 * D),
            _layer_spec(H, dh, D), _layer_spec(1, D),
            _layer_spec(1, D), _layer_spec(1, D),
            _layer_spec(D, F), _layer_spec(1, F),
            _layer_spec(F, D), _layer_spec(1, D),
            _layer_spec(1, D), _layer_spec(1, D),
        ],
        out_specs=_full_spec((B, S, D)),
        compiler_params=pltpu.CompilerParams(dimension_semantics=("arbitrary",)),
    )(x, enc,
      p["s_wqkv"], p["s_bqkv"], p["s_wo"], p["s_bo"], p["g1"], p["bt1"],
      p["c_wq"], p["c_bq"], p["c_wkv"], p["c_bkv"], p["c_wo"], p["c_bo"],
      p["g2"], p["bt2"],
      p["w1"], p["b1"], p["w2"], p["b2"], p["g3"], p["bt3"])


# ----------------------------------------------------------------------------
# Model glue (plain JAX): parameter setup, embeddings
# ----------------------------------------------------------------------------
def init_params(key, d_model, ffn_hidden, blocks, eng_vocab, kan_vocab, num_heads):
    D, F, L, H = d_model, ffn_hidden, blocks, num_heads
    dh = D // H
    scale = 1.0 / math.sqrt(dh)

    def nrm(k, shape):
        return jax.random.normal(k, shape, jnp.float32) * 0.02

    ks = jax.random.split(key, 12)
    # NOTE: 1/sqrt(dh) is folded into the Q projection weights (biases are zero, so the
    # Q-bias does not need rescaling; if nonzero biases are ever loaded, scale them too).
    enc = {
        "wqkv": jnp.concatenate([nrm(ks[0], (L, D, D)) * scale,
                                 nrm(ks[1], (L, D, D)),
                                 nrm(ks[2], (L, D, D))], axis=2).astype(jnp.bfloat16),
        "bqkv": jnp.zeros((L, 1, 3 * D), jnp.float32),
        "wo": nrm(ks[3], (L, D, D)).reshape(L, H, dh, D).astype(jnp.bfloat16),
        "bo": jnp.zeros((L, 1, D), jnp.float32),
        "g1": jnp.ones((L, 1, D), jnp.float32), "bt1": jnp.zeros((L, 1, D), jnp.float32),
        "w1": nrm(ks[4], (L, D, F)).astype(jnp.bfloat16),
        "b1": jnp.zeros((L, 1, F), jnp.float32),
        "w2": nrm(ks[5], (L, F, D)).astype(jnp.bfloat16),
        "b2": jnp.zeros((L, 1, D), jnp.float32),
        "g2": jnp.ones((L, 1, D), jnp.float32), "bt2": jnp.zeros((L, 1, D), jnp.float32),
    }
    dks = jax.random.split(ks[6], 9)
    dec = {
        "s_wqkv": jnp.concatenate([nrm(dks[0], (L, D, D)) * scale,
                                   nrm(dks[1], (L, D, D)),
                                   nrm(dks[2], (L, D, D))], axis=2).astype(jnp.bfloat16),
        "s_bqkv": jnp.zeros((L, 1, 3 * D), jnp.float32),
        "s_wo": nrm(dks[3], (L, D, D)).reshape(L, H, dh, D).astype(jnp.bfloat16),
        "s_bo": jnp.zeros((L, 1, D), jnp.float32),
        "g1": jnp.ones((L, 1, D), jnp.float32), "bt1": jnp.zeros((L, 1, D), jnp.float32),
        "c_wq": (nrm(dks[4], (L, D, D)) * scale).astype(jnp.bfloat16),
        "c_bq": jnp.zeros((L, 1, D), jnp.float32),
        "c_wkv": jnp.concatenate([nrm(dks[5], (L, D, D)),
                                  nrm(dks[6], (L, D, D))], axis=2).astype(jnp.bfloat16),
        "c_bkv": jnp.zeros((L, 1, 2 * D), jnp.float32),
        "c_wo": nrm(dks[7], (L, D, D)).reshape(L, H, dh, D).astype(jnp.bfloat16),
        "c_bo": jnp.zeros((L, 1, D), jnp.float32),
        "g2": jnp.ones((L, 1, D), jnp.float32), "bt2": jnp.zeros((L, 1, D), jnp.float32),
        "w1": nrm(ks[7], (L, D, F)).astype(jnp.bfloat16),
        "b1": jnp.zeros((L, 1, F), jnp.float32),
        "w2": nrm(ks[8], (L, F, D)).astype(jnp.bfloat16),
        "b2": jnp.zeros((L, 1, D), jnp.float32),
        "g3": jnp.ones((L, 1, D), jnp.float32), "bt3": jnp.zeros((L, 1, D), jnp.float32),
    }
    return {
        "eng_table": nrm(ks[9], (eng_vocab, d_model)),
        "kan_table": nrm(ks[10], (kan_vocab, d_model)),
        "encoder": enc,
        "decoder": dec,
    }


def positional_encoding(S, D):
    pos = jnp.arange(S, dtype=jnp.float32)[:, None]
    i = jnp.arange(0, D, 2, dtype=jnp.float32)
    denom = jnp.power(10000.0, i / D)
    pe = jnp.zeros((S, D), jnp.float32)
    pe = pe.at[:, 0::2].set(jnp.sin(pos / denom))
    pe = pe.at[:, 1::2].set(jnp.cos(pos / denom))
    return pe


def sentence_embedding(tokens, table, pe):
    # token lookup (gather) + positional encoding; dropout = identity (eval mode).
    emb = jnp.take(table, tokens, axis=0)            # [B, S, D]
    return emb + pe[None, :, :]


def transformer_forward(params, english_ids, kannada_ids, *, num_heads, eps, pe):
    enc_in = sentence_embedding(english_ids, params["eng_table"], pe)
    enc_out = encoder_stack(params["encoder"], enc_in, num_heads=num_heads, eps=eps)
    dec_in = sentence_embedding(kannada_ids, params["kan_table"], pe)
    dec_out = decoder_stack(params["decoder"], dec_in, enc_out,
                            num_heads=num_heads, eps=eps)
    return dec_out


# ----------------------------------------------------------------------------
# Main
# ----------------------------------------------------------------------------
if __name__ == "__main__":
    d_model = 32
    att_heads = 4
    ffn_hidden = 64
    blocks = 2
    eps = 1e-5
    batch_size = 2
    max_sequence_length = 8
    eng_vocab = 50
    kan_vocab = 60

    root = jax.random.PRNGKey(0)
    k_eng, k_kan, k_params = jax.random.split(root, 3)
    english = jax.random.randint(k_eng, (batch_size, max_sequence_length), 0, eng_vocab,
                                 dtype=jnp.int32)
    kannada = jax.random.randint(k_kan, (batch_size, max_sequence_length), 0, kan_vocab,
                                 dtype=jnp.int32)

    params = init_params(k_params, d_model, ffn_hidden, blocks,
                         eng_vocab, kan_vocab, att_heads)
    pe = positional_encoding(max_sequence_length, d_model)

    fwd = jax.jit(functools.partial(transformer_forward,
                                    num_heads=att_heads, eps=eps, pe=pe))
    out = fwd(params, english, kannada)
    out = jax.block_until_ready(out)
    assert out.shape == (batch_size, max_sequence_length, d_model)
    assert bool(jnp.all(jnp.isfinite(out)))
    print("KERNEL_OK")
</pallas_src>

<mosaic_0001>
module attributes {stable_mosaic.version = 11 : i64} {
  func.func @_encoder_stack_kernel(%arg0: i32, %arg1: memref<2x8x32xf32, #tpu.memory_space<vmem>>, %arg2: memref<1x32x96xbf16, #tpu.memory_space<vmem>>, %arg3: memref<1x1x96xf32, #tpu.memory_space<vmem>>, %arg4: memref<1x4x8x32xbf16, #tpu.memory_space<vmem>>, %arg5: memref<1x1x32xf32, #tpu.memory_space<vmem>>, %arg6: memref<1x1x32xf32, #tpu.memory_space<vmem>>, %arg7: memref<1x1x32xf32, #tpu.memory_space<vmem>>, %arg8: memref<1x32x64xbf16, #tpu.memory_space<vmem>>, %arg9: memref<1x1x64xf32, #tpu.memory_space<vmem>>, %arg10: memref<1x64x32xbf16, #tpu.memory_space<vmem>>, %arg11: memref<1x1x32xf32, #tpu.memory_space<vmem>>, %arg12: memref<1x1x32xf32, #tpu.memory_space<vmem>>, %arg13: memref<1x1x32xf32, #tpu.memory_space<vmem>>, %arg14: memref<2x8x32xf32, #tpu.memory_space<vmem>>) attributes {dimension_semantics = [#tpu.dimension_semantics<arbitrary>], iteration_bounds = array<i64: 2>, scalar_prefetch = 0 : i64, scratch_operands = 0 : i64, tpu.core_type = #tpu.core_type<tc>, window_params = [{pipeline_mode = #tpu.pipeline_mode<synchronous>, transform_indices = @transform_0, window_bounds = array<i64: 2, 8, 32>}, {transform_indices = @transform_1, window_bounds = array<i64: 1, 32, 96>}, {transform_indices = @transform_2, window_bounds = array<i64: 1, 1, 96>}, {transform_indices = @transform_3, window_bounds = array<i64: 1, 4, 8, 32>}, {transform_indices = @transform_4, window_bounds = array<i64: 1, 1, 32>}, {transform_indices = @transform_5, window_bounds = array<i64: 1, 1, 32>}, {transform_indices = @transform_6, window_bounds = array<i64: 1, 1, 32>}, {transform_indices = @transform_7, window_bounds = array<i64: 1, 32, 64>}, {transform_indices = @transform_8, window_bounds = array<i64: 1, 1, 64>}, {transform_indices = @transform_9, window_bounds = array<i64: 1, 64, 32>}, {transform_indices = @transform_10, window_bounds = array<i64: 1, 1, 32>}, {transform_indices = @transform_11, window_bounds = array<i64: 1, 1, 32>}, {transform_indices = @transform_12, window_bounds = array<i64: 1, 1, 32>}, {pipeline_mode = #tpu.pipeline_mode<synchronous>, transform_indices = @transform_13, window_bounds = array<i64: 2, 8, 32>}]} {
    %c0_i32 = arith.constant 0 : i32
    %0 = arith.cmpi eq, %arg0, %c0_i32 : i32
    %1 = arith.extui %0 : i1 to i32
    %c0_i32_0 = arith.constant 0 : i32
    %2 = arith.cmpi ne, %1, %c0_i32_0 : i32
    scf.if %2 {
      %c0_77 = arith.constant 0 : index
      %c0_78 = arith.constant 0 : index
      %c0_79 = arith.constant 0 : index
      %188 = vector.load %arg1[%c0_77, %c0_78, %c0_79] : memref<2x8x32xf32, #tpu.memory_space<vmem>>, vector<2x8x32xf32>
      %c0_80 = arith.constant 0 : index
      %c0_81 = arith.constant 0 : index
      %c0_82 = arith.constant 0 : index
      %189 = vector.load %arg14[%c0_80, %c0_81, %c0_82] : memref<2x8x32xf32, #tpu.memory_space<vmem>>, vector<2x8x32xf32>
      tpu.vector_store %arg14[%c0_80, %c0_81, %c0_82], %188 {strides = array<i32>} : memref<2x8x32xf32, #tpu.memory_space<vmem>>, vector<2x8x32xf32>,
    } else {
    }
    %c0 = arith.constant 0 : index
    %c0_1 = arith.constant 0 : index
    %c0_2 = arith.constant 0 : index
    %3 = vector.load %arg14[%c0, %c0_1, %c0_2] : memref<2x8x32xf32, #tpu.memory_space<vmem>>, vector<2x8x32xf32>
    %4 = arith.truncf %3 : vector<2x8x32xf32> to vector<2x8x32xbf16>
    %c0_3 = arith.constant 0 : index
    %c0_4 = arith.constant 0 : index
    %c0_5 = arith.constant 0 : index
    %5 = vector.load %arg2[%c0_3, %c0_4, %c0_5] : memref<1x32x96xbf16, #tpu.memory_space<vmem>>, vector<1x32x96xbf16>
    %6 = vector.shape_cast %5 : vector<1x32x96xbf16> to vector<32x96xbf16>
    %cst = arith.constant dense<0.000000e+00> : vector<2x8x96xf32>
    %7 = tpu.matmul %4, %6, %cst {dimension_numbers = #tpu.dot_dimension_numbers<[2], [0], [0, 1], [1], [0, 0, 0, 1, 1, 1], [], []>} : vector<2x8x32xbf16>, vector<32x96xbf16>, vector<2x8x96xf32> -> vector<2x8x96xf32>
    %c0_6 = arith.constant 0 : index
    %c0_7 = arith.constant 0 : index
    %c0_8 = arith.constant 0 : index
    %8 = vector.load %arg3[%c0_6, %c0_7, %c0_8] : memref<1x1x96xf32, #tpu.memory_space<vmem>>, vector<1x1x96xf32>
    %9 = vector.shape_cast %8 : vector<1x1x96xf32> to vector<1x96xf32>
    %10 = vector.shape_cast %9 : vector<1x96xf32> to vector<1x1x96xf32>
    %11 = vector.broadcast %10 : vector<1x1x96xf32> to vector<2x8x96xf32>
    %12 = arith.addf %7, %11 : vector<2x8x96xf32>
    %13 = arith.truncf %12 : vector<2x8x96xf32> to vector<2x8x96xbf16>
    %14 = vector.extract_strided_slice %13 {offsets = [0, 0, 0], sizes = [2, 8, 32], strides = [1, 1, 1]} : vector<2x8x96xbf16> to vector<2x8x32xbf16>
    %15 = vector.extract_strided_slice %13 {offsets = [0, 0, 32], sizes = [2, 8, 32], strides = [1, 1, 1]} : vector<2x8x96xbf16> to vector<2x8x32xbf16>
    %16 = vector.extract_strided_slice %13 {offsets = [0, 0, 64], sizes = [2, 8, 32], strides = [1, 1, 1]} : vector<2x8x96xbf16> to vector<2x8x32xbf16>
    %c0_9 = arith.constant 0 : index
    %c0_10 = arith.constant 0 : index
    %c0_11 = arith.constant 0 : index
    %c0_12 = arith.constant 0 : index
    %17 = vector.load %arg4[%c0_9, %c0_10, %c0_11, %c0_12] : memref<1x4x8x32xbf16, #tpu.memory_space<vmem>>, vector<1x4x8x32xbf16>
    %18 = vector.shape_cast %17 : vector<1x4x8x32xbf16> to vector<4x8x32xbf16>
    %cst_13 = arith.constant 0.000000e+00 : f32
    %19 = vector.broadcast %cst_13 : f32 to vector<2x8x32xf32>
    %20 = vector.extract_strided_slice %14 {offsets = [0, 0, 0], sizes = [2, 8, 8], strides = [1, 1, 1]} : vector<2x8x32xbf16> to vector<2x8x8xbf16>
    %21 = vector.extract_strided_slice %15 {offsets = [0, 0, 0], sizes = [2, 8, 8], strides = [1, 1, 1]} : vector<2x8x32xbf16> to vector<2x8x8xbf16>
    %22 = vector.extract_strided_slice %16 {offsets = [0, 0, 0], sizes = [2, 8, 8], strides = [1, 1, 1]} : vector<2x8x32xbf16> to vector<2x8x8xbf16>
    "tpu.trace_start"() <{level = 10 : i32, message = "bqd,bkd->bqk"}> : () -> ()
    %cst_14 = arith.constant dense<0.000000e+00> : vector<2x8x8xf32>
    %23 = tpu.matmul %20, %21, %cst_14 {dimension_numbers = #tpu.dot_dimension_numbers<[2], [2], [1], [1], [0, 0, 0, 1, 1, 1], [0], [0]>} : vector<2x8x8xbf16>, vector<2x8x8xbf16>, vector<2x8x8xf32> -> vector<2x8x8xf32>
    "tpu.trace_stop"() : () -> ()
    %cst_15 = arith.constant dense<0xFF800000> : vector<2x8xf32>
    %24 = vector.multi_reduction <maximumf>, %23, %cst_15 [2] : vector<2x8x8xf32> to vector<2x8xf32>
    %25 = vector.shape_cast %24 : vector<2x8xf32> to vector<2x8x1xf32>
    %26 = vector.broadcast %25 : vector<2x8x1xf32> to vector<2x8x8xf32>
    %27 = arith.subf %23, %26 : vector<2x8x8xf32>
    %28 = math.exp %27 : vector<2x8x8xf32>
    %cst_16 = arith.constant dense<0.000000e+00> : vector<2x8xf32>
    %29 = vector.multi_reduction <add>, %28, %cst_16 [2] : vector<2x8x8xf32> to vector<2x8xf32>
    %30 = vector.shape_cast %29 : vector<2x8xf32> to vector<2x8x1xf32>
    %31 = tpu.reciprocal %30 {approx = true} : vector<2x8x1xf32> -> vector<2x8x1xf32>
    %32 = vector.broadcast %31 : vector<2x8x1xf32> to vector<2x8x8xf32>
    %33 = arith.mulf %28, %32 : vector<2x8x8xf32>
    %34 = arith.truncf %33 : vector<2x8x8xf32> to vector<2x8x8xbf16>
    "tpu.trace_start"() <{level = 10 : i32, message = "bqk,bkd->bqd"}> : () -> ()
    %cst_17 = arith.constant dense<0.000000e+00> : vector<2x8x8xf32>
    %35 = tpu.matmul %34, %22, %cst_17 {dimension_numbers = #tpu.dot_dimension_numbers<[2], [1], [1], [2], [0, 0, 0, 1, 1, 2], [0], [0]>} : vector<2x8x8xbf16>, vector<2x8x8xbf16>, vector<2x8x8xf32> -> vector<2x8x8xf32>
    "tpu.trace_stop"() : () -> ()
    %36 = arith.truncf %35 : vector<2x8x8xf32> to vector<2x8x8xbf16>
    %37 = vector.extract_strided_slice %18 {offsets = [0, 0, 0], sizes = [1, 8, 32], strides = [1, 1, 1]} : vector<4x8x32xbf16> to vector<1x8x32xbf16>
    %38 = vector.shape_cast %37 : vector<1x8x32xbf16> to vector<8x32xbf16>
    %cst_18 = arith.constant dense<0.000000e+00> : vector<2x8x32xf32>
    %39 = tpu.matmul %36, %38, %cst_18 {dimension_numbers = #tpu.dot_dimension_numbers<[2], [0], [0, 1], [1], [0, 0, 0, 1, 1, 1], [], []>} : vector<2x8x8xbf16>, vector<8x32xbf16>, vector<2x8x32xf32> -> vector<2x8x32xf32>
    %40 = arith.addf %19, %39 : vector<2x8x32xf32>
    %41 = vector.extract_strided_slice %14 {offsets = [0, 0, 8], sizes = [2, 8, 8], strides = [1, 1, 1]} : vector<2x8x32xbf16> to vector<2x8x8xbf16>
    %42 = vector.extract_strided_slice %15 {offsets = [0, 0, 8], sizes = [2, 8, 8], strides = [1, 1, 1]} : vector<2x8x32xbf16> to vector<2x8x8xbf16>
    %43 = vector.extract_strided_slice %16 {offsets = [0, 0, 8], sizes = [2, 8, 8], strides = [1, 1, 1]} : vector<2x8x32xbf16> to vector<2x8x8xbf16>
    "tpu.trace_start"() <{level = 10 : i32, message = "bqd,bkd->bqk"}> : () -> ()
    %cst_19 = arith.constant dense<0.000000e+00> : vector<2x8x8xf32>
    %44 = tpu.matmul %41, %42, %cst_19 {dimension_numbers = #tpu.dot_dimension_numbers<[2], [2], [1], [1], [0, 0, 0, 1, 1, 1], [0], [0]>} : vector<2x8x8xbf16>, vector<2x8x8xbf16>, vector<2x8x8xf32> -> vector<2x8x8xf32>
    "tpu.trace_stop"() : () -> ()
    %cst_20 = arith.constant dense<0xFF800000> : vector<2x8xf32>
    %45 = vector.multi_reduction <maximumf>, %44, %cst_20 [2] : vector<2x8x8xf32> to vector<2x8xf32>
    %46 = vector.shape_cast %45 : vector<2x8xf32> to vector<2x8x1xf32>
    %47 = vector.broadcast %46 : vector<2x8x1xf32> to vector<2x8x8xf32>
    %48 = arith.subf %44, %47 : vector<2x8x8xf32>
    %49 = math.exp %48 : vector<2x8x8xf32>
    %cst_21 = arith.constant dense<0.000000e+00> : vector<2x8xf32>
    %50 = vector.multi_reduction <add>, %49, %cst_21 [2] : vector<2x8x8xf32> to vector<2x8xf32>
    %51 = vector.shape_cast %50 : vector<2x8xf32> to vector<2x8x1xf32>
    %52 = tpu.reciprocal %51 {approx = true} : vector<2x8x1xf32> -> vector<2x8x1xf32>
    %53 = vector.broadcast %52 : vector<2x8x1xf32> to vector<2x8x8xf32>
    %54 = arith.mulf %49, %53 : vector<2x8x8xf32>
    %55 = arith.truncf %54 : vector<2x8x8xf32> to vector<2x8x8xbf16>
    "tpu.trace_start"() <{level = 10 : i32, message = "bqk,bkd->bqd"}> : () -> ()
    %cst_22 = arith.constant dense<0.000000e+00> : vector<2x8x8xf32>
    %56 = tpu.matmul %55, %43, %cst_22 {dimension_numbers = #tpu.dot_dimension_numbers<[2], [1], [1], [2], [0, 0, 0, 1, 1, 2], [0], [0]>} : vector<2x8x8xbf16>, vector<2x8x8xbf16>, vector<2x8x8xf32> -> vector<2x8x8xf32>
    "tpu.trace_stop"() : () -> ()
    %57 = arith.truncf %56 : vector<2x8x8xf32> to vector<2x8x8xbf16>
    %58 = vector.extract_strided_slice %18 {offsets = [1, 0, 0], sizes = [1, 8, 32], strides = [1, 1, 1]} : vector<4x8x32xbf16> to vector<1x8x32xbf16>
    %59 = vector.shape_cast %58 : vector<1x8x32xbf16> to vector<8x32xbf16>
    %cst_23 = arith.constant dense<0.000000e+00> : vector<2x8x32xf32>
    %60 = tpu.matmul %57, %59, %cst_23 {dimension_numbers = #tpu.dot_dimension_numbers<[2], [0], [0, 1], [1], [0, 0, 0, 1, 1, 1], [], []>} : vector<2x8x8xbf16>, vector<8x32xbf16>, vector<2x8x32xf32> -> vector<2x8x32xf32>
    %61 = arith.addf %40, %60 : vector<2x8x32xf32>
    %62 = vector.extract_strided_slice %14 {offsets = [0, 0, 16], sizes = [2, 8, 8], strides = [1, 1, 1]} : vector<2x8x32xbf16> to vector<2x8x8xbf16>
    %63 = vector.extract_strided_slice %15 {offsets = [0, 0, 16], sizes = [2, 8, 8], strides = [1, 1, 1]} : vector<2x8x32xbf16> to vector<2x8x8xbf16>
    %64 = vector.extract_strided_slice %16 {offsets = [0, 0, 16], sizes = [2, 8, 8], strides = [1, 1, 1]} : vector<2x8x32xbf16> to vector<2x8x8xbf16>
    "tpu.trace_start"() <{level = 10 : i32, message = "bqd,bkd->bqk"}> : () -> ()
    %cst_24 = arith.constant dense<0.000000e+00> : vector<2x8x8xf32>
    %65 = tpu.matmul %62, %63, %cst_24 {dimension_numbers = #tpu.dot_dimension_numbers<[2], [2], [1], [1], [0, 0, 0, 1, 1, 1], [0], [0]>} : vector<2x8x8xbf16>, vector<2x8x8xbf16>, vector<2x8x8xf32> -> vector<2x8x8xf32>
    "tpu.trace_stop"() : () -> ()
    %cst_25 = arith.constant dense<0xFF800000> : vector<2x8xf32>
    %66 = vector.multi_reduction <maximumf>, %65, %cst_25 [2] : vector<2x8x8xf32> to vector<2x8xf32>
    %67 = vector.shape_cast %66 : vector<2x8xf32> to vector<2x8x1xf32>
    %68 = vector.broadcast %67 : vector<2x8x1xf32> to vector<2x8x8xf32>
    %69 = arith.subf %65, %68 : vector<2x8x8xf32>
    %70 = math.exp %69 : vector<2x8x8xf32>
    %cst_26 = arith.constant dense<0.000000e+00> : vector<2x8xf32>
    %71 = vector.multi_reduction <add>, %70, %cst_26 [2] : vector<2x8x8xf32> to vector<2x8xf32>
    %72 = vector.shape_cast %71 : vector<2x8xf32> to vector<2x8x1xf32>
    %73 = tpu.reciprocal %72 {approx = true} : vector<2x8x1xf32> -> vector<2x8x1xf32>
    %74 = vector.broadcast %73 : vector<2x8x1xf32> to vector<2x8x8xf32>
    %75 = arith.mulf %70, %74 : vector<2x8x8xf32>
    %76 = arith.truncf %75 : vector<2x8x8xf32> to vector<2x8x8xbf16>
    "tpu.trace_start"() <{level = 10 : i32, message = "bqk,bkd->bqd"}> : () -> ()
    %cst_27 = arith.constant dense<0.000000e+00> : vector<2x8x8xf32>
    %77 = tpu.matmul %76, %64, %cst_27 {dimension_numbers = #tpu.dot_dimension_numbers<[2], [1], [1], [2], [0, 0, 0, 1, 1, 2], [0], [0]>} : vector<2x8x8xbf16>, vector<2x8x8xbf16>, vector<2x8x8xf32> -> vector<2x8x8xf32>
    "tpu.trace_stop"() : () -> ()
    %78 = arith.truncf %77 : vector<2x8x8xf32> to vector<2x8x8xbf16>
    %79 = vector.extract_strided_slice %18 {offsets = [2, 0, 0], sizes = [1, 8, 32], strides = [1, 1, 1]} : vector<4x8x32xbf16> to vector<1x8x32xbf16>
    %80 = vector.shape_cast %79 : vector<1x8x32xbf16> to vector<8x32xbf16>
    %cst_28 = arith.constant dense<0.000000e+00> : vector<2x8x32xf32>
    %81 = tpu.matmul %78, %80, %cst_28 {dimension_numbers = #tpu.dot_dimension_numbers<[2], [0], [0, 1], [1], [0, 0, 0, 1, 1, 1], [], []>} : vector<2x8x8xbf16>, vector<8x32xbf16>, vector<2x8x32xf32> -> vector<2x8x32xf32>
    %82 = arith.addf %61, %81 : vector<2x8x32xf32>
    %83 = vector.extract_strided_slice %14 {offsets = [0, 0, 24], sizes = [2, 8, 8], strides = [1, 1, 1]} : vector<2x8x32xbf16> to vector<2x8x8xbf16>
    %84 = vector.extract_strided_slice %15 {offsets = [0, 0, 24], sizes = [2, 8, 8], strides = [1, 1, 1]} : vector<2x8x32xbf16> to vector<2x8x8xbf16>
    %85 = vector.extract_strided_slice %16 {offsets = [0, 0, 24], sizes = [2, 8, 8], strides = [1, 1, 1]} : vector<2x8x32xbf16> to vector<2x8x8xbf16>
    "tpu.trace_start"() <{level = 10 : i32, message = "bqd,bkd->bqk"}> : () -> ()
    %cst_29 = arith.constant dense<0.000000e+00> : vector<2x8x8xf32>
    %86 = tpu.matmul %83, %84, %cst_29 {dimension_numbers = #tpu.dot_dimension_numbers<[2], [2], [1], [1], [0, 0, 0, 1, 1, 1], [0], [0]>} : vector<2x8x8xbf16>, vector<2x8x8xbf16>, vector<2x8x8xf32> -> vector<2x8x8xf32>
    "tpu.trace_stop"() : () -> ()
    %cst_30 = arith.constant dense<0xFF800000> : vector<2x8xf32>
    %87 = vector.multi_reduction <maximumf>, %86, %cst_30 [2] : vector<2x8x8xf32> to vector<2x8xf32>
    %88 = vector.shape_cast %87 : vector<2x8xf32> to vector<2x8x1xf32>
    %89 = vector.broadcast %88 : vector<2x8x1xf32> to vector<2x8x8xf32>
    %90 = arith.subf %86, %89 : vector<2x8x8xf32>
    %91 = math.exp %90 : vector<2x8x8xf32>
    %cst_31 = arith.constant dense<0.000000e+00> : vector<2x8xf32>
    %92 = vector.multi_reduction <add>, %91, %cst_31 [2] : vector<2x8x8xf32> to vector<2x8xf32>
    %93 = vector.shape_cast %92 : vector<2x8xf32> to vector<2x8x1xf32>
    %94 = tpu.reciprocal %93 {approx = true} : vector<2x8x1xf32> -> vector<2x8x1xf32>
    %95 = vector.broadcast %94 : vector<2x8x1xf32> to vector<2x8x8xf32>
    %96 = arith.mulf %91, %95 : vector<2x8x8xf32>
    %97 = arith.truncf %96 : vector<2x8x8xf32> to vector<2x8x8xbf16>
    "tpu.trace_start"() <{level = 10 : i32, message = "bqk,bkd->bqd"}> : () -> ()
    %cst_32 = arith.constant dense<0.000000e+00> : vector<2x8x8xf32>
    %98 = tpu.matmul %97, %85, %cst_32 {dimension_numbers = #tpu.dot_dimension_numbers<[2], [1], [1], [2], [0, 0, 0, 1, 1, 2], [0], [0]>} : vector<2x8x8xbf16>, vector<2x8x8xbf16>, vector<2x8x8xf32> -> vector<2x8x8xf32>
    "tpu.trace_stop"() : () -> ()
    %99 = arith.truncf %98 : vector<2x8x8xf32> to vector<2x8x8xbf16>
    %100 = vector.extract_strided_slice %18 {offsets = [3, 0, 0], sizes = [1, 8, 32], strides = [1, 1, 1]} : vector<4x8x32xbf16> to vector<1x8x32xbf16>
    %101 = vector.shape_cast %100 : vector<1x8x32xbf16> to vector<8x32xbf16>
    %cst_33 = arith.constant dense<0.000000e+00> : vector<2x8x32xf32>
    %102 = tpu.matmul %99, %101, %cst_33 {dimension_numbers = #tpu.dot_dimension_numbers<[2], [0], [0, 1], [1], [0, 0, 0, 1, 1, 1], [], []>} : vector<2x8x8xbf16>, vector<8x32xbf16>, vector<2x8x32xf32> -> vector<2x8x32xf32>
    %103 = arith.addf %82, %102 : vector<2x8x32xf32>
    %c0_34 = arith.constant 0 : index
    %c0_35 = arith.constant 0 : index
    %c0_36 = arith.constant 0 : index
    %104 = vector.load %arg5[%c0_34, %c0_35, %c0_36] : memref<1x1x32xf32, #tpu.memory_space<vmem>>, vector<1x1x32xf32>
    %105 = vector.shape_cast %104 : vector<1x1x32xf32> to vector<1x32xf32>
    %106 = vector.shape_cast %105 : vector<1x32xf32> to vector<1x1x32xf32>
    %107 = vector.broadcast %106 : vector<1x1x32xf32> to vector<2x8x32xf32>
    %108 = arith.addf %103, %107 : vector<2x8x32xf32>
    %109 = arith.addf %108, %3 : vector<2x8x32xf32>
    %c0_37 = arith.constant 0 : index
    %c0_38 = arith.constant 0 : index
    %c0_39 = arith.constant 0 : index
    %110 = vector.load %arg6[%c0_37, %c0_38, %c0_39] : memref<1x1x32xf32, #tpu.memory_space<vmem>>, vector<1x1x32xf32>
    %111 = vector.shape_cast %110 : vector<1x1x32xf32> to vector<1x32xf32>
    %c0_40 = arith.constant 0 : index
    %c0_41 = arith.constant 0 : index
    %c0_42 = arith.constant 0 : index
    %112 = vector.load %arg7[%c0_40, %c0_41, %c0_42] : memref<1x1x32xf32, #tpu.memory_space<vmem>>, vector<1x1x32xf32>
    %113 = vector.shape_cast %112 : vector<1x1x32xf32> to vector<1x32xf32>
    %cst_43 = arith.constant dense<0.000000e+00> : vector<2x8xf32>
    %114 = vector.multi_reduction <add>, %109, %cst_43 [2] : vector<2x8x32xf32> to vector<2x8xf32>
    %115 = vector.shape_cast %114 : vector<2x8xf32> to vector<2x8x1xf32>
    %cst_44 = arith.constant 3.200000e+01 : f32
    %116 = vector.broadcast %cst_44 : f32 to vector<2x8x1xf32>
    %117 = arith.divf %115, %116 : vector<2x8x1xf32>
    %118 = vector.broadcast %117 : vector<2x8x1xf32> to vector<2x8x32xf32>
    %119 = arith.subf %109, %118 : vector<2x8x32xf32>
    %120 = arith.mulf %119, %119 : vector<2x8x32xf32>
    %cst_45 = arith.constant dense<0.000000e+00> : vector<2x8xf32>
    %121 = vector.multi_reduction <add>, %120, %cst_45 [2] : vector<2x8x32xf32> to vector<2x8xf32>
    %122 = vector.shape_cast %121 : vector<2x8xf32> to vector<2x8x1xf32>
    %cst_46 = arith.constant 3.200000e+01 : f32
    %123 = vector.broadcast %cst_46 : f32 to vector<2x8x1xf32>
    %124 = arith.divf %122, %123 : vector<2x8x1xf32>
    %125 = vector.broadcast %117 : vector<2x8x1xf32> to vector<2x8x32xf32>
    %126 = arith.subf %109, %125 : vector<2x8x32xf32>
    %cst_47 = arith.constant 9.99999974E-6 : f32
    %127 = vector.broadcast %cst_47 : f32 to vector<2x8x1xf32>
    %128 = arith.addf %124, %127 : vector<2x8x1xf32>
    %129 = math.rsqrt %128 : vector<2x8x1xf32>
    %130 = vector.broadcast %129 : vector<2x8x1xf32> to vector<2x8x32xf32>
    %131 = arith.mulf %126, %130 : vector<2x8x32xf32>
    %132 = vector.shape_cast %111 : vector<1x32xf32> to vector<1x1x32xf32>
    %133 = vector.broadcast %132 : vector<1x1x32xf32> to vector<2x8x32xf32>
    %134 = arith.mulf %131, %133 : vector<2x8x32xf32>
    %135 = vector.shape_cast %113 : vector<1x32xf32> to vector<1x1x32xf32>
    %136 = vector.broadcast %135 : vector<1x1x32xf32> to vector<2x8x32xf32>
    %137 = arith.addf %134, %136 : vector<2x8x32xf32>
    %c0_48 = arith.constant 0 : index
    %c0_49 = arith.constant 0 : index
    %c0_50 = arith.constant 0 : index
    %138 = vector.load %arg8[%c0_48, %c0_49, %c0_50] : memref<1x32x64xbf16, #tpu.memory_space<vmem>>, vector<1x32x64xbf16>
    %139 = vector.shape_cast %138 : vector<1x32x64xbf16> to vector<32x64xbf16>
    %c0_51 = arith.constant 0 : index
    %c0_52 = arith.constant 0 : index
    %c0_53 = arith.constant 0 : index
    %140 = vector.load %arg9[%c0_51, %c0_52, %c0_53] : memref<1x1x64xf32, #tpu.memory_space<vmem>>, vector<1x1x64xf32>
    %141 = vector.shape_cast %140 : vector<1x1x64xf32> to vector<1x64xf32>
    %c0_54 = arith.constant 0 : index
    %c0_55 = arith.constant 0 : index
    %c0_56 = arith.constant 0 : index
    %142 = vector.load %arg10[%c0_54, %c0_55, %c0_56] : memref<1x64x32xbf16, #tpu.memory_space<vmem>>, vector<1x64x32xbf16>
    %143 = vector.shape_cast %142 : vector<1x64x32xbf16> to vector<64x32xbf16>
    %c0_57 = arith.constant 0 : index
    %c0_58 = arith.constant 0 : index
    %c0_59 = arith.constant 0 : index
    %144 = vector.load %arg11[%c0_57, %c0_58, %c0_59] : memref<1x1x32xf32, #tpu.memory_space<vmem>>, vector<1x1x32xf32>
    %145 = vector.shape_cast %144 : vector<1x1x32xf32> to vector<1x32xf32>
    %c0_60 = arith.constant 0 : index
    %c0_61 = arith.constant 0 : index
    %c0_62 = arith.constant 0 : index
    %146 = vector.load %arg12[%c0_60, %c0_61, %c0_62] : memref<1x1x32xf32, #tpu.memory_space<vmem>>, vector<1x1x32xf32>
    %147 = vector.shape_cast %146 : vector<1x1x32xf32> to vector<1x32xf32>
    %c0_63 = arith.constant 0 : index
    %c0_64 = arith.constant 0 : index
    %c0_65 = arith.constant 0 : index
    %148 = vector.load %arg13[%c0_63, %c0_64, %c0_65] : memref<1x1x32xf32, #tpu.memory_space<vmem>>, vector<1x1x32xf32>
    %149 = vector.shape_cast %148 : vector<1x1x32xf32> to vector<1x32xf32>
    %150 = arith.truncf %137 : vector<2x8x32xf32> to vector<2x8x32xbf16>
    %cst_66 = arith.constant dense<0.000000e+00> : vector<2x8x64xf32>
    %151 = tpu.matmul %150, %139, %cst_66 {dimension_numbers = #tpu.dot_dimension_numbers<[2], [0], [0, 1], [1], [0, 0, 0, 1, 1, 1], [], []>} : vector<2x8x32xbf16>, vector<32x64xbf16>, vector<2x8x64xf32> -> vector<2x8x64xf32>
    %152 = vector.shape_cast %141 : vector<1x64xf32> to vector<1x1x64xf32>
    %153 = vector.broadcast %152 : vector<1x1x64xf32> to vector<2x8x64xf32>
    %154 = arith.addf %151, %153 : vector<2x8x64xf32>
    %cst_67 = arith.constant 0.000000e+00 : f32
    %155 = vector.broadcast %cst_67 : f32 to vector<2x8x64xf32>
    %156 = arith.maximumf %154, %155 : vector<2x8x64xf32>
    %157 = arith.truncf %156 : vector<2x8x64xf32> to vector<2x8x64xbf16>
    %cst_68 = arith.constant dense<0.000000e+00> : vector<2x8x32xf32>
    %158 = tpu.matmul %157, %143, %cst_68 {dimension_numbers = #tpu.dot_dimension_numbers<[2], [0], [0, 1], [1], [0, 0, 0, 1, 1, 1], [], []>} : vector<2x8x64xbf16>, vector<64x32xbf16>, vector<2x8x32xf32> -> vector<2x8x32xf32>
    %159 = vector.shape_cast %145 : vector<1x32xf32> to vector<1x1x32xf32>
    %160 = vector.broadcast %159 : vector<1x1x32xf32> to vector<2x8x32xf32>
    %161 = arith.addf %158, %160 : vector<2x8x32xf32>
    %162 = arith.addf %161, %137 : vector<2x8x32xf32>
    %cst_69 = arith.constant dense<0.000000e+00> : vector<2x8xf32>
    %163 = vector.multi_reduction <add>, %162, %cst_69 [2] : vector<2x8x32xf32> to vector<2x8xf32>
    %164 = vector.shape_cast %163 : vector<2x8xf32> to vector<2x8x1xf32>
    %cst_70 = arith.constant 3.200000e+01 : f32
    %165 = vector.broadcast %cst_70 : f32 to vector<2x8x1xf32>
    %166 = arith.divf %164, %165 : vector<2x8x1xf32>
    %167 = vector.broadcast %166 : vector<2x8x1xf32> to vector<2x8x32xf32>
    %168 = arith.subf %162, %167 : vector<2x8x32xf32>
    %169 = arith.mulf %168, %168 : vector<2x8x32xf32>
    %cst_71 = arith.constant dense<0.000000e+00> : vector<2x8xf32>
    %170 = vector.multi_reduction <add>, %169, %cst_71 [2] : vector<2x8x32xf32> to vector<2x8xf32>
    %171 = vector.shape_cast %170 : vector<2x8xf32> to vector<2x8x1xf32>
    %cst_72 = arith.constant 3.200000e+01 : f32
    %172 = vector.broadcast %cst_72 : f32 to vector<2x8x1xf32>
    %173 = arith.divf %171, %172 : vector<2x8x1xf32>
    %174 = vector.broadcast %166 : vector<2x8x1xf32> to vector<2x8x32xf32>
    %175 = arith.subf %162, %174 : vector<2x8x32xf32>
    %cst_73 = arith.constant 9.99999974E-6 : f32
    %176 = vector.broadcast %cst_73 : f32 to vector<2x8x1xf32>
    %177 = arith.addf %173, %176 : vector<2x8x1xf32>
    %178 = math.rsqrt %177 : vector<2x8x1xf32>
    %179 = vector.broadcast %178 : vector<2x8x1xf32> to vector<2x8x32xf32>
    %180 = arith.mulf %175, %179 : vector<2x8x32xf32>
    %181 = vector.shape_cast %147 : vector<1x32xf32> to vector<1x1x32xf32>
    %182 = vector.broadcast %181 : vector<1x1x32xf32> to vector<2x8x32xf32>
    %183 = arith.mulf %180, %182 : vector<2x8x32xf32>
    %184 = vector.shape_cast %149 : vector<1x32xf32> to vector<1x1x32xf32>
    %185 = vector.broadcast %184 : vector<1x1x32xf32> to vector<2x8x32xf32>
    %186 = arith.addf %183, %185 : vector<2x8x32xf32>
    %c0_74 = arith.constant 0 : index
    %c0_75 = arith.constant 0 : index
    %c0_76 = arith.constant 0 : index
    %187 = vector.load %arg14[%c0_74, %c0_75, %c0_76] : memref<2x8x32xf32, #tpu.memory_space<vmem>>, vector<2x8x32xf32>
    tpu.vector_store %arg14[%c0_74, %c0_75, %c0_76], %186 {strides = array<i32>} : memref<2x8x32xf32, #tpu.memory_space<vmem>>, vector<2x8x32xf32>,
    return
  }
  func.func @transform_0(%arg0: i32) -> (i32, i32, i32) {
    %c0_i32 = arith.constant 0 : i32
    %c0_i32_0 = arith.constant 0 : i32
    %c0_i32_1 = arith.constant 0 : i32
    %c0_i32_2 = arith.constant 0 : i32
    return %c0_i32, %c0_i32_0, %c0_i32_1 : i32, i32, i32
  }
  func.func @transform_1(%arg0: i32) -> (i32, i32, i32) {
    %c0_i32 = arith.constant 0 : i32
    %c0_i32_0 = arith.constant 0 : i32
    %c0_i32_1 = arith.constant 0 : i32
    return %arg0, %c0_i32, %c0_i32_0 : i32, i32, i32
  }
  func.func @transform_2(%arg0: i32) -> (i32, i32, i32) {
    %c0_i32 = arith.constant 0 : i32
    %c0_i32_0 = arith.constant 0 : i32
    %c0_i32_1 = arith.constant 0 : i32
    return %arg0, %c0_i32, %c0_i32_0 : i32, i32, i32
  }
  func.func @transform_3(%arg0: i32) -> (i32, i32, i32, i32) {
    %c0_i32 = arith.constant 0 : i32
    %c0_i32_0 = arith.constant 0 : i32
    %c0_i32_1 = arith.constant 0 : i32
    %c0_i32_2 = arith.constant 0 : i32
    return %arg0, %c0_i32, %c0_i32_0, %c0_i32_1 : i32, i32, i32, i32
  }
  func.func @transform_4(%arg0: i32) -> (i32, i32, i32) {
    %c0_i32 = arith.constant 0 : i32
    %c0_i32_0 = arith.constant 0 : i32
    %c0_i32_1 = arith.constant 0 : i32
    return %arg0, %c0_i32, %c0_i32_0 : i32, i32, i32
  }
  func.func @transform_5(%arg0: i32) -> (i32, i32, i32) {
    %c0_i32 = arith.constant 0 : i32
    %c0_i32_0 = arith.constant 0 : i32
    %c0_i32_1 = arith.constant 0 : i32
    return %arg0, %c0_i32, %c0_i32_0 : i32, i32, i32
  }
  func.func @transform_6(%arg0: i32) -> (i32, i32, i32) {
    %c0_i32 = arith.constant 0 : i32
    %c0_i32_0 = arith.constant 0 : i32
    %c0_i32_1 = arith.constant 0 : i32
    return %arg0, %c0_i32, %c0_i32_0 : i32, i32, i32
  }
  func.func @transform_7(%arg0: i32) -> (i32, i32, i32) {
    %c0_i32 = arith.constant 0 : i32
    %c0_i32_0 = arith.constant 0 : i32
    %c0_i32_1 = arith.constant 0 : i32
    return %arg0, %c0_i32, %c0_i32_0 : i32, i32, i32
  }
  func.func @transform_8(%arg0: i32) -> (i32, i32, i32) {
    %c0_i32 = arith.constant 0 : i32
    %c0_i32_0 = arith.constant 0 : i32
    %c0_i32_1 = arith.constant 0 : i32
    return %arg0, %c0_i32, %c0_i32_0 : i32, i32, i32
  }
  func.func @transform_9(%arg0: i32) -> (i32, i32, i32) {
    %c0_i32 = arith.constant 0 : i32
    %c0_i32_0 = arith.constant 0 : i32
    %c0_i32_1 = arith.constant 0 : i32
    return %arg0, %c0_i32, %c0_i32_0 : i32, i32, i32
  }
  func.func @transform_10(%arg0: i32) -> (i32, i32, i32) {
    %c0_i32 = arith.constant 0 : i32
    %c0_i32_0 = arith.constant 0 : i32
    %c0_i32_1 = arith.constant 0 : i32
    return %arg0, %c0_i32, %c0_i32_0 : i32, i32, i32
  }
  func.func @transform_11(%arg0: i32) -> (i32, i32, i32) {
    %c0_i32 = arith.constant 0 : i32
    %c0_i32_0 = arith.constant 0 : i32
    %c0_i32_1 = arith.constant 0 : i32
    return %arg0, %c0_i32, %c0_i32_0 : i32, i32, i32
  }
  func.func @transform_12(%arg0: i32) -> (i32, i32, i32) {
    %c0_i32 = arith.constant 0 : i32
    %c0_i32_0 = arith.constant 0 : i32
    %c0_i32_1 = arith.constant 0 : i32
    return %arg0, %c0_i32, %c0_i32_0 : i32, i32, i32
  }
  func.func @transform_13(%arg0: i32) -> (i32, i32, i32) {
    %c0_i32 = arith.constant 0 : i32
    %c0_i32_0 = arith.constant 0 : i32
    %c0_i32_1 = arith.constant 0 : i32
    %c0_i32_2 = arith.constant 0 : i32
    return %c0_i32, %c0_i32_0, %c0_i32_1 : i32, i32, i32
  }
}

module attributes {stable_mosaic.version = 11 : i64} {
  func.func @_decoder_stack_kernel(%arg0: i32, %arg1: memref<2x8x32xf32, #tpu.memory_space<vmem>>, %arg2: memref<2x8x32xf32, #tpu.memory_space<vmem>>, %arg3: memref<1x32x96xbf16, #tpu.memory_space<vmem>>, %arg4: memref<1x1x96xf32, #tpu.memory_space<vmem>>, %arg5: memref<1x4x8x32xbf16, #tpu.memory_space<vmem>>, %arg6: memref<1x1x32xf32, #tpu.memory_space<vmem>>, %arg7: memref<1x1x32xf32, #tpu.memory_space<vmem>>, %arg8: memref<1x1x32xf32, #tpu.memory_space<vmem>>, %arg9: memref<1x32x32xbf16, #tpu.memory_space<vmem>>, %arg10: memref<1x1x32xf32, #tpu.memory_space<vmem>>, %arg11: memref<1x32x64xbf16, #tpu.memory_space<vmem>>, %arg12: memref<1x1x64xf32, #tpu.memory_space<vmem>>, %arg13: memref<1x4x8x32xbf16, #tpu.memory_space<vmem>>, %arg14: memref<1x1x32xf32, #tpu.memory_space<vmem>>, %arg15: memref<1x1x32xf32, #tpu.memory_space<vmem>>, %arg16: memref<1x1x32xf32, #tpu.memory_space<vmem>>, %arg17: memref<1x32x64xbf16, #tpu.memory_space<vmem>>, %arg18: memref<1x1x64xf32, #tpu.memory_space<vmem>>, %arg19: memref<1x64x32xbf16, #tpu.memory_space<vmem>>, %arg20: memref<1x1x32xf32, #tpu.memory_space<vmem>>, %arg21: memref<1x1x32xf32, #tpu.memory_space<vmem>>, %arg22: memref<1x1x32xf32, #tpu.memory_space<vmem>>, %arg23: memref<2x8x32xf32, #tpu.memory_space<vmem>>) attributes {dimension_semantics = [#tpu.dimension_semantics<arbitrary>], iteration_bounds = array<i64: 2>, scalar_prefetch = 0 : i64, scratch_operands = 0 : i64, tpu.core_type = #tpu.core_type<tc>, window_params = [{pipeline_mode = #tpu.pipeline_mode<synchronous>, transform_indices = @transform_0, window_bounds = array<i64: 2, 8, 32>}, {pipeline_mode = #tpu.pipeline_mode<synchronous>, transform_indices = @transform_1, window_bounds = array<i64: 2, 8, 32>}, {transform_indices = @transform_2, window_bounds = array<i64: 1, 32, 96>}, {transform_indices = @transform_3, window_bounds = array<i64: 1, 1, 96>}, {transform_indices = @transform_4, window_bounds = array<i64: 1, 4, 8, 32>}, {transform_indices = @transform_5, window_bounds = array<i64: 1, 1, 32>}, {transform_indices = @transform_6, window_bounds = array<i64: 1, 1, 32>}, {transform_indices = @transform_7, window_bounds = array<i64: 1, 1, 32>}, {transform_indices = @transform_8, window_bounds = array<i64: 1, 32, 32>}, {transform_indices = @transform_9, window_bounds = array<i64: 1, 1, 32>}, {transform_indices = @transform_10, window_bounds = array<i64: 1, 32, 64>}, {transform_indices = @transform_11, window_bounds = array<i64: 1, 1, 64>}, {transform_indices = @transform_12, window_bounds = array<i64: 1, 4, 8, 32>}, {transform_indices = @transform_13, window_bounds = array<i64: 1, 1, 32>}, {transform_indices = @transform_14, window_bounds = array<i64: 1, 1, 32>}, {transform_indices = @transform_15, window_bounds = array<i64: 1, 1, 32>}, {transform_indices = @transform_16, window_bounds = array<i64: 1, 32, 64>}, {transform_indices = @transform_17, window_bounds = array<i64: 1, 1, 64>}, {transform_indices = @transform_18, window_bounds = array<i64: 1, 64, 32>}, {transform_indices = @transform_19, window_bounds = array<i64: 1, 1, 32>}, {transform_indices = @transform_20, window_bounds = array<i64: 1, 1, 32>}, {transform_indices = @transform_21, window_bounds = array<i64: 1, 1, 32>}, {pipeline_mode = #tpu.pipeline_mode<synchronous>, transform_indices = @transform_22, window_bounds = array<i64: 2, 8, 32>}]} {
    %c0_i32 = arith.constant 0 : i32
    %0 = arith.cmpi eq, %arg0, %c0_i32 : i32
    %1 = arith.extui %0 : i1 to i32
    %c0_i32_0 = arith.constant 0 : i32
    %2 = arith.cmpi ne, %1, %c0_i32_0 : i32
    scf.if %2 {
      %c0_137 = arith.constant 0 : index
      %c0_138 = arith.constant 0 : index
      %c0_139 = arith.constant 0 : index
      %352 = vector.load %arg1[%c0_137, %c0_138, %c0_139] : memref<2x8x32xf32, #tpu.memory_space<vmem>>, vector<2x8x32xf32>
      %c0_140 = arith.constant 0 : index
      %c0_141 = arith.constant 0 : index
      %c0_142 = arith.constant 0 : index
      %353 = vector.load %arg23[%c0_140, %c0_141, %c0_142] : memref<2x8x32xf32, #tpu.memory_space<vmem>>, vector<2x8x32xf32>
      tpu.vector_store %arg23[%c0_140, %c0_141, %c0_142], %352 {strides = array<i32>} : memref<2x8x32xf32, #tpu.memory_space<vmem>>, vector<2x8x32xf32>,
    } else {
    }
    %c0 = arith.constant 0 : index
    %c0_1 = arith.constant 0 : index
    %c0_2 = arith.constant 0 : index
    %3 = vector.load %arg23[%c0, %c0_1, %c0_2] : memref<2x8x32xf32, #tpu.memory_space<vmem>>, vector<2x8x32xf32>
    %4 = arith.truncf %3 : vector<2x8x32xf32> to vector<2x8x32xbf16>
    %c0_3 = arith.constant 0 : index
    %c0_4 = arith.constant 0 : index
    %c0_5 = arith.constant 0 : index
    %5 = vector.load %arg3[%c0_3, %c0_4, %c0_5] : memref<1x32x96xbf16, #tpu.memory_space<vmem>>, vector<1x32x96xbf16>
    %6 = vector.shape_cast %5 : vector<1x32x96xbf16> to vector<32x96xbf16>
    %cst = arith.constant dense<0.000000e+00> : vector<2x8x96xf32>
    %7 = tpu.matmul %4, %6, %cst {dimension_numbers = #tpu.dot_dimension_numbers<[2], [0], [0, 1], [1], [0, 0, 0, 1, 1, 1], [], []>} : vector<2x8x32xbf16>, vector<32x96xbf16>, vector<2x8x96xf32> -> vector<2x8x96xf32>
    %c0_6 = arith.constant 0 : index
    %c0_7 = arith.constant 0 : index
    %c0_8 = arith.constant 0 : index
    %8 = vector.load %arg4[%c0_6, %c0_7, %c0_8] : memref<1x1x96xf32, #tpu.memory_space<vmem>>, vector<1x1x96xf32>
    %9 = vector.shape_cast %8 : vector<1x1x96xf32> to vector<1x96xf32>
    %10 = vector.shape_cast %9 : vector<1x96xf32> to vector<1x1x96xf32>
    %11 = vector.broadcast %10 : vector<1x1x96xf32> to vector<2x8x96xf32>
    %12 = arith.addf %7, %11 : vector<2x8x96xf32>
    %13 = arith.truncf %12 : vector<2x8x96xf32> to vector<2x8x96xbf16>
    %14 = vector.extract_strided_slice %13 {offsets = [0, 0, 0], sizes = [2, 8, 32], strides = [1, 1, 1]} : vector<2x8x96xbf16> to vector<2x8x32xbf16>
    %15 = vector.extract_strided_slice %13 {offsets = [0, 0, 32], sizes = [2, 8, 32], strides = [1, 1, 1]} : vector<2x8x96xbf16> to vector<2x8x32xbf16>
    %16 = vector.extract_strided_slice %13 {offsets = [0, 0, 64], sizes = [2, 8, 32], strides = [1, 1, 1]} : vector<2x8x96xbf16> to vector<2x8x32xbf16>
    %c0_9 = arith.constant 0 : index
    %c0_10 = arith.constant 0 : index
    %c0_11 = arith.constant 0 : index
    %c0_12 = arith.constant 0 : index
    %17 = vector.load %arg5[%c0_9, %c0_10, %c0_11, %c0_12] : memref<1x4x8x32xbf16, #tpu.memory_space<vmem>>, vector<1x4x8x32xbf16>
    %18 = vector.shape_cast %17 : vector<1x4x8x32xbf16> to vector<4x8x32xbf16>
    %19 = tpu.iota {dimensions = array<i32: 0>} : vector<8x8xi32>
    %20 = tpu.iota {dimensions = array<i32: 1>} : vector<8x8xi32>
    %21 = arith.cmpi sle, %20, %19 : vector<8x8xi32>
    %22 = vector.shape_cast %21 : vector<8x8xi1> to vector<1x8x8xi1>
    %cst_13 = arith.constant 0.000000e+00 : f32
    %23 = vector.broadcast %cst_13 : f32 to vector<2x8x32xf32>
    %24 = vector.extract_strided_slice %14 {offsets = [0, 0, 0], sizes = [2, 8, 8], strides = [1, 1, 1]} : vector<2x8x32xbf16> to vector<2x8x8xbf16>
    %25 = vector.extract_strided_slice %15 {offsets = [0, 0, 0], sizes = [2, 8, 8], strides = [1, 1, 1]} : vector<2x8x32xbf16> to vector<2x8x8xbf16>
    %26 = vector.extract_strided_slice %16 {offsets = [0, 0, 0], sizes = [2, 8, 8], strides = [1, 1, 1]} : vector<2x8x32xbf16> to vector<2x8x8xbf16>
    "tpu.trace_start"() <{level = 10 : i32, message = "bqd,bkd->bqk"}> : () -> ()
    %cst_14 = arith.constant dense<0.000000e+00> : vector<2x8x8xf32>
    %27 = tpu.matmul %24, %25, %cst_14 {dimension_numbers = #tpu.dot_dimension_numbers<[2], [2], [1], [1], [0, 0, 0, 1, 1, 1], [0], [0]>} : vector<2x8x8xbf16>, vector<2x8x8xbf16>, vector<2x8x8xf32> -> vector<2x8x8xf32>
    %cst_15 = arith.constant 0xFF800000 : f32
    "tpu.trace_stop"() : () -> ()
    %28 = vector.shape_cast %22 : vector<1x8x8xi1> to vector<1x8x8xi1>
    %29 = vector.broadcast %28 : vector<1x8x8xi1> to vector<2x8x8xi1>
    %30 = vector.broadcast %cst_15 : f32 to vector<2x8x8xf32>
    %31 = arith.select %29, %27, %30 : vector<2x8x8xi1>, vector<2x8x8xf32>
    %cst_16 = arith.constant dense<0xFF800000> : vector<2x8xf32>
    %32 = vector.multi_reduction <maximumf>, %31, %cst_16 [2] : vector<2x8x8xf32> to vector<2x8xf32>
    %33 = vector.shape_cast %32 : vector<2x8xf32> to vector<2x8x1xf32>
    %34 = vector.broadcast %33 : vector<2x8x1xf32> to vector<2x8x8xf32>
    %35 = arith.subf %31, %34 : vector<2x8x8xf32>
    %36 = math.exp %35 : vector<2x8x8xf32>
    %cst_17 = arith.constant dense<0.000000e+00> : vector<2x8xf32>
    %37 = vector.multi_reduction <add>, %36, %cst_17 [2] : vector<2x8x8xf32> to vector<2x8xf32>
    %38 = vector.shape_cast %37 : vector<2x8xf32> to vector<2x8x1xf32>
    %39 = tpu.reciprocal %38 {approx = true} : vector<2x8x1xf32> -> vector<2x8x1xf32>
    %40 = vector.broadcast %39 : vector<2x8x1xf32> to vector<2x8x8xf32>
    %41 = arith.mulf %36, %40 : vector<2x8x8xf32>
    %42 = arith.truncf %41 : vector<2x8x8xf32> to vector<2x8x8xbf16>
    "tpu.trace_start"() <{level = 10 : i32, message = "bqk,bkd->bqd"}> : () -> ()
    %cst_18 = arith.constant dense<0.000000e+00> : vector<2x8x8xf32>
    %43 = tpu.matmul %42, %26, %cst_18 {dimension_numbers = #tpu.dot_dimension_numbers<[2], [1], [1], [2], [0, 0, 0, 1, 1, 2], [0], [0]>} : vector<2x8x8xbf16>, vector<2x8x8xbf16>, vector<2x8x8xf32> -> vector<2x8x8xf32>
    "tpu.trace_stop"() : () -> ()
    %44 = arith.truncf %43 : vector<2x8x8xf32> to vector<2x8x8xbf16>
    %45 = vector.extract_strided_slice %18 {offsets = [0, 0, 0], sizes = [1, 8, 32], strides = [1, 1, 1]} : vector<4x8x32xbf16> to vector<1x8x32xbf16>
    %46 = vector.shape_cast %45 : vector<1x8x32xbf16> to vector<8x32xbf16>
    %cst_19 = arith.constant dense<0.000000e+00> : vector<2x8x32xf32>
    %47 = tpu.matmul %44, %46, %cst_19 {dimension_numbers = #tpu.dot_dimension_numbers<[2], [0], [0, 1], [1], [0, 0, 0, 1, 1, 1], [], []>} : vector<2x8x8xbf16>, vector<8x32xbf16>, vector<2x8x32xf32> -> vector<2x8x32xf32>
    %48 = arith.addf %23, %47 : vector<2x8x32xf32>
    %49 = vector.extract_strided_slice %14 {offsets = [0, 0, 8], sizes = [2, 8, 8], strides = [1, 1, 1]} : vector<2x8x32xbf16> to vector<2x8x8xbf16>
    %50 = vector.extract_strided_slice %15 {offsets = [0, 0, 8], sizes = [2, 8, 8], strides = [1, 1, 1]} : vector<2x8x32xbf16> to vector<2x8x8xbf16>
    %51 = vector.extract_strided_slice %16 {offsets = [0, 0, 8], sizes = [2, 8, 8], strides = [1, 1, 1]} : vector<2x8x32xbf16> to vector<2x8x8xbf16>
    "tpu.trace_start"() <{level = 10 : i32, message = "bqd,bkd->bqk"}> : () -> ()
    %cst_20 = arith.constant dense<0.000000e+00> : vector<2x8x8xf32>
    %52 = tpu.matmul %49, %50, %cst_20 {dimension_numbers = #tpu.dot_dimension_numbers<[2], [2], [1], [1], [0, 0, 0, 1, 1, 1], [0], [0]>} : vector<2x8x8xbf16>, vector<2x8x8xbf16>, vector<2x8x8xf32> -> vector<2x8x8xf32>
    %cst_21 = arith.constant 0xFF800000 : f32
    "tpu.trace_stop"() : () -> ()
    %53 = vector.shape_cast %22 : vector<1x8x8xi1> to vector<1x8x8xi1>
    %54 = vector.broadcast %53 : vector<1x8x8xi1> to vector<2x8x8xi1>
    %55 = vector.broadcast %cst_21 : f32 to vector<2x8x8xf32>
    %56 = arith.select %54, %52, %55 : vector<2x8x8xi1>, vector<2x8x8xf32>
    %cst_22 = arith.constant dense<0xFF800000> : vector<2x8xf32>
    %57 = vector.multi_reduction <maximumf>, %56, %cst_22 [2] : vector<2x8x8xf32> to vector<2x8xf32>
    %58 = vector.shape_cast %57 : vector<2x8xf32> to vector<2x8x1xf32>
    %59 = vector.broadcast %58 : vector<2x8x1xf32> to vector<2x8x8xf32>
    %60 = arith.subf %56, %59 : vector<2x8x8xf32>
    %61 = math.exp %60 : vector<2x8x8xf32>
    %cst_23 = arith.constant dense<0.000000e+00> : vector<2x8xf32>
    %62 = vector.multi_reduction <add>, %61, %cst_23 [2] : vector<2x8x8xf32> to vector<2x8xf32>
    %63 = vector.shape_cast %62 : vector<2x8xf32> to vector<2x8x1xf32>
    %64 = tpu.reciprocal %63 {approx = true} : vector<2x8x1xf32> -> vector<2x8x1xf32>
    %65 = vector.broadcast %64 : vector<2x8x1xf32> to vector<2x8x8xf32>
    %66 = arith.mulf %61, %65 : vector<2x8x8xf32>
    %67 = arith.truncf %66 : vector<2x8x8xf32> to vector<2x8x8xbf16>
    "tpu.trace_start"() <{level = 10 : i32, message = "bqk,bkd->bqd"}> : () -> ()
    %cst_24 = arith.constant dense<0.000000e+00> : vector<2x8x8xf32>
    %68 = tpu.matmul %67, %51, %cst_24 {dimension_numbers = #tpu.dot_dimension_numbers<[2], [1], [1], [2], [0, 0, 0, 1, 1, 2], [0], [0]>} : vector<2x8x8xbf16>, vector<2x8x8xbf16>, vector<2x8x8xf32> -> vector<2x8x8xf32>
    "tpu.trace_stop"() : () -> ()
    %69 = arith.truncf %68 : vector<2x8x8xf32> to vector<2x8x8xbf16>
    %70 = vector.extract_strided_slice %18 {offsets = [1, 0, 0], sizes = [1, 8, 32], strides = [1, 1, 1]} : vector<4x8x32xbf16> to vector<1x8x32xbf16>
    %71 = vector.shape_cast %70 : vector<1x8x32xbf16> to vector<8x32xbf16>
    %cst_25 = arith.constant dense<0.000000e+00> : vector<2x8x32xf32>
    %72 = tpu.matmul %69, %71, %cst_25 {dimension_numbers = #tpu.dot_dimension_numbers<[2], [0], [0, 1], [1], [0, 0, 0, 1, 1, 1], [], []>} : vector<2x8x8xbf16>, vector<8x32xbf16>, vector<2x8x32xf32> -> vector<2x8x32xf32>
    %73 = arith.addf %48, %72 : vector<2x8x32xf32>
    %74 = vector.extract_strided_slice %14 {offsets = [0, 0, 16], sizes = [2, 8, 8], strides = [1, 1, 1]} : vector<2x8x32xbf16> to vector<2x8x8xbf16>
    %75 = vector.extract_strided_slice %15 {offsets = [0, 0, 16], sizes = [2, 8, 8], strides = [1, 1, 1]} : vector<2x8x32xbf16> to vector<2x8x8xbf16>
    %76 = vector.extract_strided_slice %16 {offsets = [0, 0, 16], sizes = [2, 8, 8], strides = [1, 1, 1]} : vector<2x8x32xbf16> to vector<2x8x8xbf16>
    "tpu.trace_start"() <{level = 10 : i32, message = "bqd,bkd->bqk"}> : () -> ()
    %cst_26 = arith.constant dense<0.000000e+00> : vector<2x8x8xf32>
    %77 = tpu.matmul %74, %75, %cst_26 {dimension_numbers = #tpu.dot_dimension_numbers<[2], [2], [1], [1], [0, 0, 0, 1, 1, 1], [0], [0]>} : vector<2x8x8xbf16>, vector<2x8x8xbf16>, vector<2x8x8xf32> -> vector<2x8x8xf32>
    %cst_27 = arith.constant 0xFF800000 : f32
    "tpu.trace_stop"() : () -> ()
    %78 = vector.shape_cast %22 : vector<1x8x8xi1> to vector<1x8x8xi1>
    %79 = vector.broadcast %78 : vector<1x8x8xi1> to vector<2x8x8xi1>
    %80 = vector.broadcast %cst_27 : f32 to vector<2x8x8xf32>
    %81 = arith.select %79, %77, %80 : vector<2x8x8xi1>, vector<2x8x8xf32>
    %cst_28 = arith.constant dense<0xFF800000> : vector<2x8xf32>
    %82 = vector.multi_reduction <maximumf>, %81, %cst_28 [2] : vector<2x8x8xf32> to vector<2x8xf32>
    %83 = vector.shape_cast %82 : vector<2x8xf32> to vector<2x8x1xf32>
    %84 = vector.broadcast %83 : vector<2x8x1xf32> to vector<2x8x8xf32>
    %85 = arith.subf %81, %84 : vector<2x8x8xf32>
    %86 = math.exp %85 : vector<2x8x8xf32>
    %cst_29 = arith.constant dense<0.000000e+00> : vector<2x8xf32>
    %87 = vector.multi_reduction <add>, %86, %cst_29 [2] : vector<2x8x8xf32> to vector<2x8xf32>
    %88 = vector.shape_cast %87 : vector<2x8xf32> to vector<2x8x1xf32>
    %89 = tpu.reciprocal %88 {approx = true} : vector<2x8x1xf32> -> vector<2x8x1xf32>
    %90 = vector.broadcast %89 : vector<2x8x1xf32> to vector<2x8x8xf32>
    %91 = arith.mulf %86, %90 : vector<2x8x8xf32>
    %92 = arith.truncf %91 : vector<2x8x8xf32> to vector<2x8x8xbf16>
    "tpu.trace_start"() <{level = 10 : i32, message = "bqk,bkd->bqd"}> : () -> ()
    %cst_30 = arith.constant dense<0.000000e+00> : vector<2x8x8xf32>
    %93 = tpu.matmul %92, %76, %cst_30 {dimension_numbers = #tpu.dot_dimension_numbers<[2], [1], [1], [2], [0, 0, 0, 1, 1, 2], [0], [0]>} : vector<2x8x8xbf16>, vector<2x8x8xbf16>, vector<2x8x8xf32> -> vector<2x8x8xf32>
    "tpu.trace_stop"() : () -> ()
    %94 = arith.truncf %93 : vector<2x8x8xf32> to vector<2x8x8xbf16>
    %95 = vector.extract_strided_slice %18 {offsets = [2, 0, 0], sizes = [1, 8, 32], strides = [1, 1, 1]} : vector<4x8x32xbf16> to vector<1x8x32xbf16>
    %96 = vector.shape_cast %95 : vector<1x8x32xbf16> to vector<8x32xbf16>
    %cst_31 = arith.constant dense<0.000000e+00> : vector<2x8x32xf32>
    %97 = tpu.matmul %94, %96, %cst_31 {dimension_numbers = #tpu.dot_dimension_numbers<[2], [0], [0, 1], [1], [0, 0, 0, 1, 1, 1], [], []>} : vector<2x8x8xbf16>, vector<8x32xbf16>, vector<2x8x32xf32> -> vector<2x8x32xf32>
    %98 = arith.addf %73, %97 : vector<2x8x32xf32>
    %99 = vector.extract_strided_slice %14 {offsets = [0, 0, 24], sizes = [2, 8, 8], strides = [1, 1, 1]} : vector<2x8x32xbf16> to vector<2x8x8xbf16>
    %100 = vector.extract_strided_slice %15 {offsets = [0, 0, 24], sizes = [2, 8, 8], strides = [1, 1, 1]} : vector<2x8x32xbf16> to vector<2x8x8xbf16>
    %101 = vector.extract_strided_slice %16 {offsets = [0, 0, 24], sizes = [2, 8, 8], strides = [1, 1, 1]} : vector<2x8x32xbf16> to vector<2x8x8xbf16>
    "tpu.trace_start"() <{level = 10 : i32, message = "bqd,bkd->bqk"}> : () -> ()
    %cst_32 = arith.constant dense<0.000000e+00> : vector<2x8x8xf32>
    %102 = tpu.matmul %99, %100, %cst_32 {dimension_numbers = #tpu.dot_dimension_numbers<[2], [2], [1], [1], [0, 0, 0, 1, 1, 1], [0], [0]>} : vector<2x8x8xbf16>, vector<2x8x8xbf16>, vector<2x8x8xf32> -> vector<2x8x8xf32>
    %cst_33 = arith.constant 0xFF800000 : f32
    "tpu.trace_stop"() : () -> ()
    %103 = vector.shape_cast %22 : vector<1x8x8xi1> to vector<1x8x8xi1>
    %104 = vector.broadcast %103 : vector<1x8x8xi1> to vector<2x8x8xi1>
    %105 = vector.broadcast %cst_33 : f32 to vector<2x8x8xf32>
    %106 = arith.select %104, %102, %105 : vector<2x8x8xi1>, vector<2x8x8xf32>
    %cst_34 = arith.constant dense<0xFF800000> : vector<2x8xf32>
    %107 = vector.multi_reduction <maximumf>, %106, %cst_34 [2] : vector<2x8x8xf32> to vector<2x8xf32>
    %108 = vector.shape_cast %107 : vector<2x8xf32> to vector<2x8x1xf32>
    %109 = vector.broadcast %108 : vector<2x8x1xf32> to vector<2x8x8xf32>
    %110 = arith.subf %106, %109 : vector<2x8x8xf32>
    %111 = math.exp %110 : vector<2x8x8xf32>
    %cst_35 = arith.constant dense<0.000000e+00> : vector<2x8xf32>
    %112 = vector.multi_reduction <add>, %111, %cst_35 [2] : vector<2x8x8xf32> to vector<2x8xf32>
    %113 = vector.shape_cast %112 : vector<2x8xf32> to vector<2x8x1xf32>
    %114 = tpu.reciprocal %113 {approx = true} : vector<2x8x1xf32> -> vector<2x8x1xf32>
    %115 = vector.broadcast %114 : vector<2x8x1xf32> to vector<2x8x8xf32>
    %116 = arith.mulf %111, %115 : vector<2x8x8xf32>
    %117 = arith.truncf %116 : vector<2x8x8xf32> to vector<2x8x8xbf16>
    "tpu.trace_start"() <{level = 10 : i32, message = "bqk,bkd->bqd"}> : () -> ()
    %cst_36 = arith.constant dense<0.000000e+00> : vector<2x8x8xf32>
    %118 = tpu.matmul %117, %101, %cst_36 {dimension_numbers = #tpu.dot_dimension_numbers<[2], [1], [1], [2], [0, 0, 0, 1, 1, 2], [0], [0]>} : vector<2x8x8xbf16>, vector<2x8x8xbf16>, vector<2x8x8xf32> -> vector<2x8x8xf32>
    "tpu.trace_stop"() : () -> ()
    %119 = arith.truncf %118 : vector<2x8x8xf32> to vector<2x8x8xbf16>
    %120 = vector.extract_strided_slice %18 {offsets = [3, 0, 0], sizes = [1, 8, 32], strides = [1, 1, 1]} : vector<4x8x32xbf16> to vector<1x8x32xbf16>
    %121 = vector.shape_cast %120 : vector<1x8x32xbf16> to vector<8x32xbf16>
    %cst_37 = arith.constant dense<0.000000e+00> : vector<2x8x32xf32>
    %122 = tpu.matmul %119, %121, %cst_37 {dimension_numbers = #tpu.dot_dimension_numbers<[2], [0], [0, 1], [1], [0, 0, 0, 1, 1, 1], [], []>} : vector<2x8x8xbf16>, vector<8x32xbf16>, vector<2x8x32xf32> -> vector<2x8x32xf32>
    %123 = arith.addf %98, %122 : vector<2x8x32xf32>
    %c0_38 = arith.constant 0 : index
    %c0_39 = arith.constant 0 : index
    %c0_40 = arith.constant 0 : index
    %124 = vector.load %arg6[%c0_38, %c0_39, %c0_40] : memref<1x1x32xf32, #tpu.memory_space<vmem>>, vector<1x1x32xf32>
    %125 = vector.shape_cast %124 : vector<1x1x32xf32> to vector<1x32xf32>
    %126 = vector.shape_cast %125 : vector<1x32xf32> to vector<1x1x32xf32>
    %127 = vector.broadcast %126 : vector<1x1x32xf32> to vector<2x8x32xf32>
    %128 = arith.addf %123, %127 : vector<2x8x32xf32>
    %129 = arith.addf %128, %3 : vector<2x8x32xf32>
    %c0_41 = arith.constant 0 : index
    %c0_42 = arith.constant 0 : index
    %c0_43 = arith.constant 0 : index
    %130 = vector.load %arg7[%c0_41, %c0_42, %c0_43] : memref<1x1x32xf32, #tpu.memory_space<vmem>>, vector<1x1x32xf32>
    %131 = vector.shape_cast %130 : vector<1x1x32xf32> to vector<1x32xf32>
    %c0_44 = arith.constant 0 : index
    %c0_45 = arith.constant 0 : index
    %c0_46 = arith.constant 0 : index
    %132 = vector.load %arg8[%c0_44, %c0_45, %c0_46] : memref<1x1x32xf32, #tpu.memory_space<vmem>>, vector<1x1x32xf32>
    %133 = vector.shape_cast %132 : vector<1x1x32xf32> to vector<1x32xf32>
    %cst_47 = arith.constant dense<0.000000e+00> : vector<2x8xf32>
    %134 = vector.multi_reduction <add>, %129, %cst_47 [2] : vector<2x8x32xf32> to vector<2x8xf32>
    %135 = vector.shape_cast %134 : vector<2x8xf32> to vector<2x8x1xf32>
    %cst_48 = arith.constant 3.200000e+01 : f32
    %136 = vector.broadcast %cst_48 : f32 to vector<2x8x1xf32>
    %137 = arith.divf %135, %136 : vector<2x8x1xf32>
    %138 = vector.broadcast %137 : vector<2x8x1xf32> to vector<2x8x32xf32>
    %139 = arith.subf %129, %138 : vector<2x8x32xf32>
    %140 = arith.mulf %139, %139 : vector<2x8x32xf32>
    %cst_49 = arith.constant dense<0.000000e+00> : vector<2x8xf32>
    %141 = vector.multi_reduction <add>, %140, %cst_49 [2] : vector<2x8x32xf32> to vector<2x8xf32>
    %142 = vector.shape_cast %141 : vector<2x8xf32> to vector<2x8x1xf32>
    %cst_50 = arith.constant 3.200000e+01 : f32
    %143 = vector.broadcast %cst_50 : f32 to vector<2x8x1xf32>
    %144 = arith.divf %142, %143 : vector<2x8x1xf32>
    %145 = vector.broadcast %137 : vector<2x8x1xf32> to vector<2x8x32xf32>
    %146 = arith.subf %129, %145 : vector<2x8x32xf32>
    %cst_51 = arith.constant 9.99999974E-6 : f32
    %147 = vector.broadcast %cst_51 : f32 to vector<2x8x1xf32>
    %148 = arith.addf %144, %147 : vector<2x8x1xf32>
    %149 = math.rsqrt %148 : vector<2x8x1xf32>
    %150 = vector.broadcast %149 : vector<2x8x1xf32> to vector<2x8x32xf32>
    %151 = arith.mulf %146, %150 : vector<2x8x32xf32>
    %152 = vector.shape_cast %131 : vector<1x32xf32> to vector<1x1x32xf32>
    %153 = vector.broadcast %152 : vector<1x1x32xf32> to vector<2x8x32xf32>
    %154 = arith.mulf %151, %153 : vector<2x8x32xf32>
    %155 = vector.shape_cast %133 : vector<1x32xf32> to vector<1x1x32xf32>
    %156 = vector.broadcast %155 : vector<1x1x32xf32> to vector<2x8x32xf32>
    %157 = arith.addf %154, %156 : vector<2x8x32xf32>
    %158 = arith.truncf %157 : vector<2x8x32xf32> to vector<2x8x32xbf16>
    %c0_52 = arith.constant 0 : index
    %c0_53 = arith.constant 0 : index
    %c0_54 = arith.constant 0 : index
    %159 = vector.load %arg9[%c0_52, %c0_53, %c0_54] : memref<1x32x32xbf16, #tpu.memory_space<vmem>>, vector<1x32x32xbf16>
    %160 = vector.shape_cast %159 : vector<1x32x32xbf16> to vector<32x32xbf16>
    %cst_55 = arith.constant dense<0.000000e+00> : vector<2x8x32xf32>
    %161 = tpu.matmul %158, %160, %cst_55 {dimension_numbers = #tpu.dot_dimension_numbers<[2], [0], [0, 1], [1], [0, 0, 0, 1, 1, 1], [], []>} : vector<2x8x32xbf16>, vector<32x32xbf16>, vector<2x8x32xf32> -> vector<2x8x32xf32>
    %c0_56 = arith.constant 0 : index
    %c0_57 = arith.constant 0 : index
    %c0_58 = arith.constant 0 : index
    %162 = vector.load %arg10[%c0_56, %c0_57, %c0_58] : memref<1x1x32xf32, #tpu.memory_space<vmem>>, vector<1x1x32xf32>
    %163 = vector.shape_cast %162 : vector<1x1x32xf32> to vector<1x32xf32>
    %164 = vector.shape_cast %163 : vector<1x32xf32> to vector<1x1x32xf32>
    %165 = vector.broadcast %164 : vector<1x1x32xf32> to vector<2x8x32xf32>
    %166 = arith.addf %161, %165 : vector<2x8x32xf32>
    %c0_59 = arith.constant 0 : index
    %c0_60 = arith.constant 0 : index
    %c0_61 = arith.constant 0 : index
    %167 = vector.load %arg2[%c0_59, %c0_60, %c0_61] : memref<2x8x32xf32, #tpu.memory_space<vmem>>, vector<2x8x32xf32>
    %168 = arith.truncf %167 : vector<2x8x32xf32> to vector<2x8x32xbf16>
    %c0_62 = arith.constant 0 : index
    %c0_63 = arith.constant 0 : index
    %c0_64 = arith.constant 0 : index
    %169 = vector.load %arg11[%c0_62, %c0_63, %c0_64] : memref<1x32x64xbf16, #tpu.memory_space<vmem>>, vector<1x32x64xbf16>
    %170 = vector.shape_cast %169 : vector<1x32x64xbf16> to vector<32x64xbf16>
    %cst_65 = arith.constant dense<0.000000e+00> : vector<2x8x64xf32>
    %171 = tpu.matmul %168, %170, %cst_65 {dimension_numbers = #tpu.dot_dimension_numbers<[2], [0], [0, 1], [1], [0, 0, 0, 1, 1, 1], [], []>} : vector<2x8x32xbf16>, vector<32x64xbf16>, vector<2x8x64xf32> -> vector<2x8x64xf32>
    %c0_66 = arith.constant 0 : index
    %c0_67 = arith.constant 0 : index
    %c0_68 = arith.constant 0 : index
    %172 = vector.load %arg12[%c0_66, %c0_67, %c0_68] : memref<1x1x64xf32, #tpu.memory_space<vmem>>, vector<1x1x64xf32>
    %173 = vector.shape_cast %172 : vector<1x1x64xf32> to vector<1x64xf32>
    %174 = vector.shape_cast %173 : vector<1x64xf32> to vector<1x1x64xf32>
    %175 = vector.broadcast %174 : vector<1x1x64xf32> to vector<2x8x64xf32>
    %176 = arith.addf %171, %175 : vector<2x8x64xf32>
    %177 = arith.truncf %166 : vector<2x8x32xf32> to vector<2x8x32xbf16>
    %178 = arith.truncf %176 : vector<2x8x64xf32> to vector<2x8x64xbf16>
    %179 = vector.extract_strided_slice %178 {offsets = [0, 0, 0], sizes = [2, 8, 32], strides = [1, 1, 1]} : vector<2x8x64xbf16> to vector<2x8x32xbf16>
    %180 = vector.extract_strided_slice %178 {offsets = [0, 0, 32], sizes = [2, 8, 32], strides = [1, 1, 1]} : vector<2x8x64xbf16> to vector<2x8x32xbf16>
    %c0_69 = arith.constant 0 : index
    %c0_70 = arith.constant 0 : index
    %c0_71 = arith.constant 0 : index
    %c0_72 = arith.constant 0 : index
    %181 = vector.load %arg13[%c0_69, %c0_70, %c0_71, %c0_72] : memref<1x4x8x32xbf16, #tpu.memory_space<vmem>>, vector<1x4x8x32xbf16>
    %182 = vector.shape_cast %181 : vector<1x4x8x32xbf16> to vector<4x8x32xbf16>
    %cst_73 = arith.constant 0.000000e+00 : f32
    %183 = vector.broadcast %cst_73 : f32 to vector<2x8x32xf32>
    %184 = vector.extract_strided_slice %177 {offsets = [0, 0, 0], sizes = [2, 8, 8], strides = [1, 1, 1]} : vector<2x8x32xbf16> to vector<2x8x8xbf16>
    %185 = vector.extract_strided_slice %179 {offsets = [0, 0, 0], sizes = [2, 8, 8], strides = [1, 1, 1]} : vector<2x8x32xbf16> to vector<2x8x8xbf16>
    %186 = vector.extract_strided_slice %180 {offsets = [0, 0, 0], sizes = [2, 8, 8], strides = [1, 1, 1]} : vector<2x8x32xbf16> to vector<2x8x8xbf16>
    "tpu.trace_start"() <{level = 10 : i32, message = "bqd,bkd->bqk"}> : () -> ()
    %cst_74 = arith.constant dense<0.000000e+00> : vector<2x8x8xf32>
    %187 = tpu.matmul %184, %185, %cst_74 {dimension_numbers = #tpu.dot_dimension_numbers<[2], [2], [1], [1], [0, 0, 0, 1, 1, 1], [0], [0]>} : vector<2x8x8xbf16>, vector<2x8x8xbf16>, vector<2x8x8xf32> -> vector<2x8x8xf32>
    "tpu.trace_stop"() : () -> ()
    %cst_75 = arith.constant dense<0xFF800000> : vector<2x8xf32>
    %188 = vector.multi_reduction <maximumf>, %187, %cst_75 [2] : vector<2x8x8xf32> to vector<2x8xf32>
    %189 = vector.shape_cast %188 : vector<2x8xf32> to vector<2x8x1xf32>
    %190 = vector.broadcast %189 : vector<2x8x1xf32> to vector<2x8x8xf32>
    %191 = arith.subf %187, %190 : vector<2x8x8xf32>
    %192 = math.exp %191 : vector<2x8x8xf32>
    %cst_76 = arith.constant dense<0.000000e+00> : vector<2x8xf32>
    %193 = vector.multi_reduction <add>, %192, %cst_76 [2] : vector<2x8x8xf32> to vector<2x8xf32>
    %194 = vector.shape_cast %193 : vector<2x8xf32> to vector<2x8x1xf32>
    %195 = tpu.reciprocal %194 {approx = true} : vector<2x8x1xf32> -> vector<2x8x1xf32>
    %196 = vector.broadcast %195 : vector<2x8x1xf32> to vector<2x8x8xf32>
    %197 = arith.mulf %192, %196 : vector<2x8x8xf32>
    %198 = arith.truncf %197 : vector<2x8x8xf32> to vector<2x8x8xbf16>
    "tpu.trace_start"() <{level = 10 : i32, message = "bqk,bkd->bqd"}> : () -> ()
    %cst_77 = arith.constant dense<0.000000e+00> : vector<2x8x8xf32>
    %199 = tpu.matmul %198, %186, %cst_77 {dimension_numbers = #tpu.dot_dimension_numbers<[2], [1], [1], [2], [0, 0, 0, 1, 1, 2], [0], [0]>} : vector<2x8x8xbf16>, vector<2x8x8xbf16>, vector<2x8x8xf32> -> vector<2x8x8xf32>
    "tpu.trace_stop"() : () -> ()
    %200 = arith.truncf %199 : vector<2x8x8xf32> to vector<2x8x8xbf16>
    %201 = vector.extract_strided_slice %182 {offsets = [0, 0, 0], sizes = [1, 8, 32], strides = [1, 1, 1]} : vector<4x8x32xbf16> to vector<1x8x32xbf16>
    %202 = vector.shape_cast %201 : vector<1x8x32xbf16> to vector<8x32xbf16>
    %cst_78 = arith.constant dense<0.000000e+00> : vector<2x8x32xf32>
    %203 = tpu.matmul %200, %202, %cst_78 {dimension_numbers = #tpu.dot_dimension_numbers<[2], [0], [0, 1], [1], [0, 0, 0, 1, 1, 1], [], []>} : vector<2x8x8xbf16>, vector<8x32xbf16>, vector<2x8x32xf32> -> vector<2x8x32xf32>
    %204 = arith.addf %183, %203 : vector<2x8x32xf32>
    %205 = vector.extract_strided_slice %177 {offsets = [0, 0, 8], sizes = [2, 8, 8], strides = [1, 1, 1]} : vector<2x8x32xbf16> to vector<2x8x8xbf16>
    %206 = vector.extract_strided_slice %179 {offsets = [0, 0, 8], sizes = [2, 8, 8], strides = [1, 1, 1]} : vector<2x8x32xbf16> to vector<2x8x8xbf16>
    %207 = vector.extract_strided_slice %180 {offsets = [0, 0, 8], sizes = [2, 8, 8], strides = [1, 1, 1]} : vector<2x8x32xbf16> to vector<2x8x8xbf16>
    "tpu.trace_start"() <{level = 10 : i32, message = "bqd,bkd->bqk"}> : () -> ()
    %cst_79 = arith.constant dense<0.000000e+00> : vector<2x8x8xf32>
    %208 = tpu.matmul %205, %206, %cst_79 {dimension_numbers = #tpu.dot_dimension_numbers<[2], [2], [1], [1], [0, 0, 0, 1, 1, 1], [0], [0]>} : vector<2x8x8xbf16>, vector<2x8x8xbf16>, vector<2x8x8xf32> -> vector<2x8x8xf32>
    "tpu.trace_stop"() : () -> ()
    %cst_80 = arith.constant dense<0xFF800000> : vector<2x8xf32>
    %209 = vector.multi_reduction <maximumf>, %208, %cst_80 [2] : vector<2x8x8xf32> to vector<2x8xf32>
    %210 = vector.shape_cast %209 : vector<2x8xf32> to vector<2x8x1xf32>
    %211 = vector.broadcast %210 : vector<2x8x1xf32> to vector<2x8x8xf32>
    %212 = arith.subf %208, %211 : vector<2x8x8xf32>
    %213 = math.exp %212 : vector<2x8x8xf32>
    %cst_81 = arith.constant dense<0.000000e+00> : vector<2x8xf32>
    %214 = vector.multi_reduction <add>, %213, %cst_81 [2] : vector<2x8x8xf32> to vector<2x8xf32>
    %215 = vector.shape_cast %214 : vector<2x8xf32> to vector<2x8x1xf32>
    %216 = tpu.reciprocal %215 {approx = true} : vector<2x8x1xf32> -> vector<2x8x1xf32>
    %217 = vector.broadcast %216 : vector<2x8x1xf32> to vector<2x8x8xf32>
    %218 = arith.mulf %213, %217 : vector<2x8x8xf32>
    %219 = arith.truncf %218 : vector<2x8x8xf32> to vector<2x8x8xbf16>
    "tpu.trace_start"() <{level = 10 : i32, message = "bqk,bkd->bqd"}> : () -> ()
    %cst_82 = arith.constant dense<0.000000e+00> : vector<2x8x8xf32>
    %220 = tpu.matmul %219, %207, %cst_82 {dimension_numbers = #tpu.dot_dimension_numbers<[2], [1], [1], [2], [0, 0, 0, 1, 1, 2], [0], [0]>} : vector<2x8x8xbf16>, vector<2x8x8xbf16>, vector<2x8x8xf32> -> vector<2x8x8xf32>
    "tpu.trace_stop"() : () -> ()
    %221 = arith.truncf %220 : vector<2x8x8xf32> to vector<2x8x8xbf16>
    %222 = vector.extract_strided_slice %182 {offsets = [1, 0, 0], sizes = [1, 8, 32], strides = [1, 1, 1]} : vector<4x8x32xbf16> to vector<1x8x32xbf16>
    %223 = vector.shape_cast %222 : vector<1x8x32xbf16> to vector<8x32xbf16>
    %cst_83 = arith.constant dense<0.000000e+00> : vector<2x8x32xf32>
    %224 = tpu.matmul %221, %223, %cst_83 {dimension_numbers = #tpu.dot_dimension_numbers<[2], [0], [0, 1], [1], [0, 0, 0, 1, 1, 1], [], []>} : vector<2x8x8xbf16>, vector<8x32xbf16>, vector<2x8x32xf32> -> vector<2x8x32xf32>
    %225 = arith.addf %204, %224 : vector<2x8x32xf32>
    %226 = vector.extract_strided_slice %177 {offsets = [0, 0, 16], sizes = [2, 8, 8], strides = [1, 1, 1]} : vector<2x8x32xbf16> to vector<2x8x8xbf16>
    %227 = vector.extract_strided_slice %179 {offsets = [0, 0, 16], sizes = [2, 8, 8], strides = [1, 1, 1]} : vector<2x8x32xbf16> to vector<2x8x8xbf16>
    %228 = vector.extract_strided_slice %180 {offsets = [0, 0, 16], sizes = [2, 8, 8], strides = [1, 1, 1]} : vector<2x8x32xbf16> to vector<2x8x8xbf16>
    "tpu.trace_start"() <{level = 10 : i32, message = "bqd,bkd->bqk"}> : () -> ()
    %cst_84 = arith.constant dense<0.000000e+00> : vector<2x8x8xf32>
    %229 = tpu.matmul %226, %227, %cst_84 {dimension_numbers = #tpu.dot_dimension_numbers<[2], [2], [1], [1], [0, 0, 0, 1, 1, 1], [0], [0]>} : vector<2x8x8xbf16>, vector<2x8x8xbf16>, vector<2x8x8xf32> -> vector<2x8x8xf32>
    "tpu.trace_stop"() : () -> ()
    %cst_85 = arith.constant dense<0xFF800000> : vector<2x8xf32>
    %230 = vector.multi_reduction <maximumf>, %229, %cst_85 [2] : vector<2x8x8xf32> to vector<2x8xf32>
    %231 = vector.shape_cast %230 : vector<2x8xf32> to vector<2x8x1xf32>
    %232 = vector.broadcast %231 : vector<2x8x1xf32> to vector<2x8x8xf32>
    %233 = arith.subf %229, %232 : vector<2x8x8xf32>
    %234 = math.exp %233 : vector<2x8x8xf32>
    %cst_86 = arith.constant dense<0.000000e+00> : vector<2x8xf32>
    %235 = vector.multi_reduction <add>, %234, %cst_86 [2] : vector<2x8x8xf32> to vector<2x8xf32>
    %236 = vector.shape_cast %235 : vector<2x8xf32> to vector<2x8x1xf32>
    %237 = tpu.reciprocal %236 {approx = true} : vector<2x8x1xf32> -> vector<2x8x1xf32>
    %238 = vector.broadcast %237 : vector<2x8x1xf32> to vector<2x8x8xf32>
    %239 = arith.mulf %234, %238 : vector<2x8x8xf32>
    %240 = arith.truncf %239 : vector<2x8x8xf32> to vector<2x8x8xbf16>
    "tpu.trace_start"() <{level = 10 : i32, message = "bqk,bkd->bqd"}> : () -> ()
    %cst_87 = arith.constant dense<0.000000e+00> : vector<2x8x8xf32>
    %241 = tpu.matmul %240, %228, %cst_87 {dimension_numbers = #tpu.dot_dimension_numbers<[2], [1], [1], [2], [0, 0, 0, 1, 1, 2], [0], [0]>} : vector<2x8x8xbf16>, vector<2x8x8xbf16>, vector<2x8x8xf32> -> vector<2x8x8xf32>
    "tpu.trace_stop"() : () -> ()
    %242 = arith.truncf %241 : vector<2x8x8xf32> to vector<2x8x8xbf16>
    %243 = vector.extract_strided_slice %182 {offsets = [2, 0, 0], sizes = [1, 8, 32], strides = [1, 1, 1]} : vector<4x8x32xbf16> to vector<1x8x32xbf16>
    %244 = vector.shape_cast %243 : vector<1x8x32xbf16> to vector<8x32xbf16>
    %cst_88 = arith.constant dense<0.000000e+00> : vector<2x8x32xf32>
    %245 = tpu.matmul %242, %244, %cst_88 {dimension_numbers = #tpu.dot_dimension_numbers<[2], [0], [0, 1], [1], [0, 0, 0, 1, 1, 1], [], []>} : vector<2x8x8xbf16>, vector<8x32xbf16>, vector<2x8x32xf32> -> vector<2x8x32xf32>
    %246 = arith.addf %225, %245 : vector<2x8x32xf32>
    %247 = vector.extract_strided_slice %177 {offsets = [0, 0, 24], sizes = [2, 8, 8], strides = [1, 1, 1]} : vector<2x8x32xbf16> to vector<2x8x8xbf16>
    %248 = vector.extract_strided_slice %179 {offsets = [0, 0, 24], sizes = [2, 8, 8], strides = [1, 1, 1]} : vector<2x8x32xbf16> to vector<2x8x8xbf16>
    %249 = vector.extract_strided_slice %180 {offsets = [0, 0, 24], sizes = [2, 8, 8], strides = [1, 1, 1]} : vector<2x8x32xbf16> to vector<2x8x8xbf16>
    "tpu.trace_start"() <{level = 10 : i32, message = "bqd,bkd->bqk"}> : () -> ()
    %cst_89 = arith.constant dense<0.000000e+00> : vector<2x8x8xf32>
    %250 = tpu.matmul %247, %248, %cst_89 {dimension_numbers = #tpu.dot_dimension_numbers<[2], [2], [1], [1], [0, 0, 0, 1, 1, 1], [0], [0]>} : vector<2x8x8xbf16>, vector<2x8x8xbf16>, vector<2x8x8xf32> -> vector<2x8x8xf32>
    "tpu.trace_stop"() : () -> ()
    %cst_90 = arith.constant dense<0xFF800000> : vector<2x8xf32>
    %251 = vector.multi_reduction <maximumf>, %250, %cst_90 [2] : vector<2x8x8xf32> to vector<2x8xf32>
    %252 = vector.shape_cast %251 : vector<2x8xf32> to vector<2x8x1xf32>
    %253 = vector.broadcast %252 : vector<2x8x1xf32> to vector<2x8x8xf32>
    %254 = arith.subf %250, %253 : vector<2x8x8xf32>
    %255 = math.exp %254 : vector<2x8x8xf32>
    %cst_91 = arith.constant dense<0.000000e+00> : vector<2x8xf32>
    %256 = vector.multi_reduction <add>, %255, %cst_91 [2] : vector<2x8x8xf32> to vector<2x8xf32>
    %257 = vector.shape_cast %256 : vector<2x8xf32> to vector<2x8x1xf32>
    %258 = tpu.reciprocal %257 {approx = true} : vector<2x8x1xf32> -> vector<2x8x1xf32>
    %259 = vector.broadcast %258 : vector<2x8x1xf32> to vector<2x8x8xf32>
    %260 = arith.mulf %255, %259 : vector<2x8x8xf32>
    %261 = arith.truncf %260 : vector<2x8x8xf32> to vector<2x8x8xbf16>
    "tpu.trace_start"() <{level = 10 : i32, message = "bqk,bkd->bqd"}> : () -> ()
    %cst_92 = arith.constant dense<0.000000e+00> : vector<2x8x8xf32>
    %262 = tpu.matmul %261, %249, %cst_92 {dimension_numbers = #tpu.dot_dimension_numbers<[2], [1], [1], [2], [0, 0, 0, 1, 1, 2], [0], [0]>} : vector<2x8x8xbf16>, vector<2x8x8xbf16>, vector<2x8x8xf32> -> vector<2x8x8xf32>
    "tpu.trace_stop"() : () -> ()
    %263 = arith.truncf %262 : vector<2x8x8xf32> to vector<2x8x8xbf16>
    %264 = vector.extract_strided_slice %182 {offsets = [3, 0, 0], sizes = [1, 8, 32], strides = [1, 1, 1]} : vector<4x8x32xbf16> to vector<1x8x32xbf16>
    %265 = vector.shape_cast %264 : vector<1x8x32xbf16> to vector<8x32xbf16>
    %cst_93 = arith.constant dense<0.000000e+00> : vector<2x8x32xf32>
    %266 = tpu.matmul %263, %265, %cst_93 {dimension_numbers = #tpu.dot_dimension_numbers<[2], [0], [0, 1], [1], [0, 0, 0, 1, 1, 1], [], []>} : vector<2x8x8xbf16>, vector<8x32xbf16>, vector<2x8x32xf32> -> vector<2x8x32xf32>
    %267 = arith.addf %246, %266 : vector<2x8x32xf32>
    %c0_94 = arith.constant 0 : index
    %c0_95 = arith.constant 0 : index
    %c0_96 = arith.constant 0 : index
    %268 = vector.load %arg14[%c0_94, %c0_95, %c0_96] : memref<1x1x32xf32, #tpu.memory_space<vmem>>, vector<1x1x32xf32>
    %269 = vector.shape_cast %268 : vector<1x1x32xf32> to vector<1x32xf32>
    %270 = vector.shape_cast %269 : vector<1x32xf32> to vector<1x1x32xf32>
    %271 = vector.broadcast %270 : vector<1x1x32xf32> to vector<2x8x32xf32>
    %272 = arith.addf %267, %271 : vector<2x8x32xf32>
    %273 = arith.addf %272, %157 : vector<2x8x32xf32>
    %c0_97 = arith.constant 0 : index
    %c0_98 = arith.constant 0 : index
    %c0_99 = arith.constant 0 : index
    %274 = vector.load %arg15[%c0_97, %c0_98, %c0_99] : memref<1x1x32xf32, #tpu.memory_space<vmem>>, vector<1x1x32xf32>
    %275 = vector.shape_cast %274 : vector<1x1x32xf32> to vector<1x32xf32>
    %c0_100 = arith.constant 0 : index
    %c0_101 = arith.constant 0 : index
    %c0_102 = arith.constant 0 : index
    %276 = vector.load %arg16[%c0_100, %c0_101, %c0_102] : memref<1x1x32xf32, #tpu.memory_space<vmem>>, vector<1x1x32xf32>
    %277 = vector.shape_cast %276 : vector<1x1x32xf32> to vector<1x32xf32>
    %cst_103 = arith.constant dense<0.000000e+00> : vector<2x8xf32>
    %278 = vector.multi_reduction <add>, %273, %cst_103 [2] : vector<2x8x32xf32> to vector<2x8xf32>
    %279 = vector.shape_cast %278 : vector<2x8xf32> to vector<2x8x1xf32>
    %cst_104 = arith.constant 3.200000e+01 : f32
    %280 = vector.broadcast %cst_104 : f32 to vector<2x8x1xf32>
    %281 = arith.divf %279, %280 : vector<2x8x1xf32>
    %282 = vector.broadcast %281 : vector<2x8x1xf32> to vector<2x8x32xf32>
    %283 = arith.subf %273, %282 : vector<2x8x32xf32>
    %284 = arith.mulf %283, %283 : vector<2x8x32xf32>
    %cst_105 = arith.constant dense<0.000000e+00> : vector<2x8xf32>
    %285 = vector.multi_reduction <add>, %284, %cst_105 [2] : vector<2x8x32xf32> to vector<2x8xf32>
    %286 = vector.shape_cast %285 : vector<2x8xf32> to vector<2x8x1xf32>
    %cst_106 = arith.constant 3.200000e+01 : f32
    %287 = vector.broadcast %cst_106 : f32 to vector<2x8x1xf32>
    %288 = arith.divf %286, %287 : vector<2x8x1xf32>
    %289 = vector.broadcast %281 : vector<2x8x1xf32> to vector<2x8x32xf32>
    %290 = arith.subf %273, %289 : vector<2x8x32xf32>
    %cst_107 = arith.constant 9.99999974E-6 : f32
    %291 = vector.broadcast %cst_107 : f32 to vector<2x8x1xf32>
    %292 = arith.addf %288, %291 : vector<2x8x1xf32>
    %293 = math.rsqrt %292 : vector<2x8x1xf32>
    %294 = vector.broadcast %293 : vector<2x8x1xf32> to vector<2x8x32xf32>
    %295 = arith.mulf %290, %294 : vector<2x8x32xf32>
    %296 = vector.shape_cast %275 : vector<1x32xf32> to vector<1x1x32xf32>
    %297 = vector.broadcast %296 : vector<1x1x32xf32> to vector<2x8x32xf32>
    %298 = arith.mulf %295, %297 : vector<2x8x32xf32>
    %299 = vector.shape_cast %277 : vector<1x32xf32> to vector<1x1x32xf32>
    %300 = vector.broadcast %299 : vector<1x1x32xf32> to vector<2x8x32xf32>
    %301 = arith.addf %298, %300 : vector<2x8x32xf32>
    %c0_108 = arith.constant 0 : index
    %c0_109 = arith.constant 0 : index
    %c0_110 = arith.constant 0 : index
    %302 = vector.load %arg17[%c0_108, %c0_109, %c0_110] : memref<1x32x64xbf16, #tpu.memory_space<vmem>>, vector<1x32x64xbf16>
    %303 = vector.shape_cast %302 : vector<1x32x64xbf16> to vector<32x64xbf16>
    %c0_111 = arith.constant 0 : index
    %c0_112 = arith.constant 0 : index
    %c0_113 = arith.constant 0 : index
    %304 = vector.load %arg18[%c0_111, %c0_112, %c0_113] : memref<1x1x64xf32, #tpu.memory_space<vmem>>, vector<1x1x64xf32>
    %305 = vector.shape_cast %304 : vector<1x1x64xf32> to vector<1x64xf32>
    %c0_114 = arith.constant 0 : index
    %c0_115 = arith.constant 0 : index
    %c0_116 = arith.constant 0 : index
    %306 = vector.load %arg19[%c0_114, %c0_115, %c0_116] : memref<1x64x32xbf16, #tpu.memory_space<vmem>>, vector<1x64x32xbf16>
    %307 = vector.shape_cast %306 : vector<1x64x32xbf16> to vector<64x32xbf16>
    %c0_117 = arith.constant 0 : index
    %c0_118 = arith.constant 0 : index
    %c0_119 = arith.constant 0 : index
    %308 = vector.load %arg20[%c0_117, %c0_118, %c0_119] : memref<1x1x32xf32, #tpu.memory_space<vmem>>, vector<1x1x32xf32>
    %309 = vector.shape_cast %308 : vector<1x1x32xf32> to vector<1x32xf32>
    %c0_120 = arith.constant 0 : index
    %c0_121 = arith.constant 0 : index
    %c0_122 = arith.constant 0 : index
    %310 = vector.load %arg21[%c0_120, %c0_121, %c0_122] : memref<1x1x32xf32, #tpu.memory_space<vmem>>, vector<1x1x32xf32>
    %311 = vector.shape_cast %310 : vector<1x1x32xf32> to vector<1x32xf32>
    %c0_123 = arith.constant 0 : index
    %c0_124 = arith.constant 0 : index
    %c0_125 = arith.constant 0 : index
    %312 = vector.load %arg22[%c0_123, %c0_124, %c0_125] : memref<1x1x32xf32, #tpu.memory_space<vmem>>, vector<1x1x32xf32>
    %313 = vector.shape_cast %312 : vector<1x1x32xf32> to vector<1x32xf32>
    %314 = arith.truncf %301 : vector<2x8x32xf32> to vector<2x8x32xbf16>
    %cst_126 = arith.constant dense<0.000000e+00> : vector<2x8x64xf32>
    %315 = tpu.matmul %314, %303, %cst_126 {dimension_numbers = #tpu.dot_dimension_numbers<[2], [0], [0, 1], [1], [0, 0, 0, 1, 1, 1], [], []>} : vector<2x8x32xbf16>, vector<32x64xbf16>, vector<2x8x64xf32> -> vector<2x8x64xf32>
    %316 = vector.shape_cast %305 : vector<1x64xf32> to vector<1x1x64xf32>
    %317 = vector.broadcast %316 : vector<1x1x64xf32> to vector<2x8x64xf32>
    %318 = arith.addf %315, %317 : vector<2x8x64xf32>
    %cst_127 = arith.constant 0.000000e+00 : f32
    %319 = vector.broadcast %cst_127 : f32 to vector<2x8x64xf32>
    %320 = arith.maximumf %318, %319 : vector<2x8x64xf32>
    %321 = arith.truncf %320 : vector<2x8x64xf32> to vector<2x8x64xbf16>
    %cst_128 = arith.constant dense<0.000000e+00> : vector<2x8x32xf32>
    %322 = tpu.matmul %321, %307, %cst_128 {dimension_numbers = #tpu.dot_dimension_numbers<[2], [0], [0, 1], [1], [0, 0, 0, 1, 1, 1], [], []>} : vector<2x8x64xbf16>, vector<64x32xbf16>, vector<2x8x32xf32> -> vector<2x8x32xf32>
    %323 = vector.shape_cast %309 : vector<1x32xf32> to vector<1x1x32xf32>
    %324 = vector.broadcast %323 : vector<1x1x32xf32> to vector<2x8x32xf32>
    %325 = arith.addf %322, %324 : vector<2x8x32xf32>
    %326 = arith.addf %325, %301 : vector<2x8x32xf32>
    %cst_129 = arith.constant dense<0.000000e+00> : vector<2x8xf32>
    %327 = vector.multi_reduction <add>, %326, %cst_129 [2] : vector<2x8x32xf32> to vector<2x8xf32>
    %328 = vector.shape_cast %327 : vector<2x8xf32> to vector<2x8x1xf32>
    %cst_130 = arith.constant 3.200000e+01 : f32
    %329 = vector.broadcast %cst_130 : f32 to vector<2x8x1xf32>
    %330 = arith.divf %328, %329 : vector<2x8x1xf32>
    %331 = vector.broadcast %330 : vector<2x8x1xf32> to vector<2x8x32xf32>
    %332 = arith.subf %326, %331 : vector<2x8x32xf32>
    %333 = arith.mulf %332, %332 : vector<2x8x32xf32>
    %cst_131 = arith.constant dense<0.000000e+00> : vector<2x8xf32>
    %334 = vector.multi_reduction <add>, %333, %cst_131 [2] : vector<2x8x32xf32> to vector<2x8xf32>
    %335 = vector.shape_cast %334 : vector<2x8xf32> to vector<2x8x1xf32>
    %cst_132 = arith.constant 3.200000e+01 : f32
    %336 = vector.broadcast %cst_132 : f32 to vector<2x8x1xf32>
    %337 = arith.divf %335, %336 : vector<2x8x1xf32>
    %338 = vector.broadcast %330 : vector<2x8x1xf32> to vector<2x8x32xf32>
    %339 = arith.subf %326, %338 : vector<2x8x32xf32>
    %cst_133 = arith.constant 9.99999974E-6 : f32
    %340 = vector.broadcast %cst_133 : f32 to vector<2x8x1xf32>
    %341 = arith.addf %337, %340 : vector<2x8x1xf32>
    %342 = math.rsqrt %341 : vector<2x8x1xf32>
    %343 = vector.broadcast %342 : vector<2x8x1xf32> to vector<2x8x32xf32>
    %344 = arith.mulf %339, %343 : vector<2x8x32xf32>
    %345 = vector.shape_cast %311 : vector<1x32xf32> to vector<1x1x32xf32>
    %346 = vector.broadcast %345 : vector<1x1x32xf32> to vector<2x8x32xf32>
    %347 = arith.mulf %344, %346 : vector<2x8x32xf32>
    %348 = vector.shape_cast %313 : vector<1x32xf32> to vector<1x1x32xf32>
    %349 = vector.broadcast %348 : vector<1x1x32xf32> to vector<2x8x32xf32>
    %350 = arith.addf %347, %349 : vector<2x8x32xf32>
    %c0_134 = arith.constant 0 : index
    %c0_135 = arith.constant 0 : index
    %c0_136 = arith.constant 0 : index
    %351 = vector.load %arg23[%c0_134, %c0_135, %c0_136] : memref<2x8x32xf32, #tpu.memory_space<vmem>>, vector<2x8x32xf32>
    tpu.vector_store %arg23[%c0_134, %c0_135, %c0_136], %350 {strides = array<i32>} : memref<2x8x32xf32, #tpu.memory_space<vmem>>, vector<2x8x32xf32>,
    return
  }
  func.func @transform_0(%arg0: i32) -> (i32, i32, i32) {
    %c0_i32 = arith.constant 0 : i32
    %c0_i32_0 = arith.constant 0 : i32
    %c0_i32_1 = arith.constant 0 : i32
    %c0_i32_2 = arith.constant 0 : i32
    return %c0_i32, %c0_i32_0, %c0_i32_1 : i32, i32, i32
  }
  func.func @transform_1(%arg0: i32) -> (i32, i32, i32) {
    %c0_i32 = arith.constant 0 : i32
    %c0_i32_0 = arith.constant 0 : i32
    %c0_i32_1 = arith.constant 0 : i32
    %c0_i32_2 = arith.constant 0 : i32
    return %c0_i32, %c0_i32_0, %c0_i32_1 : i32, i32, i32
  }
  func.func @transform_2(%arg0: i32) -> (i32, i32, i32) {
    %c0_i32 = arith.constant 0 : i32
    %c0_i32_0 = arith.constant 0 : i32
    %c0_i32_1 = arith.constant 0 : i32
    return %arg0, %c0_i32, %c0_i32_0 : i32, i32, i32
  }
  func.func @transform_3(%arg0: i32) -> (i32, i32, i32) {
    %c0_i32 = arith.constant 0 : i32
    %c0_i32_0 = arith.constant 0 : i32
    %c0_i32_1 = arith.constant 0 : i32
    return %arg0, %c0_i32, %c0_i32_0 : i32, i32, i32
  }
  func.func @transform_4(%arg0: i32) -> (i32, i32, i32, i32) {
    %c0_i32 = arith.constant 0 : i32
    %c0_i32_0 = arith.constant 0 : i32
    %c0_i32_1 = arith.constant 0 : i32
    %c0_i32_2 = arith.constant 0 : i32
    return %arg0, %c0_i32, %c0_i32_0, %c0_i32_1 : i32, i32, i32, i32
  }
  func.func @transform_5(%arg0: i32) -> (i32, i32, i32) {
    %c0_i32 = arith.constant 0 : i32
    %c0_i32_0 = arith.constant 0 : i32
    %c0_i32_1 = arith.constant 0 : i32
    return %arg0, %c0_i32, %c0_i32_0 : i32, i32, i32
  }
  func.func @transform_6(%arg0: i32) -> (i32, i32, i32) {
    %c0_i32 = arith.constant 0 : i32
    %c0_i32_0 = arith.constant 0 : i32
    %c0_i32_1 = arith.constant 0 : i32
    return %arg0, %c0_i32, %c0_i32_0 : i32, i32, i32
  }
  func.func @transform_7(%arg0: i32) -> (i32, i32, i32) {
    %c0_i32 = arith.constant 0 : i32
    %c0_i32_0 = arith.constant 0 : i32
    %c0_i32_1 = arith.constant 0 : i32
    return %arg0, %c0_i32, %c0_i32_0 : i32, i32, i32
  }
  func.func @transform_8(%arg0: i32) -> (i32, i32, i32) {
    %c0_i32 = arith.constant 0 : i32
    %c0_i32_0 = arith.constant 0 : i32
    %c0_i32_1 = arith.constant 0 : i32
    return %arg0, %c0_i32, %c0_i32_0 : i32, i32, i32
  }
  func.func @transform_9(%arg0: i32) -> (i32, i32, i32) {
    %c0_i32 = arith.constant 0 : i32
    %c0_i32_0 = arith.constant 0 : i32
    %c0_i32_1 = arith.constant 0 : i32
    return %arg0, %c0_i32, %c0_i32_0 : i32, i32, i32
  }
  func.func @transform_10(%arg0: i32) -> (i32, i32, i32) {
    %c0_i32 = arith.constant 0 : i32
    %c0_i32_0 = arith.constant 0 : i32
    %c0_i32_1 = arith.constant 0 : i32
    return %arg0, %c0_i32, %c0_i32_0 : i32, i32, i32
  }
  func.func @transform_11(%arg0: i32) -> (i32, i32, i32) {
    %c0_i32 = arith.constant 0 : i32
    %c0_i32_0 = arith.constant 0 : i32
    %c0_i32_1 = arith.constant 0 : i32
    return %arg0, %c0_i32, %c0_i32_0 : i32, i32, i32
  }
  func.func @transform_12(%arg0: i32) -> (i32, i32, i32, i32) {
    %c0_i32 = arith.constant 0 : i32
    %c0_i32_0 = arith.constant 0 : i32
    %c0_i32_1 = arith.constant 0 : i32
    %c0_i32_2 = arith.constant 0 : i32
    return %arg0, %c0_i32, %c0_i32_0, %c0_i32_1 : i32, i32, i32, i32
  }
  func.func @transform_13(%arg0: i32) -> (i32, i32, i32) {
    %c0_i32 = arith.constant 0 : i32
    %c0_i32_0 = arith.constant 0 : i32
    %c0_i32_1 = arith.constant 0 : i32
    return %arg0, %c0_i32, %c0_i32_0 : i32, i32, i32
  }
  func.func @transform_14(%arg0: i32) -> (i32, i32, i32) {
    %c0_i32 = arith.constant 0 : i32
    %c0_i32_0 = arith.constant 0 : i32
    %c0_i32_1 = arith.constant 0 : i32
    return %arg0, %c0_i32, %c0_i32_0 : i32, i32, i32
  }
  func.func @transform_15(%arg0: i32) -> (i32, i32, i32) {
    %c0_i32 = arith.constant 0 : i32
    %c0_i32_0 = arith.constant 0 : i32
    %c0_i32_1 = arith.constant 0 : i32
    return %arg0, %c0_i32, %c0_i32_0 : i32, i32, i32
  }
  func.func @transform_16(%arg0: i32) -> (i32, i32, i32) {
    %c0_i32 = arith.constant 0 : i32
    %c0_i32_0 = arith.constant 0 : i32
    %c0_i32_1 = arith.constant 0 : i32
    return %arg0, %c0_i32, %c0_i32_0 : i32, i32, i32
  }
  func.func @transform_17(%arg0: i32) -> (i32, i32, i32) {
    %c0_i32 = arith.constant 0 : i32
    %c0_i32_0 = arith.constant 0 : i32
    %c0_i32_1 = arith.constant 0 : i32
    return %arg0, %c0_i32, %c0_i32_0 : i32, i32, i32
  }
  func.func @transform_18(%arg0: i32) -> (i32, i32, i32) {
    %c0_i32 = arith.constant 0 : i32
    %c0_i32_0 = arith.constant 0 : i32
    %c0_i32_1 = arith.constant 0 : i32
    return %arg0, %c0_i32, %c0_i32_0 : i32, i32, i32
  }
  func.func @transform_19(%arg0: i32) -> (i32, i32, i32) {
    %c0_i32 = arith.constant 0 : i32
    %c0_i32_0 = arith.constant 0 : i32
    %c0_i32_1 = arith.constant 0 : i32
    return %arg0, %c0_i32, %c0_i32_0 : i32, i32, i32
  }
  func.func @transform_20(%arg0: i32) -> (i32, i32, i32) {
    %c0_i32 = arith.constant 0 : i32
    %c0_i32_0 = arith.constant 0 : i32
    %c0_i32_1 = arith.constant 0 : i32
    return %arg0, %c0_i32, %c0_i32_0 : i32, i32, i32
  }
  func.func @transform_21(%arg0: i32) -> (i32, i32, i32) {
    %c0_i32 = arith.constant 0 : i32
    %c0_i32_0 = arith.constant 0 : i32
    %c0_i32_1 = arith.constant 0 : i32
    return %arg0, %c0_i32, %c0_i32_0 : i32, i32, i32
  }
  func.func @transform_22(%arg0: i32) -> (i32, i32, i32) {
    %c0_i32 = arith.constant 0 : i32
    %c0_i32_0 = arith.constant 0 : i32
    %c0_i32_1 = arith.constant 0 : i32
    %c0_i32_2 = arith.constant 0 : i32
    return %c0_i32, %c0_i32_0, %c0_i32_1 : i32, i32, i32
  }
}

</mosaic_0001>

<bundles_post_ra>
// kernel: transformer_forward.2
= control target key start
LH: loop header
LB: loop body
LE: loop exit
PB: predicated region body
PF: predicated region fallthrough
CT: control target
= control target key end

     0   :  { %s2629_s25 = smov 0   ;;  %s2965_s0 = inlined_call_operand.vmem [shape: f32[2,8,32], index: 0, kind: input, shape index: {}]   ;;  %s2966_s1 = inlined_call_operand.vmem [shape: bf16[2,32,96], index: 1, kind: input, shape index: {}]   ;;  %s2967_s2 = inlined_call_operand.vmem [shape: f32[2,1,96], index: 2, kind: input, shape index: {}]   ;;  %s2968_s3 = inlined_call_operand.vmem [shape: bf16[2,4,8,32], index: 3, kind: input, shape index: {}]   ;;  %s2969_s4 = inlined_call_operand.vmem [shape: f32[2,1,32], index: 4, kind: input, shape index: {}]   ;;  %s2970_s5 = inlined_call_operand.vmem [shape: f32[2,1,32], index: 5, kind: input, shape index: {}]   ;;  %s2971_s6 = inlined_call_operand.vmem [shape: f32[2,1,32], index: 6, kind: input, shape index: {}]   ;;  %s2972_s7 = inlined_call_operand.vmem [shape: bf16[2,32,64], index: 7, kind: input, shape index: {}]   ;;  %s2973_s8 = inlined_call_operand.vmem [shape: f32[2,1,64], index: 8, kind: input, shape index: {}]   ;;  %s2974_s9 = inlined_call_operand.vmem [shape: bf16[2,64,32], index: 9, kind: input, shape index: {}]   ;;  %s2975_s10 = inlined_call_operand.vmem [shape: f32[2,1,32], index: 10, kind: input, shape index: {}]   ;;  %s2976_s11 = inlined_call_operand.vmem [shape: f32[2,1,32], index: 11, kind: input, shape index: {}]   ;;  %s2977_s12 = inlined_call_operand.vmem [shape: f32[2,1,32], index: 12, kind: input, shape index: {}]   ;;  %s2978_s13 = inlined_call_operand.vmem [shape: f32[2,8,32], index: 13, kind: output, shape index: {}]  }
   0x1   :  { %2983 = sst [smem:[#allocation3_spill]] %s2965_s0 }
   0x2   :  { %2984 = sst [smem:[#allocation4_spill]] %s2966_s1 }
   0x3   :  { %2985 = sst [smem:[#allocation5_spill]] %s2968_s3 }
   0x4   :  { %2986 = sst [smem:[#allocation6_spill]] %s2978_s13 }
   0x5 LB: > { %2987 = sst [smem:[#allocation2_spill]] %s2544_s25  ;;  %s2198_s26 = sadd.s32 4294967295, %s2544_s25   ;;  %s2544_s25 = sphi %s2629_s25, %s23_s25  }
   0x6   : > { %p2201_p0 = scmp.ge.s32.totalorder %s2544_s25, 1  ;;  %p476_p1 = scmp.lt.s32.totalorder %s2544_s25, 3 }
   0x8   : > { %p477_p2 = pnand %p2201_p0, %p476_p1 }
   0x9   : > { %p554_p3 = scmp.lt.s32.totalorder (!%p477_p2), %s2198_s26, 1  ;;  %s2988_s1 = sld [smem:[#allocation4_spill]] (!%p477_p2) }
   0xa   : > { %480 = sbr.rel (%p477_p2) target bundleno = 4448 (0x1160), region = 72  ;;  %s2989_s3 = sld [smem:[#allocation5_spill]] (!%p477_p2) }
   0xb   : > { %p2210_p4 = scmp.ne.s32.totalorder (!%p477_p2), %s2198_s26, 0 }
  0x11   : > { %s2637_s27 = scalar_select %p554_p3, %s2198_s26, 1 }
  0x12   : > { %602 = sbr.rel (%p2210_p4) target bundleno = 31 (0x1f), region = 76  ;;  %vm605_vm0 = vcmask (!%p2210_p4), 261120   ;;  %s2991_s24 = sld [smem:[#allocation6_spill]] (!%p2210_p4) }
  0x13   : > { %s2259_s28 = sshll.u32 %s2637_s27, 4  ;;  %s591_s0 = scalar_lea.vmem %s2975_s10, %s2637_s27 }
  0x14   : > { %s558_s17 = scalar_lea.vmem %s2988_s1, %s2259_s28  ;;  %s2650_s20 = scalar_lea.vmem %s2989_s3, %s2259_s28 }
  0x15   : > { %s2667_s16 = scalar_lea.vmem %s2972_s7, %s2259_s28  ;;  %s2262_s3 = sshll.u32 %s2637_s27, 5 }
  0x16   : > { %s2677_s23 = scalar_lea.vmem %s2974_s9, %s2262_s3  ;;  %s594_s14 = scalar_lea.vmem %s2976_s11, %s2637_s27 }
  0x17   : > { %s597_s13 = scalar_lea.vmem %s2977_s12, %s2637_s27  ;;  %s2990_s1 = sld [smem:[#allocation3_spill]] (!%p2210_p4) }
  0x1d   : > { %v603_v0 = vld [vmem:[%s2990_s1] sm:$0xff]  ;;  %v604_v1 = vld [vmem:[%s2990_s1 + $0x8] sm:$0xff] }
  0x1e   : > { %606 = vst.msk [vmem:[%s2991_s24] sm:$0xff] %vm605_vm0, %v603_v0  ;;  %607 = vst.msk [vmem:[%s2991_s24 + $0x8] sm:$0xff] %vm605_vm0, %v604_v1 }
  0x1f PF: > { %v2490_v2 = vld [vmem:[%s558_s17] sm:$0xff]   ;;  %v2546_v3 = vmov 0.0   ;;  %v2491_v4 = vld [vmem:[%s558_s17 + $0x8] sm:$0xff]   ;;  %vm2547_vm1 = vmmov 0   ;;  %s2992_s15 = sld [smem:[#allocation6_spill]]  ;;  %vm640_vm2 = vcmask 261120   ;;  %s2993_s21 = scalar_lea.vmem %s2967_s2, %s2637_s27 }
  0x20   : > { %2321 = vmatprep.subr.bf16.mxu1 %v2546_v3  ;;  %2335 = vmatprep.subr.bf16.mxu0 %v2546_v3  ;;  %v2211_v8 = vld [vmem:[%s2993_s21] ss:$0 sm:$0xff]  ;;  %s2548_s22 = smov 96   ;;  %vm694_vm3 = vcmask 64512   ;;  %s2549_s25 = smov 64   ;;  %vm819_vm4 = vcmask 1043456  }
  0x21   : > { %2322 = vmatpush3.bf16.msra.mxu1 %v2490_v2  ;;  %2325 = vmatprep.mubr.msk.bf16.mxu1 %vm2547_vm1, %v2546_v3  ;;  %s2550_s24 = smov 88   ;;  %s2551_s30 = smov 120   ;;  %vm1971_vm5 = vcmask 523264  }
  0x22   : > { %2323 = vmatprep.subr.bf16.mxu1 %v2546_v3  ;;  %2337 = vmatprep.mubr.msk.bf16.mxu0 %vm2547_vm1, %v2546_v3  ;;  %s2552_s29 = smov 56   ;;  %s2553_s26 = smov 112  }
  0x23   : > { %s2554_s28 = smov 80   ;;  %s2555_s18 = smov 48  }
  0x24   : > { %s2556_s19 = smov 72   ;;  %s2557_s17 = smov 104  }
  0x25   : > { %v2710_v5 = vld [vmem:[%s2992_s15] sm:$0xff]  ;;  %v2715_v6 = vld [vmem:[%s2992_s15 + $0x8] sm:$0xff]  ;;  %2324 = vmatpush3.bf16.msra.mxu1 %v2491_v4  ;;  %s2558_s3 = smov 40  }
  0x26   : > { %v2263_v7 = vpack.c.bf16 %v2715_v6, %v2710_v5  ;;  %2329 = vmatprep.subr.bf16.mxu1 %v2546_v3 }
  0x28   : > { %2326 = vmatmul.mubr.msk.bf16.vlgmr.msra.gmra.mrb[0].mxu1 %vm640_vm2, %v2263_v7 }
  0x29   : > { %2331 = vmatprep.mubr.msk.bf16.mxu1 %vm2547_vm1, %v2546_v3 }
  0xfb   : > { %v678_v9 = vpop.f32.mrb[0].mxu1 }
  0xfc   : > { %v679_v10 = vadd.f32 %v2211_v8, %v678_v9  ;;  %v2327_v11 = vpop.f32.mrb[1].mxu1 }
  0xfd   : > { %v681_v12 = vpop.f32.mrb[2].mxu1 }
  0xfe   : > { %v2731_v13 = vpack.c.bf16 %v679_v10, %v679_v10  ;;  %v682_v14 = vadd.f32 %v2211_v8, %v681_v12  ;;  %v2328_v15 = vpop.f32.mrb[3].mxu1 }
 0x100   : > { %692 = vrot.lane.b32.xlu0 %v2731_v13, %s2548_s22  ;;  %v2734_v16 = vpack.c.bf16 %v682_v14, %v682_v14 }
 0x104   : > { %742 = vrot.lane.b32.xlu0 %v2734_v16, %s2548_s22  ;;  %s2994_s22 = scalar_lea.vmem %s2969_s4, %s2637_s27 }
 0x172   : > { %v693_v17 = vpop.permute.xlu0 %692 }
 0x173   : > { %v699_v18 = vsel %vm694_vm3, %v693_v17, 0 }
 0x174   : > { %2330 = vmatpush3.bf16.xpose.msra.mxu1 %v699_v18 }
 0x175   : > { %2341 = vmatprep.subr.bf16.mxu1 %v2546_v3 }
 0x176   : > { %v743_v19 = vpop.permute.xlu0 %742 }
 0x177   : > { %v748_v20 = vsel %vm694_vm3, %v743_v19, 0 }
 0x178   : > { %2336 = vmatpush3.bf16.xpose.msra.mxu0 %v748_v20 }
 0x179   : > { %2347 = vmatprep.subr.bf16.mxu0 %v2546_v3 }
 0x17b   : > { %2332 = vmatmul.mubr.msk.bf16.vlgmr.msra.gmra.mrb[4].mxu1 %vm694_vm3, %v2731_v13 }
 0x17c   : > { %2343 = vmatprep.mubr.msk.bf16.mxu1 %vm2547_vm1, %v2546_v3 }
 0x17f   : > { %2338 = vmatmul.mubr.msk.bf16.vlgmr.msra.gmra.mrb[0].mxu0 %vm694_vm3, %v2734_v16 }
 0x180   : > { %2349 = vmatprep.mubr.msk.bf16.mxu0 %vm2547_vm1, %v2546_v3 }
 0x24e   : > { %v735_v21 = vpop.f32.mrb[4].mxu1 }
 0x24f   : > { %v2333_v22 = vpop.f32.mrb[5].mxu1  ;;  %v790_v23 = vsel %vm694_vm3, %v735_v21, -inf }
 0x250   : > { %791 = vmax.xlane.f32.xlu1 %v790_v23  ;;  %v738_v24 = vpop.f32.mrb[6].mxu1 }
 0x251   : > { %v2334_v25 = vpop.f32.mrb[7].mxu1 }
 0x252   : > { %v784_v26 = vpop.f32.mrb[0].mxu0 }
 0x253   : > { %v2339_v27 = vpop.f32.mrb[1].mxu0  ;;  %v793_v28 = vsel %vm694_vm3, %v784_v26, -inf }
 0x254   : > { %v787_v29 = vpop.f32.mrb[2].mxu0  ;;  %794 = vmax.xlane.f32.xlu1 %v793_v28 }
 0x255   : > { %v2340_v30 = vpop.f32.mrb[3].mxu0 }
 0x265   : > { %814 = vrot.lane.b32.xlu1 %v2731_v13, %s2549_s25 }
 0x269   : > { %863 = vrot.lane.b32.xlu1 %v2734_v16, %s2549_s25 }
 0x26d   : > { %915 = vrot.lane.b32.xlu1 %v2731_v13, %s2550_s24 }
 0x2dd   : > { %v792_v31 = vpop.xlane.xlu1 %791 }
 0x2de   : > { %v796_v32 = vsub.f32 %v735_v21, %v792_v31 }
 0x2e0   : > { %v798_v33 = vmul.f32 1.442695, %v796_v32 }
 0x2e1   : > { %v795_v34 = vpop.xlane.xlu1 %794 }
 0x2e2   : > { %2498 = vpow2.f32 %v798_v33  ;;  %v797_v35 = vsub.f32 %v784_v26, %v795_v34 }
 0x2e4   : > { %v800_v36 = vmul.f32 1.442695, %v797_v35 }
 0x2e5   : > { %v815_v37 = vpop.permute.xlu1 %814 }
 0x2e6   : > { %2500 = vpow2.f32 %v800_v36  ;;  %v821_v38 = vsel %vm819_vm4, %v815_v37, 0  ;;  %v688_v36 = vld [vmem:[%s2650_s20 + $0x4] sm:$0xf] }
 0x2e7   : > { %2342 = vmatpush3.bf16.msra.mxu1 %v821_v38 }
 0x2e8   : > { %2353 = vmatprep.subr.bf16.mxu1 %v2546_v3 }
 0x2e9   : > { %v864_v39 = vpop.permute.xlu1 %863 }
 0x2ea   : > { %v869_v40 = vsel %vm819_vm4, %v864_v39, 0  ;;  %v1144_v39 = vsel %vm819_vm4, %v688_v36, 0 }
 0x2eb   : > { %2348 = vmatpush3.bf16.msra.mxu0 %v869_v40 }
 0x2ec   : > { %v2499_v41 = vpop.eup %2498  ;;  %2359 = vmatprep.subr.bf16.mxu0 %v2546_v3 }
 0x2ed   : > { %v802_v42 = vsel %vm694_vm3, %v2499_v41, 0.0  ;;  %v916_v45 = vpop.permute.xlu1 %915 }
 0x2ee   : > { %803 = vadd.xlane.f32.xlu0 %v802_v42  ;;  %v921_v52 = vsel %vm694_vm3, %v916_v45, 0 }
 0x2f0   : > { %v2501_v43 = vpop.eup %2500 }
 0x2f1   : > { %v805_v44 = vsel %vm694_vm3, %v2501_v43, 0.0 }
 0x2f2   : > { %806 = vadd.xlane.f32.xlu1 %v805_v44 }
 0x303   : > { %965 = vrot.lane.b32.xlu1 %v2734_v16, %s2550_s24  ;;  %s2995_s24 = scalar_lea.vmem %s2970_s5, %s2637_s27 }
 0x304   : > { %913 = vrot.lane.b32.xlu0 %v2731_v13, %s2551_s30 }
 0x307   : > { %963 = vrot.lane.b32.xlu1 %v2734_v16, %s2551_s30 }
 0x37b   : > { %v804_v46 = vpop.xlane.xlu0 %803 }
 0x37c   : > { %2502 = vrcp.f32 %v804_v46 }
 0x37f   : > { %v807_v47 = vpop.xlane.xlu1 %806  ;;  %v914_v57 = vpop.permute.xlu0 %913 }
 0x380   : > { %2504 = vrcp.f32 %v807_v47 }
 0x383   : > { %v966_v54 = vpop.permute.xlu1 %965 }
 0x384   : > { %v971_v56 = vsel %vm694_vm3, %v966_v54, 0 }
 0x386   : > { %v2503_v48 = vpop.eup %2502 }
 0x387   : > { %v810_v49 = vmul.f32 %v2503_v48, %v2499_v41  ;;  %v964_v58 = vpop.permute.xlu1 %963  ;;  %v687_v41 = vld [vmem:[%s2650_s20] sm:$0xf] }
 0x388   : > { %v1196_v44 = vsel %vm819_vm4, %v687_v41, 0 }
 0x389   : > { %v812_v50 = vpack.c.bf16 %v810_v49, %v810_v49 }
 0x38a   : > { %v2505_v51 = vpop.eup %2504 }
 0x38b   : > { %v811_v53 = vmul.f32 %v2505_v51, %v2501_v43  ;;  %2344 = vmatmul.mubr.msk.bf16.vlgmr.msra.gmra.mrb[8].mxu1 %vm694_vm3, %v812_v50 }
 0x38c   : > { %2354 = vmatpush3.bf16.xpose.msra.mxu1 %v921_v52  ;;  %2355 = vmatprep.mubr.msk.bf16.mxu1 %vm2547_vm1, %v2546_v3 }
 0x38d   : > { %v813_v55 = vpack.c.bf16 %v811_v53, %v811_v53  ;;  %2365 = vmatprep.subr.bf16.mxu1 %v2546_v3 }
 0x38f   : > { %2350 = vmatmul.mubr.msk.bf16.vlgmr.msra.gmra.mrb[4].mxu0 %vm694_vm3, %v813_v55 }
 0x390   : > { %2360 = vmatpush3.bf16.xpose.msra.mxu0 %v971_v56  ;;  %2361 = vmatprep.mubr.msk.bf16.mxu0 %vm2547_vm1, %v2546_v3 }
 0x391   : > { %2371 = vmatprep.subr.bf16.mxu0 %v2546_v3 }
 0x393   : > { %2356 = vmatmul.mubr.msk.bf16.vlgmr.msra.gmra.mrb[12].mxu1 %vm694_vm3, %v914_v57 }
 0x394   : > { %2367 = vmatprep.mubr.msk.bf16.mxu1 %vm2547_vm1, %v2546_v3 }
 0x397   : > { %2362 = vmatmul.mubr.msk.bf16.vlgmr.msra.gmra.mrb[8].mxu0 %vm694_vm3, %v964_v58 }
 0x398   : > { %2373 = vmatprep.mubr.msk.bf16.mxu0 %vm2547_vm1, %v2546_v3 }
 0x45e   : > { %v2779_v59 = vpop.f32.mrb[8].mxu1 }
 0x45f   : > { %v2345_v60 = vpop.f32.mrb[9].mxu1 }
 0x460   : > { %v860_v61 = vpop.f32.mrb[10].mxu1 }
 0x461   : > { %v2346_v62 = vpop.f32.mrb[11].mxu1 }
 0x462   : > { %v2781_v63 = vpop.f32.mrb[4].mxu0 }
 0x463   : > { %v2265_v0 = vpack.c.bf16 %v2781_v63, %v2779_v59  ;;  %v2351_v1 = vpop.f32.mrb[5].mxu0 }
 0x464   : > { %v908_v2 = vpop.f32.mrb[6].mxu0 }
 0x465   : > { %v2352_v4 = vpop.f32.mrb[7].mxu0 }
 0x466   : > { %v957_v7 = vpop.f32.mrb[12].mxu1 }
 0x467   : > { %v2357_v8 = vpop.f32.mrb[13].mxu1  ;;  %v1013_v9 = vsel %vm694_vm3, %v957_v7, -inf }
 0x468   : > { %1014 = vmax.xlane.f32.xlu1 %v1013_v9  ;;  %v960_v10 = vpop.f32.mrb[14].mxu1 }
 0x469   : > { %v2358_v11 = vpop.f32.mrb[15].mxu1 }
 0x46a   : > { %v1007_v12 = vpop.f32.mrb[8].mxu0 }
 0x46b   : > { %v2363_v14 = vpop.f32.mrb[9].mxu0  ;;  %v1016_v15 = vsel %vm694_vm3, %v1007_v12, -inf }
 0x46c   : > { %1017 = vmax.xlane.f32.xlu0 %v1016_v15  ;;  %v1010_v17 = vpop.f32.mrb[10].mxu0 }
 0x46d   : > { %v2364_v18 = vpop.f32.mrb[11].mxu0 }
 0x482   : > { %1085 = vrot.lane.b32.xlu0 %v2734_v16, %s2552_s29 }
 0x486   : > { %1239 = vrot.lane.b32.xlu0 %v2731_v13, %s2553_s26 }
 0x4f5   : > { %v1015_v19 = vpop.xlane.xlu1 %1014 }
 0x4f6   : > { %v1019_v20 = vsub.f32 %v957_v7, %v1015_v19 }
 0x4f8   : > { %v1021_v21 = vmul.f32 1.442695, %v1019_v20 }
 0x4f9   : > { %v1018_v22 = vpop.xlane.xlu0 %1017 }
 0x4fa   : > { %2506 = vpow2.f32 %v1021_v21  ;;  %v1020_v23 = vsub.f32 %v1007_v12, %v1018_v22 }
 0x4fc   : > { %v1023_v24 = vmul.f32 1.442695, %v1020_v23 }
 0x4fd   : > { %v1086_v25 = vpop.permute.xlu0 %1085 }
 0x4fe   : > { %2508 = vpow2.f32 %v1023_v24  ;;  %v1091_v26 = vsel %vm819_vm4, %v1086_v25, 0 }
 0x4ff   : > { %2372 = vmatpush3.bf16.msra.mxu0 %v1091_v26 }
 0x500   : > { %2383 = vmatprep.subr.bf16.mxu0 %v2546_v3 }
 0x501   : > { %v1240_v61 = vpop.permute.xlu0 %1239 }
 0x504   : > { %v2507_v27 = vpop.eup %2506 }
 0x505   : > { %v1025_v28 = vsel %vm694_vm3, %v2507_v27, 0.0 }
 0x506   : > { %1026 = vadd.xlane.f32.xlu1 %v1025_v28 }
 0x508   : > { %v2509_v29 = vpop.eup %2508 }
 0x509   : > { %v1028_v30 = vsel %vm694_vm3, %v2509_v29, 0.0 }
 0x50a   : > { %1029 = vadd.xlane.f32.xlu1 %v1028_v30 }
 0x51b   : > { %1037 = vrot.lane.b32.xlu1 %v2731_v13, %s2552_s29 }
 0x51f   : > { %1241 = vrot.lane.b32.xlu1 %v2731_v13, %s2554_s28 }
 0x523   : > { %1291 = vrot.lane.b32.xlu1 %v2734_v16, %s2554_s28 }
 0x527   : > { %1289 = vrot.lane.b32.xlu1 %v2734_v16, %s2553_s26  ;;  %s2996_s26 = scalar_lea.vmem %s2971_s6, %s2637_s27 }
 0x593   : > { %v1027_v31 = vpop.xlane.xlu1 %1026 }
 0x594   : > { %2510 = vrcp.f32 %v1027_v31 }
 0x597   : > { %v1030_v32 = vpop.xlane.xlu1 %1029 }
 0x598   : > { %2512 = vrcp.f32 %v1030_v32 }
 0x59b   : > { %v1038_v33 = vpop.permute.xlu1 %1037 }
 0x59c   : > { %v1043_v34 = vsel %vm819_vm4, %v1038_v33, 0 }
 0x59d   : > { %2366 = vmatpush3.bf16.msra.mxu1 %v1043_v34 }
 0x59e   : > { %v2511_v35 = vpop.eup %2510  ;;  %2377 = vmatprep.subr.bf16.mxu1 %v2546_v3 }
 0x59f   : > { %v1033_v37 = vmul.f32 %v2511_v35, %v2507_v27  ;;  %v1242_v45 = vpop.permute.xlu1 %1241 }
 0x5a0   : > { %v1247_v57 = vsel %vm694_vm3, %v1242_v45, 0 }
 0x5a1   : > { %v1035_v38 = vpack.c.bf16 %v1033_v37, %v1033_v37 }
 0x5a2   : > { %v2513_v40 = vpop.eup %2512 }
 0x5a3   : > { %v1034_v42 = vmul.f32 %v2513_v40, %v2509_v29  ;;  %2368 = vmatmul.mubr.msk.bf16.vlgmr.msra.gmra.mrb[16].mxu1 %vm694_vm3, %v1035_v38  ;;  %v1292_v46 = vpop.permute.xlu1 %1291 }
 0x5a4   : > { %2378 = vmatpush3.bf16.msra.mxu1 %v1144_v39  ;;  %2379 = vmatprep.mubr.msk.bf16.mxu1 %vm2547_vm1, %v2546_v3  ;;  %v1297_v47 = vsel %vm694_vm3, %v1292_v46, 0  ;;  %v689_v46 = vld [vmem:[%s2650_s20 + $0x8] sm:$0xf] }
 0x5a5   : > { %v1036_v43 = vpack.c.bf16 %v1034_v42, %v1034_v42  ;;  %2389 = vmatprep.subr.bf16.mxu1 %v2546_v3 }
 0x5a7   : > { %2374 = vmatmul.mubr.msk.bf16.vlgmr.msra.gmra.mrb[12].mxu0 %vm694_vm3, %v1036_v43  ;;  %v1290_v48 = vpop.permute.xlu1 %1289 }
 0x5a8   : > { %2384 = vmatpush3.bf16.msra.mxu0 %v1196_v44  ;;  %2385 = vmatprep.mubr.msk.bf16.mxu0 %vm2547_vm1, %v2546_v3 }
 0x5a9   : > { %2395 = vmatprep.subr.bf16.mxu0 %v2546_v3 }
 0x5af   : > { %2386 = vmatmul.mubr.msk.bf16.vlgmr.msra.gmra.mrb[16].mxu0 %vm694_vm3, %v2265_v0 }
 0x5b0   : > { %2397 = vmatprep.mubr.msk.bf16.mxu0 %vm2547_vm1, %v2546_v3 }
 0x5b1   : > { %2396 = vmatpush3.bf16.xpose.msra.mxu0 %v1297_v47  ;;  %v1470_v47 = vsel %vm819_vm4, %v689_v46, 0 }
 0x5b2   : > { %2407 = vmatprep.subr.bf16.mxu0 %v2546_v3 }
 0x5b8   : > { %2398 = vmatmul.mubr.msk.bf16.vlgmr.msra.gmra.mrb[20].mxu0 %vm694_vm3, %v1290_v48 }
 0x5b9   : > { %2409 = vmatprep.mubr.msk.bf16.mxu0 %vm2547_vm1, %v2546_v3 }
 0x676   : > { %v1079_v49 = vpop.f32.mrb[16].mxu1 }
 0x677   : > { %v2369_v50 = vpop.f32.mrb[17].mxu1 }
 0x678   : > { %v1082_v51 = vpop.f32.mrb[18].mxu1 }
 0x679   : > { %v2370_v52 = vpop.f32.mrb[19].mxu1 }
 0x67a   : > { %v1127_v53 = vpop.f32.mrb[12].mxu0 }
 0x67b   : > { %v2264_v54 = vpack.c.bf16 %v1127_v53, %v1079_v49  ;;  %v2375_v55 = vpop.f32.mrb[13].mxu0 }
 0x67c   : > { %v1130_v56 = vpop.f32.mrb[14].mxu0 }
 0x67d   : > { %v2376_v58 = vpop.f32.mrb[15].mxu0  ;;  %2380 = vmatmul.mubr.msk.bf16.vlgmr.msra.gmra.mrb[20].mxu1 %vm694_vm3, %v2264_v54 }
 0x67e   : > { %2390 = vmatpush3.bf16.xpose.msra.mxu1 %v1247_v57  ;;  %2391 = vmatprep.mubr.msk.bf16.mxu1 %vm2547_vm1, %v2546_v3 }
 0x67f   : > { %2401 = vmatprep.subr.bf16.mxu1 %v2546_v3 }
 0x682   : > { %v1232_v59 = vpop.f32.mrb[16].mxu0 }
 0x683   : > { %v2387_v60 = vpop.f32.mrb[17].mxu0 }
 0x684   : > { %v1235_v62 = vpop.f32.mrb[18].mxu0 }
 0x685   : > { %v2388_v63 = vpop.f32.mrb[19].mxu0  ;;  %2392 = vmatmul.mubr.msk.bf16.vlgmr.msra.gmra.mrb[24].mxu1 %vm694_vm3, %v1240_v61 }
 0x686   : > { %2403 = vmatprep.mubr.msk.bf16.mxu1 %vm2547_vm1, %v2546_v3 }
 0x68b   : > { %v1333_v0 = vpop.f32.mrb[20].mxu0 }
 0x68c   : > { %v2399_v1 = vpop.f32.mrb[21].mxu0  ;;  %v1342_v2 = vsel %vm694_vm3, %v1333_v0, -inf }
 0x68d   : > { %1343 = vmax.xlane.f32.xlu1 %v1342_v2  ;;  %v1336_v4 = vpop.f32.mrb[22].mxu0 }
 0x68e   : > { %v2400_v7 = vpop.f32.mrb[23].mxu0 }
 0x69e   : > { %1363 = vrot.lane.b32.xlu1 %v2731_v13, %s2555_s18 }
 0x6a2   : > { %1517 = vrot.lane.b32.xlu1 %v2731_v13, %s2556_s19 }
 0x6a6   : > { %1567 = vrot.lane.b32.xlu1 %v2734_v16, %s2556_s19  ;;  %s2997_s19 = scalar_lea.vmem %s2973_s8, %s2637_s27 }
 0x6aa   : > { %1565 = vrot.lane.b32.xlu1 %v2734_v16, %s2557_s17 }
 0x71a   : > { %v1344_v8 = vpop.xlane.xlu1 %1343 }
 0x71b   : > { %v1346_v11 = vsub.f32 %v1333_v0, %v1344_v8 }
 0x71d   : > { %v1349_v12 = vmul.f32 1.442695, %v1346_v11 }
 0x71e   : > { %v1364_v9 = vpop.permute.xlu1 %1363 }
 0x71f   : > { %v1369_v10 = vsel %vm819_vm4, %v1364_v9, 0  ;;  %2514 = vpow2.f32 %v1349_v12 }
 0x720   : > { %2402 = vmatpush3.bf16.msra.mxu1 %v1369_v10 }
 0x721   : > { %2413 = vmatprep.subr.bf16.mxu1 %v2546_v3 }
 0x722   : > { %v1518_v41 = vpop.permute.xlu1 %1517 }
 0x723   : > { %v1523_v43 = vsel %vm694_vm3, %v1518_v41, 0 }
 0x726   : > { %v1568_v52 = vpop.permute.xlu1 %1567 }
 0x727   : > { %v1573_v57 = vsel %vm694_vm3, %v1568_v52, 0 }
 0x729   : > { %v2515_v24 = vpop.eup %2514 }
 0x72a   : > { %v1354_v27 = vsel %vm694_vm3, %v2515_v24, 0.0  ;;  %v1566_v0 = vpop.permute.xlu1 %1565 }
 0x750   : > { %v1180_v14 = vpop.f32.mrb[20].mxu1 }
 0x751   : > { %v2839_v15 = vadd.f32 %v1232_v59, %v1180_v14  ;;  %v2381_v17 = vpop.f32.mrb[21].mxu1 }
 0x752   : > { %v1183_v18 = vpop.f32.mrb[22].mxu1 }
 0x753   : > { %v2841_v19 = vadd.f32 %v1235_v62, %v1183_v18  ;;  %v2382_v20 = vpop.f32.mrb[23].mxu1 }
 0x758   : > { %v1283_v21 = vpop.f32.mrb[24].mxu1 }
 0x759   : > { %v2393_v22 = vpop.f32.mrb[25].mxu1  ;;  %v1339_v23 = vsel %vm694_vm3, %v1283_v21, -inf }
 0x75a   : > { %1340 = vmax.xlane.f32.xlu0 %v1339_v23  ;;  %v1286_v25 = vpop.f32.mrb[26].mxu1 }
 0x75b   : > { %v2394_v26 = vpop.f32.mrb[27].mxu1 }
 0x75e   : > { %1355 = vadd.xlane.f32.xlu0 %v1354_v27 }
 0x7e7   : > { %v1341_v28 = vpop.xlane.xlu0 %1340 }
 0x7e8   : > { %v1345_v29 = vsub.f32 %v1283_v21, %v1341_v28 }
 0x7ea   : > { %v1347_v30 = vmul.f32 1.442695, %v1345_v29 }
 0x7eb   : > { %v1356_v33 = vpop.xlane.xlu0 %1355 }
 0x7ec   : > { %2516 = vpow2.f32 %v1347_v30 }
 0x7ed   : > { %2518 = vrcp.f32 %v1356_v33 }
 0x7f6   : > { %v2517_v31 = vpop.eup %2516 }
 0x7f7   : > { %v1351_v32 = vsel %vm694_vm3, %v2517_v31, 0.0  ;;  %v2519_v34 = vpop.eup %2518 }
 0x7f8   : > { %1352 = vadd.xlane.f32.xlu0 %v1351_v32  ;;  %v1360_v36 = vmul.f32 %v2519_v34, %v2515_v24  ;;  %v690_v32 = vld [vmem:[%s2650_s20 + $0xc] sm:$0xf] }
 0x7f9   : > { %v1746_v33 = vsel %vm819_vm4, %v690_v32, 0  ;;  %v2243_v32 = vld [vmem:[%s2997_s19] ss:$0 sm:$0xff] }
 0x7fa   : > { %v1362_v39 = vpack.c.bf16 %v1360_v36, %v1360_v36 }
 0x80e   : > { %1411 = vrot.lane.b32.xlu0 %v2734_v16, %s2555_s18 }
 0x812   : > { %1515 = vrot.lane.b32.xlu0 %v2731_v13, %s2557_s17 }
 0x885   : > { %v1353_v35 = vpop.xlane.xlu0 %1352 }
 0x886   : > { %2520 = vrcp.f32 %v1353_v35 }
 0x889   : > { %v1412_v37 = vpop.permute.xlu0 %1411 }
 0x88a   : > { %v1417_v38 = vsel %vm819_vm4, %v1412_v37, 0 }
 0x88b   : > { %2408 = vmatpush3.bf16.msra.mxu0 %v1417_v38 }
 0x88c   : > { %2419 = vmatprep.subr.bf16.mxu0 %v2546_v3 }
 0x88d   : > { %v1516_v45 = vpop.permute.xlu0 %1515 }
 0x88e   : > { %2410 = vmatmul.mubr.msk.bf16.vlgmr.msra.gmra.mrb[24].mxu0 %vm694_vm3, %v1362_v39 }
 0x88f   : > { %2421 = vmatprep.mubr.msk.bf16.mxu0 %vm2547_vm1, %v2546_v3 }
 0x890   : > { %v2521_v40 = vpop.eup %2520 }
 0x891   : > { %v1359_v42 = vmul.f32 %v2521_v40, %v2517_v31 }
 0x893   : > { %v1361_v44 = vpack.c.bf16 %v1359_v42, %v1359_v42 }
 0x894   : > { %2420 = vmatpush3.bf16.xpose.msra.mxu0 %v1523_v43 }
 0x895   : > { %2404 = vmatmul.mubr.msk.bf16.vlgmr.msra.gmra.mrb[28].mxu1 %vm694_vm3, %v1361_v44  ;;  %2431 = vmatprep.subr.bf16.mxu0 %v2546_v3 }
 0x896   : > { %2415 = vmatprep.mubr.msk.bf16.mxu1 %vm2547_vm1, %v2546_v3  ;;  %2414 = vmatpush3.bf16.msra.mxu1 %v1470_v47 }
 0x897   : > { %2425 = vmatprep.subr.bf16.mxu1 %v2546_v3 }
 0x89b   : > { %2422 = vmatmul.mubr.msk.bf16.vlgmr.msra.gmra.mrb[28].mxu0 %vm694_vm3, %v1516_v45 }
 0x89c   : > { %2433 = vmatprep.mubr.msk.bf16.mxu0 %vm2547_vm1, %v2546_v3 }
 0x961   : > { %v1453_v48 = vpop.f32.mrb[24].mxu0 }
 0x962   : > { %v2411_v49 = vpop.f32.mrb[25].mxu0 }
 0x963   : > { %v1456_v50 = vpop.f32.mrb[26].mxu0  ;;  %v2240_v49 = vld [vmem:[%s2994_s22] ss:$0 sm:$0xff] }
 0x964   : > { %v2412_v51 = vpop.f32.mrb[27].mxu0 }
 0x968   : > { %v1405_v53 = vpop.f32.mrb[28].mxu1 }
 0x969   : > { %v2266_v54 = vpack.c.bf16 %v1453_v48, %v1405_v53  ;;  %v2405_v55 = vpop.f32.mrb[29].mxu1 }
 0x96a   : > { %v1408_v56 = vpop.f32.mrb[30].mxu1 }
 0x96b   : > { %v2406_v58 = vpop.f32.mrb[31].mxu1  ;;  %2416 = vmatmul.mubr.msk.bf16.vlgmr.msra.gmra.mrb[32].mxu1 %vm694_vm3, %v2266_v54 }
 0x96c   : > { %2426 = vmatpush3.bf16.xpose.msra.mxu1 %v1573_v57  ;;  %2427 = vmatprep.mubr.msk.bf16.mxu1 %vm2547_vm1, %v2546_v3 }
 0x96d   : > { %2437 = vmatprep.subr.bf16.mxu1 %v2546_v3 }
 0x96e   : > { %v1559_v59 = vpop.f32.mrb[28].mxu0 }
 0x96f   : > { %v2423_v60 = vpop.f32.mrb[29].mxu0  ;;  %v1615_v61 = vsel %vm694_vm3, %v1559_v59, -inf }
 0x970   : > { %1616 = vmax.xlane.f32.xlu0 %v1615_v61  ;;  %v1562_v62 = vpop.f32.mrb[30].mxu0 }
 0x971   : > { %v2424_v63 = vpop.f32.mrb[31].mxu0 }
 0x973   : > { %2428 = vmatmul.mubr.msk.bf16.vlgmr.msra.gmra.mrb[36].mxu1 %vm694_vm3, %v1566_v0 }
 0x974   : > { %2439 = vmatprep.mubr.msk.bf16.mxu1 %vm2547_vm1, %v2546_v3 }
 0x9fd   : > { %v1617_v1 = vpop.xlane.xlu0 %1616 }
 0x9fe   : > { %v1621_v2 = vsub.f32 %v1559_v59, %v1617_v1 }
 0xa00   : > { %v1623_v4 = vmul.f32 1.442695, %v1621_v2 }
 0xa02   : > { %2522 = vpow2.f32 %v1623_v4 }
 0xa0c   : > { %v2523_v7 = vpop.eup %2522 }
 0xa0d   : > { %v1627_v8 = vsel %vm694_vm3, %v2523_v7, 0.0 }
 0xa0e   : > { %1628 = vadd.xlane.f32.xlu0 %v1627_v8  ;;  %v2492_v8 = vld [vmem:[%s2667_s16] sm:$0xff]  }
 0xa3e   : > { %v1506_v9 = vpop.f32.mrb[32].mxu1 }
 0xa3f   : > { %v1513_v10 = vadd.f32 %v1506_v9, %v2839_v15  ;;  %v2417_v11 = vpop.f32.mrb[33].mxu1  ;;  %v2493_v9 = vld [vmem:[%s2667_s16 + $0x8] sm:$0xff]  }
 0xa40   : > { %v1509_v12 = vpop.f32.mrb[34].mxu1  ;;  %v2495_v11 = vld [vmem:[%s2677_s23 + $0x8] sm:$0xff]  }
 0xa41   : > { %v1514_v14 = vadd.f32 %v1509_v12, %v2841_v19  ;;  %v2418_v17 = vpop.f32.mrb[35].mxu1 }
 0xa46   : > { %v1609_v18 = vpop.f32.mrb[36].mxu1 }
 0xa47   : > { %v2429_v20 = vpop.f32.mrb[37].mxu1  ;;  %v1618_v21 = vsel %vm694_vm3, %v1609_v18, -inf }
 0xa48   : > { %1619 = vmax.xlane.f32.xlu1 %v1618_v21  ;;  %v1612_v22 = vpop.f32.mrb[38].mxu1 }
 0xa49   : > { %v2430_v23 = vpop.f32.mrb[39].mxu1 }
 0xa4a   : > { %v2241_v23 = vld [vmem:[%s2995_s24] ss:$0 sm:$0xff] }
 0xa59   : > { %1639 = vrot.lane.b32.xlu1 %v2731_v13, %s2558_s3 }
 0xa9b   : > { %v1629_v24 = vpop.xlane.xlu0 %1628 }
 0xa9c   : > { %2524 = vrcp.f32 %v1629_v24 }
 0xaa6   : > { %v2525_v25 = vpop.eup %2524 }
 0xaa7   : > { %v1635_v27 = vmul.f32 %v2525_v25, %v2523_v7 }
 0xaa9   : > { %v1637_v30 = vpack.c.bf16 %v1635_v27, %v1635_v27  ;;  %v2242_v27 = vld [vmem:[%s2996_s26] ss:$0 sm:$0xff] }
 0xad5   : > { %v1620_v26 = vpop.xlane.xlu1 %1619 }
 0xad6   : > { %v1622_v15 = vsub.f32 %v1609_v18, %v1620_v26 }
 0xad8   : > { %v1625_v28 = vmul.f32 1.442695, %v1622_v15 }
 0xad9   : > { %v1640_v19 = vpop.permute.xlu1 %1639 }
 0xada   : > { %2526 = vpow2.f32 %v1625_v28  ;;  %v1645_v29 = vsel %vm819_vm4, %v1640_v19, 0 }
 0xadb   : > { %2432 = vmatpush3.bf16.msra.mxu0 %v1645_v29 }
 0xadc   : > { %2443 = vmatprep.subr.bf16.mxu0 %v2546_v3 }
 0xade   : > { %2434 = vmatmul.mubr.msk.bf16.vlgmr.msra.gmra.mrb[32].mxu0 %vm694_vm3, %v1637_v30 }
 0xadf   : > { %2445 = vmatprep.mubr.msk.bf16.mxu0 %vm2547_vm1, %v2546_v3  ;;  %2444 = vmatpush3.bf16.msra.mxu0 %v1746_v33 }
 0xae0   : > { %2457 = vmatprep.subr.bf16.mxu0 %v2546_v3 }
 0xae4   : > { %v2527_v13 = vpop.eup %2526 }
 0xae5   : > { %v1630_v31 = vsel %vm694_vm3, %v2527_v13, 0.0 }
 0xae6   : > { %1631 = vadd.xlane.f32.xlu0 %v1630_v31  ;;  %v2497_v31 = vld [vmem:[%s2677_s23 + $0x18] sm:$0xff]  }
 0xafc   : > { %1687 = vrot.lane.b32.xlu0 %v2734_v16, %s2558_s3 }
 0xb73   : > { %v1632_v34 = vpop.xlane.xlu0 %1631 }
 0xb74   : > { %2528 = vrcp.f32 %v1632_v34 }
 0xb77   : > { %v1688_v35 = vpop.permute.xlu0 %1687 }
 0xb78   : > { %v1693_v36 = vsel %vm819_vm4, %v1688_v35, 0 }
 0xb79   : > { %2438 = vmatpush3.bf16.msra.mxu1 %v1693_v36 }
 0xb7a   : > { %2449 = vmatprep.subr.bf16.mxu1 %v2546_v3 }
 0xb7e   : > { %v2529_v37 = vpop.eup %2528 }
 0xb7f   : > { %v1636_v38 = vmul.f32 %v2529_v37, %v2527_v13  ;;  %v2496_v13 = vld [vmem:[%s2677_s23 + $0x10] sm:$0xff]  }
 0xb81   : > { %v1638_v39 = vpack.c.bf16 %v1636_v38, %v1636_v38 }
 0xb83   : > { %2440 = vmatmul.mubr.msk.bf16.vlgmr.msra.gmra.mrb[40].mxu1 %vm694_vm3, %v1638_v39 }
 0xb84   : > { %2453 = vmatprep.mubr.msk.bf16.mxu1 %vm2547_vm1, %v2546_v3  ;;  %2450 = vmatpush3.bf16.msra.mxu1 %v2492_v8  ;;  %v2256_v8 = vld [vmem:[%s597_s13] ss:$0 sm:$0xff] }
 0xb85   : > { %2451 = vmatprep.subr.bf16.mxu1 %v2546_v3 }
 0xb88   : > { %2452 = vmatpush3.bf16.msra.mxu1 %v2493_v9 }
 0xbb1   : > { %v1681_v16 = vpop.f32.mrb[32].mxu0 }
 0xbb2   : > { %v2435_v40 = vpop.f32.mrb[33].mxu0 }
 0xbb3   : > { %v1684_v41 = vpop.f32.mrb[34].mxu0 }
 0xbb4   : > { %v2436_v42 = vpop.f32.mrb[35].mxu0 }
 0xc56   : > { %v1729_v43 = vpop.f32.mrb[40].mxu1 }
 0xc57   : > { %v2267_v44 = vpack.c.bf16 %v1729_v43, %v1681_v16  ;;  %v2441_v45 = vpop.f32.mrb[41].mxu1 }
 0xc58   : > { %v1732_v46 = vpop.f32.mrb[42].mxu1 }
 0xc59   : > { %v2442_v47 = vpop.f32.mrb[43].mxu1  ;;  %2446 = vmatmul.mubr.msk.bf16.vlgmr.msra.gmra.mrb[36].mxu0 %vm694_vm3, %v2267_v44 }
 0xc5a   : > { %2465 = vmatprep.mubr.msk.bf16.mxu0 %vm2547_vm1, %v2546_v3 }
 0xd2c   : > { %v1782_v48 = vpop.f32.mrb[36].mxu0 }
 0xd2d   : > { %v1789_v50 = vadd.f32 %v1782_v48, %v1513_v10  ;;  %v2447_v51 = vpop.f32.mrb[37].mxu0  ;;  %v2494_v10 = vld [vmem:[%s2677_s23] sm:$0xff]  }
 0xd2e   : > { %v1785_v52 = vpop.f32.mrb[38].mxu0  ;;  %2458 = vmatpush3.bf16.msra.mxu0 %v2494_v10 }
 0xd2f   : > { %v1798_v53 = vadd.f32 %v2240_v49, %v1789_v50  ;;  %v1790_v54 = vadd.f32 %v1785_v52, %v1514_v14  ;;  %v2448_v55 = vpop.f32.mrb[39].mxu0  ;;  %2459 = vmatprep.subr.bf16.mxu0 %v2546_v3 }
 0xd31   : > { %v1799_v56 = vadd.f32 %v2240_v49, %v1790_v54  ;;  %v1800_v57 = vadd.f32 %v1798_v53, %v2710_v5 }
 0xd32   : > { %2460 = vmatpush3.bf16.msra.mxu0 %v2495_v11 }
 0xd33   : > { %v1804_v58 = vsel %vm640_vm2, %v1800_v57, 0.0  ;;  %v1801_v59 = vadd.f32 %v1799_v56, %v2715_v6  ;;  %2461 = vmatprep.subr.bf16.mxu0 %v2546_v3 }
 0xd34   : > { %1805 = vadd.xlane.f32.xlu1 %v1804_v58 }
 0xd35   : > { %v1807_v60 = vsel %vm640_vm2, %v1801_v59, 0.0 }
 0xd36   : > { %1808 = vadd.xlane.f32.xlu0 %v1807_v60  ;;  %2462 = vmatpush3.bf16.msra.mxu0 %v2496_v13 }
 0xd37   : > { %2463 = vmatprep.subr.bf16.mxu0 %v2546_v3  ;;  %v2248_v3 = vld [vmem:[%s591_s0] ss:$0 sm:$0xff] }
 0xd3a   : > { %2464 = vmatpush3.bf16.msra.mxu0 %v2497_v31 }
 0xdc1   : > { %v1806_v61 = vpop.xlane.xlu1 %1805 }
 0xdc2   : > { %v1811_v62 = vmul.f32 0.03125, %v1806_v61 }
 0xdc3   : > { %v1809_v63 = vpop.xlane.xlu0 %1808 }
 0xdc4   : > { %v1813_v0 = vsub.f32 %v1800_v57, %v1811_v62  ;;  %v1812_v1 = vmul.f32 0.03125, %v1809_v63 }
 0xdc6   : > { %v1814_v2 = vsub.f32 %v1801_v59, %v1812_v1  ;;  %v1815_v4 = vmul.f32 %v1813_v0, %v1813_v0 }
 0xdc8   : > { %v1817_v5 = vsel %vm640_vm2, %v1815_v4, 0.0  ;;  %v1816_v7 = vmul.f32 %v1814_v2, %v1814_v2 }
 0xdc9   : > { %1818 = vadd.xlane.f32.xlu1 %v1817_v5  ;;  %v2255_v5 = vld [vmem:[%s594_s14] ss:$0 sm:$0xff] }
 0xdca   : > { %v1820_v6 = vsel %vm640_vm2, %v1816_v7, 0.0 }
 0xdcb   : > { %1821 = vadd.xlane.f32.xlu0 %v1820_v6 }
 0xe56   : > { %v1819_v12 = vpop.xlane.xlu1 %1818 }
 0xe57   : > { %v1823_v14 = vmul.f32 0.03125, %v1819_v12 }
 0xe58   : > { %v1822_v17 = vpop.xlane.xlu0 %1821 }
 0xe59   : > { %v1825_v18 = vadd.f32 1e-05, %v1823_v14  ;;  %v1824_v20 = vmul.f32 0.03125, %v1822_v17 }
 0xe5b   : > { %2530 = vrsqrt.f32 %v1825_v18  ;;  %v1826_v21 = vadd.f32 1e-05, %v1824_v20 }
 0xe5d   : > { %2532 = vrsqrt.f32 %v1826_v21 }
 0xe65   : > { %v2531_v22 = vpop.eup %2530 }
 0xe66   : > { %v1829_v24 = vmul.f32 %v2531_v22, %v1813_v0 }
 0xe67   : > { %v2533_v25 = vpop.eup %2532 }
 0xe68   : > { %v1837_v26 = vmul.f32 %v2241_v23, %v1829_v24  ;;  %v1830_v15 = vmul.f32 %v2533_v25, %v1814_v2 }
 0xe6a   : > { %v1838_v28 = vmul.f32 %v2241_v23, %v1830_v15  ;;  %v1845_v19 = vadd.f32 %v2242_v27, %v1837_v26 }
 0xe6c   : > { %v1846_v29 = vadd.f32 %v2242_v27, %v1838_v28 }
 0xe6e   : > { %v2268_v30 = vpack.c.bf16 %v1846_v29, %v1845_v19 }
 0xe70   : > { %2454 = vmatmul.mubr.msk.bf16.vlgmr.msra.gmra.mrb[44].mxu1 %vm640_vm2, %v2268_v30 }
 0xf43   : > { %v1925_v33 = vpop.f32.mrb[44].mxu1 }
 0xf44   : > { %v1926_v34 = vadd.f32 %v2243_v32, %v1925_v33  ;;  %v2455_v35 = vpop.f32.mrb[45].mxu1 }
 0xf45   : > { %v1928_v36 = vpop.f32.mrb[46].mxu1 }
 0xf46   : > { %v1929_v37 = vadd.f32 %v2243_v32, %v1928_v36  ;;  %v2456_v38 = vpop.f32.mrb[47].mxu1  ;;  %v1932_v39 = vmax.f32 %v1926_v34, 0.0 }
 0xf48   : > { %v1933_v16 = vmax.f32 %v1929_v37, 0.0 }
 0xf4a   : > { %v2269_v40 = vpack.c.bf16 %v1933_v16, %v1932_v39 }
 0xf4c   : > { %2466 = vmatmul.mubr.msk.bf16.vlgmr.msra.gmra.mrb[40].mxu0 %vm1971_vm5, %v2269_v40 }
0x101f   : > { %v2009_v41 = vpop.f32.mrb[40].mxu0 }
0x1020   : > { %v2010_v42 = vadd.f32 %v2248_v3, %v2009_v41  ;;  %v2467_v43 = vpop.f32.mrb[41].mxu0 }
0x1021   : > { %v2012_v44 = vpop.f32.mrb[42].mxu0 }
0x1022   : > { %v2013_v45 = vadd.f32 %v2248_v3, %v2012_v44  ;;  %v2468_v46 = vpop.f32.mrb[43].mxu0  ;;  %v2016_v47 = vadd.f32 %v2010_v42, %v1845_v19 }
0x1024   : > { %v2018_v48 = vsel %vm640_vm2, %v2016_v47, 0.0  ;;  %v2017_v49 = vadd.f32 %v2013_v45, %v1846_v29 }
0x1025   : > { %2019 = vadd.xlane.f32.xlu1 %v2018_v48 }
0x1026   : > { %v2021_v50 = vsel %vm640_vm2, %v2017_v49, 0.0 }
0x1027   : > { %2022 = vadd.xlane.f32.xlu0 %v2021_v50 }
0x10b2   : > { %v2020_v51 = vpop.xlane.xlu1 %2019 }
0x10b3   : > { %v2024_v52 = vmul.f32 0.03125, %v2020_v51 }
0x10b4   : > { %v2023_v53 = vpop.xlane.xlu0 %2022 }
0x10b5   : > { %v2026_v54 = vsub.f32 %v2016_v47, %v2024_v52  ;;  %v2025_v55 = vmul.f32 0.03125, %v2023_v53 }
0x10b7   : > { %v2027_v56 = vsub.f32 %v2017_v49, %v2025_v55  ;;  %v2028_v57 = vmul.f32 %v2026_v54, %v2026_v54 }
0x10b9   : > { %v2030_v58 = vsel %vm640_vm2, %v2028_v57, 0.0  ;;  %v2029_v59 = vmul.f32 %v2027_v56, %v2027_v56 }
0x10ba   : > { %2031 = vadd.xlane.f32.xlu1 %v2030_v58 }
0x10bb   : > { %v2033_v60 = vsel %vm640_vm2, %v2029_v59, 0.0 }
0x10bc   : > { %2034 = vadd.xlane.f32.xlu0 %v2033_v60 }
0x1147   : > { %v2032_v61 = vpop.xlane.xlu1 %2031 }
0x1148   : > { %v2036_v62 = vmul.f32 0.03125, %v2032_v61 }
0x1149   : > { %v2035_v63 = vpop.xlane.xlu0 %2034 }
0x114a   : > { %v2038_v0 = vadd.f32 1e-05, %v2036_v62  ;;  %v2037_v1 = vmul.f32 0.03125, %v2035_v63 }
0x114c   : > { %2534 = vrsqrt.f32 %v2038_v0  ;;  %v2039_v2 = vadd.f32 1e-05, %v2037_v1 }
0x114e   : > { %2536 = vrsqrt.f32 %v2039_v2 }
0x1156   : > { %v2535_v4 = vpop.eup %2534 }
0x1157   : > { %v2042_v7 = vmul.f32 %v2535_v4, %v2026_v54 }
0x1158   : > { %v2537_v6 = vpop.eup %2536 }
0x1159   : > { %v2050_v9 = vmul.f32 %v2255_v5, %v2042_v7  ;;  %v2043_v10 = vmul.f32 %v2537_v6, %v2027_v56 }
0x115b   : > { %v2058_v11 = vadd.f32 %v2256_v8, %v2050_v9  ;;  %v2051_v12 = vmul.f32 %v2255_v5, %v2043_v10 }
0x115d   : > { %2060 = vst.msk [vmem:[%s2992_s15] sm:$0xff] %vm640_vm2, %v2058_v11  ;;  %v2059_v14 = vadd.f32 %v2256_v8, %v2051_v12 }
0x115f   : > { %2061 = vst.msk [vmem:[%s2992_s15 + $0x8] sm:$0xff] %vm640_vm2, %v2059_v14 }
0x1160 PF: > { %s2998_s24 = sld [smem:[#allocation2_spill]] }
0x1166   : > { %s23_s25 = sadd.s32 1, %s2998_s24  }
0x1167   : > { %p20_p5 = scmp.ge.s32.totalorder %s23_s25, 4  }
0x1169   :  { %22 = sbr.rel (!%p20_p5) target bundleno = 5 (0x5), region = 135 }

// kernel: transformer_forward.3
= control target key start
LH: loop header
LB: loop body
LE: loop exit
PB: predicated region body
PF: predicated region fallthrough
CT: control target
= control target key end

     0   :  { %s5452_s0 = inlined_call_operand.vmem [shape: f32[2,8,32], index: 0, kind: input, shape index: {}]   ;;  %s5453_s1 = inlined_call_operand.vmem [shape: f32[2,8,32], index: 1, kind: input, shape index: {}]   ;;  %s5454_s2 = inlined_call_operand.vmem [shape: bf16[2,32,96], index: 2, kind: input, shape index: {}]   ;;  %s5455_s3 = inlined_call_operand.vmem [shape: f32[2,1,96], index: 3, kind: input, shape index: {}]   ;;  %s5456_s4 = inlined_call_operand.vmem [shape: bf16[2,4,8,32], index: 4, kind: input, shape index: {}]   ;;  %s5457_s5 = inlined_call_operand.vmem [shape: f32[2,1,32], index: 5, kind: input, shape index: {}]   ;;  %s5458_s6 = inlined_call_operand.vmem [shape: f32[2,1,32], index: 6, kind: input, shape index: {}]   ;;  %s5459_s7 = inlined_call_operand.vmem [shape: f32[2,1,32], index: 7, kind: input, shape index: {}]   ;;  %s5460_s8 = inlined_call_operand.vmem [shape: bf16[2,32,32], index: 8, kind: input, shape index: {}]   ;;  %s5461_s9 = inlined_call_operand.vmem [shape: f32[2,1,32], index: 9, kind: input, shape index: {}]   ;;  %s5462_s10 = inlined_call_operand.vmem [shape: bf16[2,32,64], index: 10, kind: input, shape index: {}]   ;;  %s5463_s11 = inlined_call_operand.vmem [shape: f32[2,1,64], index: 11, kind: input, shape index: {}]   ;;  %s5464_s12 = inlined_call_operand.vmem [shape: bf16[2,4,8,32], index: 12, kind: input, shape index: {}]   ;;  %s5465_s13 = inlined_call_operand.vmem [shape: f32[2,1,32], index: 13, kind: input, shape index: {}]   ;;  %s5466_s14 = inlined_call_operand.vmem [shape: f32[2,1,32], index: 14, kind: input, shape index: {}]   ;;  %s5467_s15 = inlined_call_operand.vmem [shape: f32[2,1,32], index: 15, kind: input, shape index: {}]   ;;  %s5468_s16 = inlined_call_operand.vmem [shape: bf16[2,32,64], index: 16, kind: input, shape index: {}]   ;;  %s5469_s17 = inlined_call_operand.vmem [shape: f32[2,1,64], index: 17, kind: input, shape index: {}]   ;;  %s5470_s18 = inlined_call_operand.vmem [shape: bf16[2,64,32], index: 18, kind: input, shape index: {}]   ;;  %s5471_s19 = inlined_call_operand.vmem [shape: f32[2,1,32], index: 19, kind: input, shape index: {}]   ;;  %s5472_s20 = inlined_call_operand.vmem [shape: f32[2,1,32], index: 20, kind: input, shape index: {}]   ;;  %s5473_s21 = inlined_call_operand.vmem [shape: f32[2,1,32], index: 21, kind: input, shape index: {}]   ;;  %s5474_s22 = inlined_call_operand.hbm [shape: f32[2,8,32], index: 22, kind: output, shape index: {}]  }
   0x1   :  { %5482 = sst [smem:[#allocation8_spill]] %s5452_s0 }
   0x2   :  { %5483 = sst [smem:[#allocation9_spill]] %s5453_s1 }
   0x3   :  { %5484 = sst [smem:[#allocation10_spill]] %s5454_s2 }
   0x4   :  { %5485 = sst [smem:[#allocation11_spill]] %s5455_s3 }
   0x5   :  { %5486 = sst [smem:[#allocation12_spill]] %s5456_s4 }
   0x6   :  { %5487 = sst [smem:[#allocation13_spill]] %s5457_s5 }
   0x7   :  { %5488 = sst [smem:[#allocation14_spill]] %s5458_s6 }
   0x8   :  { %5489 = sst [smem:[#allocation15_spill]] %s5460_s8 }
   0x9   :  { %5490 = sst [smem:[#allocation16_spill]] %s5462_s10 }
   0xa   :  { %5491 = sst [smem:[#allocation17_spill]] %s5464_s12 }
   0xb   :  { %5492 = sst [smem:[#allocation18_spill]] %s5466_s14 }
   0xc   :  { %5493 = sst [smem:[#allocation19_spill]] %s5467_s15 }
   0xd   :  { %5494 = sst [smem:[#allocation20_spill]] %s5468_s16 }
   0xe   :  { %5495 = sst [smem:[#allocation21_spill]] %s5471_s19 }
   0xf   :  { %5496 = sst [smem:[#allocation22_spill]] %s5472_s20 }
  0x10   :  { %5497 = sst [smem:[#allocation23_spill]] %s5473_s21 }
  0x11   :  { %5498 = sst [smem:[#allocation24_spill]] %s5474_s22 }
  0x12   :  { %27 = vsyncpa [#allocation3], 0  ;;  %s4791_s3 = smov 0  }
  0x13 LB: > { %5499 = sst [smem:[#allocation5_spill]] %s4658_s3  ;;  %s4797_s28 = sadd.s32 4294967295, %s4658_s3   ;;  %s4658_s3 = sphi %s4791_s3, %s33_s3  }
  0x14   : > { %5500 = sst [smem:[#allocation6_spill]] %s4797_s28  ;;  %p4000_p0 = scmp.ge.s32.totalorder %s4658_s3, 1 }
  0x15   : > { %p772_p1 = scmp.lt.s32.totalorder %s4658_s3, 3 }
  0x17   : > { %p773_p2 = pnand %p4000_p0, %p772_p1 }
  0x19   : > { %776 = sbr.rel (%p773_p2) target bundleno = 8034 (0x1f62), region = 108 }
  0x20   : > { %p898_p3 = scmp.lt.s32.totalorder %s4797_s28, 1  ;;  %s5502_s6 = sld [smem:[#allocation10_spill]] }
  0x21   : > { %s5504_s27 = sld [smem:[#allocation12_spill]]  ;;  %s5507_s8 = sld [smem:[#allocation15_spill]] }
  0x22   : > { %s4803_s29 = scalar_select %p898_p3, %s4797_s28, 1 }
  0x23   : > { %s5508_s10 = sld [smem:[#allocation16_spill]]  ;;  %s5509_s12 = sld [smem:[#allocation17_spill]] }
  0x24   : > { %s4103_s30 = sshll.u32 %s4803_s29, 4  ;;  %s5512_s16 = sld [smem:[#allocation20_spill]] }
  0x25   : > { %s5513_s22 = sld [smem:[#allocation21_spill]]  ;;  %s5514_s15 = sld [smem:[#allocation22_spill]] }
  0x26   : > { %s4813_s25 = scalar_lea.vmem %s5502_s6, %s4103_s30  ;;  %s5516_s24 = sld [smem:[#allocation6_spill]] }
  0x27   : > { %5503 = sst [smem:[#allocation7_spill]] %s4813_s25  ;;  %s4818_s3 = scalar_lea.vmem %s5504_s27, %s4103_s30 }
  0x28   : > { %s4835_s26 = scalar_lea.vmem %s5507_s8, %s4103_s30 }
  0x29   : > { %s4844_s19 = scalar_lea.vmem %s5508_s10, %s4103_s30  ;;  %s4853_s23 = scalar_lea.vmem %s5509_s12, %s4103_s30 }
  0x2a   : > { %s4870_s0 = scalar_lea.vmem %s5512_s16, %s4103_s30  ;;  %s4109_s12 = sshll.u32 %s4803_s29, 5 }
  0x2b   : > { %s4880_s20 = scalar_lea.vmem %s5470_s18, %s4109_s12  ;;  %s965_s21 = scalar_lea.vmem %s5513_s22, %s4803_s29 }
  0x2c   : > { %s968_s10 = scalar_lea.vmem %s5514_s15, %s4803_s29  ;;  %s5515_s16 = sld [smem:[#allocation23_spill]] }
  0x2d   : > { %p4015_p4 = scmp.ne.s32.totalorder %s5516_s24, 0 }
  0x2e   : > { %s5517_s25 = sld [smem:[#allocation8_spill]] (!%p4015_p4)  ;;  %vm979_vm0 = vcmask (!%p4015_p4), 261120  }
  0x2f   : > { %976 = sbr.rel (%p4015_p4) target bundleno = 54 (0x36), region = 112 }
  0x32   : > { %s971_s14 = scalar_lea.vmem %s5515_s16, %s4803_s29 }
  0x34   : > { %v977_v0 = vld [vmem:[%s5517_s25] sm:$0xff] (!%p4015_p4)  ;;  %v978_v1 = vld [vmem:[%s5517_s25 + $0x8] sm:$0xff] (!%p4015_p4) }
  0x35   : > { %980 = vst.msk [vmem:[#allocation2] sm:$0xff] (!%p4015_p4), %vm979_vm0, %v977_v0  ;;  %981 = vst.msk [vmem:[#allocation2 + $0x8] sm:$0xff] (!%p4015_p4), %vm979_vm0, %v978_v1 }
  0x36 PF: > { %s5518_s8 = sld [smem:[#allocation7_spill]]  ;;  %v4660_v3 = vmov 0.0   ;;  %vm4661_vm1 = vmmov 0   ;;  %vm1014_vm2 = vcmask 261120   ;;  %s4662_s2 = smov 96   ;;  %vm1073_vm3 = vcmask 64512  }
  0x37   : > { %4220 = vmatprep.subr.bf16.mxu1 %v4660_v3  ;;  %4234 = vmatprep.subr.bf16.mxu0 %v4660_v3  ;;  %s5519_s22 = sld [smem:[#allocation11_spill]]  ;;  %v1065_v21 = vlaneseq  ;;  %s4663_s27 = smov 64   ;;  %vm1202_vm5 = vcmask 1043456   ;;  %vm3669_vm6 = vcmask 523264  }
  0x38   : > { %4224 = vmatprep.mubr.msk.bf16.mxu1 %vm4661_vm1, %v4660_v3  ;;  %4236 = vmatprep.mubr.msk.bf16.mxu0 %vm4661_vm1, %v4660_v3  ;;  %s4664_s28 = smov 88   ;;  %s4665_s30 = smov 120  }
  0x39   : > { %v1066_v22 = vshrl.u32 %v1065_v21, 7  ;;  %v1068_v23 = vand.u32 127, %v1065_v21  ;;  %s4666_s4 = smov 56   ;;  %s4667_s24 = smov 112  }
  0x3a   : > { %s4668_s5 = smov 80   ;;  %s4669_s12 = smov 48  }
  0x3b   : > { %vm4945_vm4 = vcmp.le.s32.totalorder %v1068_v23, %v1066_v22  ;;  %s4670_s6 = smov 72   ;;  %s4672_s15 = smov 40  }
  0x3c   : > { %v4534_v2 = vld [vmem:[%s5518_s8] sm:$0xff]   ;;  %v4535_v4 = vld [vmem:[%s5518_s8 + $0x8] sm:$0xff]   ;;  %s4671_s8 = smov 104  }
  0x3d   : > { %4221 = vmatpush3.bf16.msra.mxu1 %v4534_v2  ;;  %v4907_v5 = vld [vmem:[#allocation2] sm:$0xff]  ;;  %v4909_v6 = vld [vmem:[#allocation2 + $0x8] sm:$0xff]  ;;  %s5520_s1 = scalar_lea.vmem %s5519_s22, %s4803_s29  ;;  %s5523_s22 = sld [smem:[#allocation13_spill]] }
  0x3e   : > { %4222 = vmatprep.subr.bf16.mxu1 %v4660_v3  ;;  %v4110_v7 = vpack.c.bf16 %v4909_v6, %v4907_v5  ;;  %v4016_v8 = vld [vmem:[%s5520_s1] ss:$0 sm:$0xff] }
  0x41   : > { %4223 = vmatpush3.bf16.msra.mxu1 %v4535_v4 }
  0x42   : > { %4228 = vmatprep.subr.bf16.mxu1 %v4660_v3 }
  0x43   : > { %s5524_s1 = scalar_lea.vmem %s5523_s22, %s4803_s29  ;;  %s5526_s22 = sld [smem:[#allocation14_spill]] }
  0x44   : > { %4225 = vmatmul.mubr.msk.bf16.vlgmr.msra.gmra.mrb[0].mxu1 %vm1014_vm2, %v4110_v7 }
  0x45   : > { %4230 = vmatprep.mubr.msk.bf16.mxu1 %vm4661_vm1, %v4660_v3 }
 0x117   : > { %v1052_v9 = vpop.f32.mrb[0].mxu1 }
 0x118   : > { %v1053_v10 = vadd.f32 %v4016_v8, %v1052_v9  ;;  %v4226_v11 = vpop.f32.mrb[1].mxu1 }
 0x119   : > { %v1055_v12 = vpop.f32.mrb[2].mxu1 }
 0x11a   : > { %v4925_v13 = vpack.c.bf16 %v1053_v10, %v1053_v10  ;;  %v1056_v14 = vadd.f32 %v4016_v8, %v1055_v12  ;;  %v4227_v15 = vpop.f32.mrb[3].mxu1 }
 0x11c   : > { %1071 = vrot.lane.b32.xlu0 %v4925_v13, %s4662_s2  ;;  %v4929_v16 = vpack.c.bf16 %v1056_v14, %v1056_v14 }
 0x120   : > { %1121 = vrot.lane.b32.xlu0 %v4929_v16, %s4662_s2 }
 0x18e   : > { %v1072_v17 = vpop.permute.xlu0 %1071 }
 0x18f   : > { %v1078_v18 = vsel %vm1073_vm3, %v1072_v17, 0 }
 0x190   : > { %4229 = vmatpush3.bf16.xpose.msra.mxu1 %v1078_v18 }
 0x191   : > { %4240 = vmatprep.subr.bf16.mxu1 %v4660_v3 }
 0x192   : > { %v1122_v19 = vpop.permute.xlu0 %1121 }
 0x193   : > { %v1127_v20 = vsel %vm1073_vm3, %v1122_v19, 0 }
 0x194   : > { %4235 = vmatpush3.bf16.xpose.msra.mxu0 %v1127_v20 }
 0x195   : > { %4246 = vmatprep.subr.bf16.mxu0 %v4660_v3 }
 0x197   : > { %4231 = vmatmul.mubr.msk.bf16.vlgmr.msra.gmra.mrb[4].mxu1 %vm1073_vm3, %v4925_v13 }
 0x198   : > { %4242 = vmatprep.mubr.msk.bf16.mxu1 %vm4661_vm1, %v4660_v3 }
 0x19b   : > { %4237 = vmatmul.mubr.msk.bf16.vlgmr.msra.gmra.mrb[0].mxu0 %vm1073_vm3, %v4929_v16 }
 0x19c   : > { %4248 = vmatprep.mubr.msk.bf16.mxu0 %vm4661_vm1, %v4660_v3 }
 0x26a   : > { %v1114_v25 = vpop.f32.mrb[4].mxu1 }
 0x26b   : > { %v1171_v26 = vsel %vm4945_vm4, %v1114_v25, -inf  ;;  %v4232_v27 = vpop.f32.mrb[5].mxu1 }
 0x26c   : > { %v1117_v28 = vpop.f32.mrb[6].mxu1  ;;  %v1173_v29 = vsel %vm1073_vm3, %v1171_v26, -inf }
 0x26d   : > { %1174 = vmax.xlane.f32.xlu1 %v1173_v29  ;;  %v4233_v30 = vpop.f32.mrb[7].mxu1 }
 0x26e   : > { %v1163_v31 = vpop.f32.mrb[0].mxu0 }
 0x26f   : > { %v1172_v32 = vsel %vm4945_vm4, %v1163_v31, -inf  ;;  %v4238_v33 = vpop.f32.mrb[1].mxu0 }
 0x270   : > { %v1166_v34 = vpop.f32.mrb[2].mxu0  ;;  %v1176_v35 = vsel %vm1073_vm3, %v1172_v32, -inf }
 0x271   : > { %v4239_v36 = vpop.f32.mrb[3].mxu0  ;;  %1177 = vmax.xlane.f32.xlu1 %v1176_v35 }
 0x282   : > { %1197 = vrot.lane.b32.xlu1 %v4925_v13, %s4663_s27 }
 0x286   : > { %1246 = vrot.lane.b32.xlu1 %v4929_v16, %s4663_s27 }
 0x28a   : > { %1298 = vrot.lane.b32.xlu1 %v4925_v13, %s4664_s28 }
 0x2fa   : > { %v1175_v37 = vpop.xlane.xlu1 %1174 }
 0x2fb   : > { %v1179_v38 = vsub.f32 %v1171_v26, %v1175_v37 }
 0x2fd   : > { %v1181_v39 = vmul.f32 1.442695, %v1179_v38 }
 0x2fe   : > { %v1178_v40 = vpop.xlane.xlu1 %1177 }
 0x2ff   : > { %4546 = vpow2.f32 %v1181_v39  ;;  %v1180_v41 = vsub.f32 %v1172_v32, %v1178_v40 }
 0x301   : > { %v1183_v42 = vmul.f32 1.442695, %v1180_v41 }
 0x302   : > { %v1198_v43 = vpop.permute.xlu1 %1197 }
 0x303   : > { %4548 = vpow2.f32 %v1183_v42  ;;  %v1204_v44 = vsel %vm1202_vm5, %v1198_v43, 0 }
 0x304   : > { %4241 = vmatpush3.bf16.msra.mxu1 %v1204_v44 }
 0x305   : > { %4252 = vmatprep.subr.bf16.mxu1 %v4660_v3 }
 0x306   : > { %v1247_v45 = vpop.permute.xlu1 %1246 }
 0x307   : > { %v1252_v46 = vsel %vm1202_vm5, %v1247_v45, 0  ;;  %v1062_v45 = vld [vmem:[%s4818_s3 + $0x4] sm:$0xf] }
 0x308   : > { %4247 = vmatpush3.bf16.msra.mxu0 %v1252_v46 }
 0x309   : > { %v4547_v47 = vpop.eup %4546  ;;  %4258 = vmatprep.subr.bf16.mxu0 %v4660_v3 }
 0x30a   : > { %v1185_v48 = vsel %vm1073_vm3, %v4547_v47, 0.0  ;;  %v1299_v51 = vpop.permute.xlu1 %1298 }
 0x30b   : > { %1186 = vadd.xlane.f32.xlu0 %v1185_v48  ;;  %v1304_v58 = vsel %vm1073_vm3, %v1299_v51, 0  ;;  %v1529_v48 = vsel %vm1202_vm5, %v1062_v45, 0 }
 0x30d   : > { %v4549_v49 = vpop.eup %4548 }
 0x30e   : > { %v1188_v50 = vsel %vm1073_vm3, %v4549_v49, 0.0 }
 0x30f   : > { %1189 = vadd.xlane.f32.xlu1 %v1188_v50  ;;  %v1061_v50 = vld [vmem:[%s4818_s3] sm:$0xf] }
 0x320   : > { %1348 = vrot.lane.b32.xlu1 %v4929_v16, %s4664_s28 }
 0x321   : > { %1296 = vrot.lane.b32.xlu0 %v4925_v13, %s4665_s30 }
 0x324   : > { %1346 = vrot.lane.b32.xlu1 %v4929_v16, %s4665_s30 }
 0x398   : > { %v1187_v52 = vpop.xlane.xlu0 %1186 }
 0x399   : > { %4550 = vrcp.f32 %v1187_v52 }
 0x39c   : > { %v1190_v53 = vpop.xlane.xlu1 %1189  ;;  %v1297_v63 = vpop.permute.xlu0 %1296 }
 0x39d   : > { %4552 = vrcp.f32 %v1190_v53  ;;  %v1581_v53 = vsel %vm1202_vm5, %v1061_v50, 0 }
 0x3a0   : > { %v1349_v60 = vpop.permute.xlu1 %1348 }
 0x3a1   : > { %v1354_v62 = vsel %vm1073_vm3, %v1349_v60, 0 }
 0x3a3   : > { %v4551_v54 = vpop.eup %4550 }
 0x3a4   : > { %v1193_v55 = vmul.f32 %v4551_v54, %v4547_v47  ;;  %v1347_v0 = vpop.permute.xlu1 %1346 }
 0x3a6   : > { %v1195_v56 = vpack.c.bf16 %v1193_v55, %v1193_v55 }
 0x3a7   : > { %v4553_v57 = vpop.eup %4552 }
 0x3a8   : > { %v1194_v59 = vmul.f32 %v4553_v57, %v4549_v49  ;;  %4243 = vmatmul.mubr.msk.bf16.vlgmr.msra.gmra.mrb[8].mxu1 %vm1073_vm3, %v1195_v56 }
 0x3a9   : > { %4253 = vmatpush3.bf16.xpose.msra.mxu1 %v1304_v58  ;;  %4254 = vmatprep.mubr.msk.bf16.mxu1 %vm4661_vm1, %v4660_v3 }
 0x3aa   : > { %v1196_v61 = vpack.c.bf16 %v1194_v59, %v1194_v59  ;;  %4264 = vmatprep.subr.bf16.mxu1 %v4660_v3 }
 0x3ac   : > { %4249 = vmatmul.mubr.msk.bf16.vlgmr.msra.gmra.mrb[4].mxu0 %vm1073_vm3, %v1196_v61 }
 0x3ad   : > { %4259 = vmatpush3.bf16.xpose.msra.mxu0 %v1354_v62  ;;  %4260 = vmatprep.mubr.msk.bf16.mxu0 %vm4661_vm1, %v4660_v3 }
 0x3ae   : > { %4270 = vmatprep.subr.bf16.mxu0 %v4660_v3 }
 0x3b0   : > { %4255 = vmatmul.mubr.msk.bf16.vlgmr.msra.gmra.mrb[12].mxu1 %vm1073_vm3, %v1297_v63 }
 0x3b1   : > { %4266 = vmatprep.mubr.msk.bf16.mxu1 %vm4661_vm1, %v4660_v3 }
 0x3b4   : > { %4261 = vmatmul.mubr.msk.bf16.vlgmr.msra.gmra.mrb[8].mxu0 %vm1073_vm3, %v1347_v0 }
 0x3b5   : > { %4272 = vmatprep.mubr.msk.bf16.mxu0 %vm4661_vm1, %v4660_v3 }
 0x47b   : > { %v4987_v1 = vpop.f32.mrb[8].mxu1 }
 0x47c   : > { %v4244_v2 = vpop.f32.mrb[9].mxu1 }
 0x47d   : > { %v1243_v4 = vpop.f32.mrb[10].mxu1 }
 0x47e   : > { %v4245_v7 = vpop.f32.mrb[11].mxu1 }
 0x47f   : > { %v4989_v8 = vpop.f32.mrb[4].mxu0 }
 0x480   : > { %v4112_v9 = vpack.c.bf16 %v4989_v8, %v4987_v1  ;;  %v4250_v10 = vpop.f32.mrb[5].mxu0 }
 0x481   : > { %v1291_v11 = vpop.f32.mrb[6].mxu0 }
 0x482   : > { %v4251_v12 = vpop.f32.mrb[7].mxu0 }
 0x483   : > { %v1340_v14 = vpop.f32.mrb[12].mxu1 }
 0x484   : > { %v1396_v15 = vsel %vm4945_vm4, %v1340_v14, -inf  ;;  %v4256_v17 = vpop.f32.mrb[13].mxu1 }
 0x485   : > { %v1343_v18 = vpop.f32.mrb[14].mxu1  ;;  %v1398_v19 = vsel %vm1073_vm3, %v1396_v15, -inf }
 0x486   : > { %1399 = vmax.xlane.f32.xlu1 %v1398_v19  ;;  %v4257_v20 = vpop.f32.mrb[15].mxu1 }
 0x487   : > { %v1390_v21 = vpop.f32.mrb[8].mxu0 }
 0x488   : > { %v1397_v22 = vsel %vm4945_vm4, %v1390_v21, -inf  ;;  %v4262_v23 = vpop.f32.mrb[9].mxu0 }
 0x489   : > { %v1393_v25 = vpop.f32.mrb[10].mxu0  ;;  %v1401_v26 = vsel %vm1073_vm3, %v1397_v22, -inf }
 0x48a   : > { %1402 = vmax.xlane.f32.xlu0 %v1401_v26  ;;  %v4263_v27 = vpop.f32.mrb[11].mxu0 }
 0x4a0   : > { %1470 = vrot.lane.b32.xlu0 %v4929_v16, %s4666_s4 }
 0x4a4   : > { %1624 = vrot.lane.b32.xlu0 %v4925_v13, %s4667_s24 }
 0x513   : > { %v1400_v28 = vpop.xlane.xlu1 %1399 }
 0x514   : > { %v1404_v29 = vsub.f32 %v1396_v15, %v1400_v28 }
 0x516   : > { %v1406_v30 = vmul.f32 1.442695, %v1404_v29 }
 0x517   : > { %v1403_v31 = vpop.xlane.xlu0 %1402 }
 0x518   : > { %4554 = vpow2.f32 %v1406_v30  ;;  %v1405_v32 = vsub.f32 %v1397_v22, %v1403_v31 }
 0x51a   : > { %v1408_v33 = vmul.f32 1.442695, %v1405_v32 }
 0x51b   : > { %v1471_v34 = vpop.permute.xlu0 %1470 }
 0x51c   : > { %4556 = vpow2.f32 %v1408_v33  ;;  %v1476_v35 = vsel %vm1202_vm5, %v1471_v34, 0 }
 0x51d   : > { %4271 = vmatpush3.bf16.msra.mxu0 %v1476_v35 }
 0x51e   : > { %4282 = vmatprep.subr.bf16.mxu0 %v4660_v3 }
 0x522   : > { %v4555_v36 = vpop.eup %4554 }
 0x523   : > { %v1410_v37 = vsel %vm1073_vm3, %v4555_v36, 0.0 }
 0x524   : > { %1411 = vadd.xlane.f32.xlu1 %v1410_v37 }
 0x526   : > { %v4557_v38 = vpop.eup %4556 }
 0x527   : > { %v1413_v39 = vsel %vm1073_vm3, %v4557_v38, 0.0 }
 0x528   : > { %1414 = vadd.xlane.f32.xlu1 %v1413_v39 }
 0x539   : > { %1422 = vrot.lane.b32.xlu1 %v4925_v13, %s4666_s4  ;;  %s5528_s4 = scalar_lea.vmem %s5459_s7, %s4803_s29 }
 0x53d   : > { %1626 = vrot.lane.b32.xlu1 %v4925_v13, %s4668_s5 }
 0x541   : > { %1676 = vrot.lane.b32.xlu1 %v4929_v16, %s4668_s5 }
 0x545   : > { %1674 = vrot.lane.b32.xlu1 %v4929_v16, %s4667_s24 }
 0x5b1   : > { %v1412_v40 = vpop.xlane.xlu1 %1411 }
 0x5b2   : > { %4558 = vrcp.f32 %v1412_v40 }
 0x5b5   : > { %v1415_v41 = vpop.xlane.xlu1 %1414 }
 0x5b6   : > { %4560 = vrcp.f32 %v1415_v41 }
 0x5b9   : > { %v1423_v42 = vpop.permute.xlu1 %1422 }
 0x5ba   : > { %v1428_v43 = vsel %vm1202_vm5, %v1423_v42, 0 }
 0x5bb   : > { %4265 = vmatpush3.bf16.msra.mxu1 %v1428_v43 }
 0x5bc   : > { %v4559_v44 = vpop.eup %4558  ;;  %4276 = vmatprep.subr.bf16.mxu1 %v4660_v3 }
 0x5bd   : > { %v1418_v46 = vmul.f32 %v4559_v44, %v4555_v36  ;;  %v1627_v54 = vpop.permute.xlu1 %1626 }
 0x5be   : > { %v1632_v2 = vsel %vm1073_vm3, %v1627_v54, 0 }
 0x5bf   : > { %v1420_v47 = vpack.c.bf16 %v1418_v46, %v1418_v46 }
 0x5c0   : > { %v4561_v49 = vpop.eup %4560 }
 0x5c1   : > { %v1419_v51 = vmul.f32 %v4561_v49, %v4557_v38  ;;  %4267 = vmatmul.mubr.msk.bf16.vlgmr.msra.gmra.mrb[16].mxu1 %vm1073_vm3, %v1420_v47  ;;  %v1677_v55 = vpop.permute.xlu1 %1676 }
 0x5c2   : > { %4277 = vmatpush3.bf16.msra.mxu1 %v1529_v48  ;;  %4278 = vmatprep.mubr.msk.bf16.mxu1 %vm4661_vm1, %v4660_v3  ;;  %v1682_v56 = vsel %vm1073_vm3, %v1677_v55, 0 }
 0x5c3   : > { %v1421_v52 = vpack.c.bf16 %v1419_v51, %v1419_v51  ;;  %4288 = vmatprep.subr.bf16.mxu1 %v4660_v3 }
 0x5c5   : > { %4273 = vmatmul.mubr.msk.bf16.vlgmr.msra.gmra.mrb[12].mxu0 %vm1073_vm3, %v1421_v52  ;;  %v1675_v57 = vpop.permute.xlu1 %1674 }
 0x5c6   : > { %4283 = vmatpush3.bf16.msra.mxu0 %v1581_v53  ;;  %4284 = vmatprep.mubr.msk.bf16.mxu0 %vm4661_vm1, %v4660_v3 }
 0x5c7   : > { %4294 = vmatprep.subr.bf16.mxu0 %v4660_v3 }
 0x5cd   : > { %4285 = vmatmul.mubr.msk.bf16.vlgmr.msra.gmra.mrb[16].mxu0 %vm1073_vm3, %v4112_v9  ;;  %v1625_v9 = vpop.permute.xlu0 %1624 }
 0x5ce   : > { %4296 = vmatprep.mubr.msk.bf16.mxu0 %vm4661_vm1, %v4660_v3 }
 0x5cf   : > { %4295 = vmatpush3.bf16.xpose.msra.mxu0 %v1682_v56 }
 0x5d0   : > { %4306 = vmatprep.subr.bf16.mxu0 %v4660_v3 }
 0x5d6   : > { %4297 = vmatmul.mubr.msk.bf16.vlgmr.msra.gmra.mrb[20].mxu0 %vm1073_vm3, %v1675_v57 }
 0x5d7   : > { %4308 = vmatprep.mubr.msk.bf16.mxu0 %vm4661_vm1, %v4660_v3 }
 0x694   : > { %v1464_v58 = vpop.f32.mrb[16].mxu1 }
 0x695   : > { %v4268_v59 = vpop.f32.mrb[17].mxu1 }
 0x696   : > { %v1467_v60 = vpop.f32.mrb[18].mxu1 }
 0x697   : > { %v4269_v61 = vpop.f32.mrb[19].mxu1 }
 0x698   : > { %v1512_v62 = vpop.f32.mrb[12].mxu0 }
 0x699   : > { %v4111_v63 = vpack.c.bf16 %v1512_v62, %v1464_v58  ;;  %v4274_v0 = vpop.f32.mrb[13].mxu0  ;;  %v1063_v58 = vld [vmem:[%s4818_s3 + $0x8] sm:$0xf] }
 0x69a   : > { %v1515_v1 = vpop.f32.mrb[14].mxu0  ;;  %v1857_v59 = vsel %vm1202_vm5, %v1063_v58, 0 }
 0x69b   : > { %v4275_v4 = vpop.f32.mrb[15].mxu0  ;;  %4279 = vmatmul.mubr.msk.bf16.vlgmr.msra.gmra.mrb[20].mxu1 %vm1073_vm3, %v4111_v63 }
 0x69c   : > { %4289 = vmatpush3.bf16.xpose.msra.mxu1 %v1632_v2  ;;  %4290 = vmatprep.mubr.msk.bf16.mxu1 %vm4661_vm1, %v4660_v3 }
 0x69d   : > { %4300 = vmatprep.subr.bf16.mxu1 %v4660_v3 }
 0x6a0   : > { %v1617_v7 = vpop.f32.mrb[16].mxu0 }
 0x6a1   : > { %v4286_v8 = vpop.f32.mrb[17].mxu0 }
 0x6a2   : > { %v1620_v10 = vpop.f32.mrb[18].mxu0 }
 0x6a3   : > { %v4287_v11 = vpop.f32.mrb[19].mxu0  ;;  %4291 = vmatmul.mubr.msk.bf16.vlgmr.msra.gmra.mrb[24].mxu1 %vm1073_vm3, %v1625_v9 }
 0x6a4   : > { %4302 = vmatprep.mubr.msk.bf16.mxu1 %vm4661_vm1, %v4660_v3 }
 0x6a9   : > { %v1718_v12 = vpop.f32.mrb[20].mxu0 }
 0x6aa   : > { %v1725_v14 = vsel %vm4945_vm4, %v1718_v12, -inf  ;;  %v4298_v15 = vpop.f32.mrb[21].mxu0 }
 0x6ab   : > { %v1721_v17 = vpop.f32.mrb[22].mxu0  ;;  %v1729_v18 = vsel %vm1073_vm3, %v1725_v14, -inf }
 0x6ac   : > { %1730 = vmax.xlane.f32.xlu1 %v1729_v18  ;;  %v4299_v19 = vpop.f32.mrb[23].mxu0 }
 0x6bd   : > { %1750 = vrot.lane.b32.xlu1 %v4925_v13, %s4669_s12 }
 0x6c1   : > { %1904 = vrot.lane.b32.xlu1 %v4925_v13, %s4670_s6 }
 0x6c5   : > { %1954 = vrot.lane.b32.xlu1 %v4929_v16, %s4670_s6 }
 0x6c9   : > { %1952 = vrot.lane.b32.xlu1 %v4929_v16, %s4671_s8 }
 0x739   : > { %v1731_v20 = vpop.xlane.xlu1 %1730 }
 0x73a   : > { %v1733_v23 = vsub.f32 %v1725_v14, %v1731_v20 }
 0x73c   : > { %v1736_v25 = vmul.f32 1.442695, %v1733_v23 }
 0x73d   : > { %v1751_v21 = vpop.permute.xlu1 %1750 }
 0x73e   : > { %v1756_v22 = vsel %vm1202_vm5, %v1751_v21, 0  ;;  %4562 = vpow2.f32 %v1736_v25 }
 0x73f   : > { %4301 = vmatpush3.bf16.msra.mxu1 %v1756_v22 }
 0x740   : > { %4312 = vmatprep.subr.bf16.mxu1 %v4660_v3 }
 0x741   : > { %v1905_v53 = vpop.permute.xlu1 %1904 }
 0x742   : > { %v1910_v55 = vsel %vm1073_vm3, %v1905_v53, 0 }
 0x745   : > { %v1955_v0 = vpop.permute.xlu1 %1954 }
 0x746   : > { %v1960_v8 = vsel %vm1073_vm3, %v1955_v0, 0 }
 0x748   : > { %v4563_v37 = vpop.eup %4562 }
 0x749   : > { %v1741_v39 = vsel %vm1073_vm3, %v4563_v37, 0.0  ;;  %v1953_v18 = vpop.permute.xlu1 %1952 }
 0x76e   : > { %v1565_v26 = vpop.f32.mrb[20].mxu1 }
 0x76f   : > { %v5059_v27 = vadd.f32 %v1617_v7, %v1565_v26  ;;  %v4280_v28 = vpop.f32.mrb[21].mxu1 }
 0x770   : > { %v1568_v29 = vpop.f32.mrb[22].mxu1 }
 0x771   : > { %v5061_v30 = vadd.f32 %v1620_v10, %v1568_v29  ;;  %v4281_v31 = vpop.f32.mrb[23].mxu1 }
 0x776   : > { %v1668_v32 = vpop.f32.mrb[24].mxu1 }
 0x777   : > { %v1724_v33 = vsel %vm4945_vm4, %v1668_v32, -inf  ;;  %v4292_v34 = vpop.f32.mrb[25].mxu1 }
 0x778   : > { %v1671_v35 = vpop.f32.mrb[26].mxu1  ;;  %v1726_v36 = vsel %vm1073_vm3, %v1724_v33, -inf }
 0x779   : > { %1727 = vmax.xlane.f32.xlu0 %v1726_v36  ;;  %v4293_v38 = vpop.f32.mrb[27].mxu1 }
 0x77d   : > { %1742 = vadd.xlane.f32.xlu0 %v1741_v39 }
 0x806   : > { %v1728_v40 = vpop.xlane.xlu0 %1727 }
 0x807   : > { %v1732_v41 = vsub.f32 %v1724_v33, %v1728_v40 }
 0x809   : > { %v1734_v42 = vmul.f32 1.442695, %v1732_v41 }
 0x80a   : > { %v1743_v45 = vpop.xlane.xlu0 %1742 }
 0x80b   : > { %4564 = vpow2.f32 %v1734_v42 }
 0x80c   : > { %4566 = vrcp.f32 %v1743_v45 }
 0x815   : > { %v4565_v43 = vpop.eup %4564 }
 0x816   : > { %v1738_v44 = vsel %vm1073_vm3, %v4565_v43, 0.0  ;;  %v4567_v46 = vpop.eup %4566 }
 0x817   : > { %1739 = vadd.xlane.f32.xlu0 %v1738_v44  ;;  %v1747_v48 = vmul.f32 %v4567_v46, %v4563_v37  ;;  %v1064_v46 = vld [vmem:[%s4818_s3 + $0xc] sm:$0xf]  ;;  %s5536_s3 = scalar_lea.vmem %s5469_s17, %s4803_s29 }
 0x819   : > { %v1749_v51 = vpack.c.bf16 %v1747_v48, %v1747_v48 }
 0x82d   : > { %1798 = vrot.lane.b32.xlu0 %v4929_v16, %s4669_s12  ;;  %s5525_s12 = sld [smem:[#allocation9_spill]] }
 0x831   : > { %1902 = vrot.lane.b32.xlu0 %v4925_v13, %s4671_s8 }
 0x8a4   : > { %v1740_v47 = vpop.xlane.xlu0 %1739 }
 0x8a5   : > { %4568 = vrcp.f32 %v1740_v47  ;;  %v2135_v47 = vsel %vm1202_vm5, %v1064_v46, 0 }
 0x8a8   : > { %v1799_v49 = vpop.permute.xlu0 %1798 }
 0x8a9   : > { %v1804_v50 = vsel %vm1202_vm5, %v1799_v49, 0 }
 0x8aa   : > { %4307 = vmatpush3.bf16.msra.mxu0 %v1804_v50 }
 0x8ab   : > { %4318 = vmatprep.subr.bf16.mxu0 %v4660_v3 }
 0x8ac   : > { %v1903_v57 = vpop.permute.xlu0 %1902 }
 0x8ad   : > { %4309 = vmatmul.mubr.msk.bf16.vlgmr.msra.gmra.mrb[24].mxu0 %vm1073_vm3, %v1749_v51 }
 0x8ae   : > { %4320 = vmatprep.mubr.msk.bf16.mxu0 %vm4661_vm1, %v4660_v3 }
 0x8af   : > { %v4569_v52 = vpop.eup %4568 }
 0x8b0   : > { %v1746_v54 = vmul.f32 %v4569_v52, %v4565_v43 }
 0x8b2   : > { %v1748_v56 = vpack.c.bf16 %v1746_v54, %v1746_v54 }
 0x8b3   : > { %4319 = vmatpush3.bf16.xpose.msra.mxu0 %v1910_v55 }
 0x8b4   : > { %4303 = vmatmul.mubr.msk.bf16.vlgmr.msra.gmra.mrb[28].mxu1 %vm1073_vm3, %v1748_v56  ;;  %4330 = vmatprep.subr.bf16.mxu0 %v4660_v3 }
 0x8b5   : > { %4314 = vmatprep.mubr.msk.bf16.mxu1 %vm4661_vm1, %v4660_v3  ;;  %4313 = vmatpush3.bf16.msra.mxu1 %v1857_v59 }
 0x8b6   : > { %4324 = vmatprep.subr.bf16.mxu1 %v4660_v3 }
 0x8ba   : > { %4321 = vmatmul.mubr.msk.bf16.vlgmr.msra.gmra.mrb[28].mxu0 %vm1073_vm3, %v1903_v57 }
 0x8bb   : > { %4332 = vmatprep.mubr.msk.bf16.mxu0 %vm4661_vm1, %v4660_v3 }
 0x980   : > { %v1840_v60 = vpop.f32.mrb[24].mxu0 }
 0x981   : > { %v4310_v61 = vpop.f32.mrb[25].mxu0 }
 0x982   : > { %v1843_v62 = vpop.f32.mrb[26].mxu0 }
 0x983   : > { %v4311_v63 = vpop.f32.mrb[27].mxu0 }
 0x984   : > { %v4045_v63 = vld [vmem:[%s5524_s1] ss:$0 sm:$0xff]  ;;  %s5534_s1 = sld [smem:[#allocation19_spill]] }
 0x987   : > { %v1792_v1 = vpop.f32.mrb[28].mxu1 }
 0x988   : > { %v4113_v2 = vpack.c.bf16 %v1840_v60, %v1792_v1  ;;  %v4304_v4 = vpop.f32.mrb[29].mxu1 }
 0x989   : > { %v1795_v7 = vpop.f32.mrb[30].mxu1 }
 0x98a   : > { %v4305_v9 = vpop.f32.mrb[31].mxu1  ;;  %4315 = vmatmul.mubr.msk.bf16.vlgmr.msra.gmra.mrb[32].mxu1 %vm1073_vm3, %v4113_v2  ;;  %s5535_s27 = scalar_lea.vmem %s5534_s1, %s4803_s29 }
 0x98b   : > { %4325 = vmatpush3.bf16.xpose.msra.mxu1 %v1960_v8  ;;  %4326 = vmatprep.mubr.msk.bf16.mxu1 %vm4661_vm1, %v4660_v3 }
 0x98c   : > { %4336 = vmatprep.subr.bf16.mxu1 %v4660_v3 }
 0x98d   : > { %v1946_v10 = vpop.f32.mrb[28].mxu0 }
 0x98e   : > { %v2002_v11 = vsel %vm4945_vm4, %v1946_v10, -inf  ;;  %v4322_v12 = vpop.f32.mrb[29].mxu0 }
 0x98f   : > { %v1949_v14 = vpop.f32.mrb[30].mxu0  ;;  %v2004_v15 = vsel %vm1073_vm3, %v2002_v11, -inf }
 0x990   : > { %2005 = vmax.xlane.f32.xlu0 %v2004_v15  ;;  %v4323_v17 = vpop.f32.mrb[31].mxu0 }
 0x992   : > { %4327 = vmatmul.mubr.msk.bf16.vlgmr.msra.gmra.mrb[36].mxu1 %vm1073_vm3, %v1953_v18 }
 0x993   : > { %4338 = vmatprep.mubr.msk.bf16.mxu1 %vm4661_vm1, %v4660_v3 }
 0xa1d   : > { %v2006_v19 = vpop.xlane.xlu0 %2005 }
 0xa1e   : > { %v2010_v20 = vsub.f32 %v2002_v11, %v2006_v19 }
 0xa20   : > { %v2012_v21 = vmul.f32 1.442695, %v2010_v20 }
 0xa22   : > { %4570 = vpow2.f32 %v2012_v21 }
 0xa2c   : > { %v4571_v22 = vpop.eup %4570 }
 0xa2d   : > { %v2016_v23 = vsel %vm1073_vm3, %v4571_v22, 0.0 }
 0xa2e   : > { %2017 = vadd.xlane.f32.xlu0 %v2016_v23 }
 0xa5d   : > { %v1893_v25 = vpop.f32.mrb[32].mxu1 }
 0xa5e   : > { %v1900_v26 = vadd.f32 %v1893_v25, %v5059_v27  ;;  %v4316_v28 = vpop.f32.mrb[33].mxu1  ;;  %v4536_v25 = vld [vmem:[%s4844_s19] sm:$0xff]  }
 0xa5f   : > { %v1896_v29 = vpop.f32.mrb[34].mxu1  ;;  %v2310_v28 = vld [vmem:[%s5525_s12] sm:$0xff] }
 0xa60   : > { %v1901_v31 = vadd.f32 %v1896_v29, %v5061_v30  ;;  %v4317_v32 = vpop.f32.mrb[35].mxu1  ;;  %v2311_v29 = vld [vmem:[%s5525_s12 + $0x8] sm:$0xff] }
 0xa61   : > { %v4538_v32 = vld [vmem:[%s4835_s26] sm:$0xff]  }
 0xa65   : > { %v1996_v33 = vpop.f32.mrb[36].mxu1 }
 0xa66   : > { %v2003_v34 = vsel %vm4945_vm4, %v1996_v33, -inf  ;;  %v4328_v35 = vpop.f32.mrb[37].mxu1  ;;  %v4539_v33 = vld [vmem:[%s4835_s26 + $0x8] sm:$0xff]   ;;  %s5527_s26 = scalar_lea.vmem %s5526_s22, %s4803_s29 }
 0xa67   : > { %v1999_v36 = vpop.f32.mrb[38].mxu1  ;;  %v2007_v37 = vsel %vm1073_vm3, %v2003_v34, -inf }
 0xa68   : > { %2008 = vmax.xlane.f32.xlu1 %v2007_v37  ;;  %v4329_v38 = vpop.f32.mrb[39].mxu1 }
 0xa79   : > { %2028 = vrot.lane.b32.xlu1 %v4925_v13, %s4672_s15 }
 0xabb   : > { %v2018_v39 = vpop.xlane.xlu0 %2017 }
 0xabc   : > { %4572 = vrcp.f32 %v2018_v39 }
 0xac6   : > { %v4573_v27 = vpop.eup %4572 }
 0xac7   : > { %v2024_v41 = vmul.f32 %v4573_v27, %v4571_v22 }
 0xac9   : > { %v2026_v44 = vpack.c.bf16 %v2024_v41, %v2024_v41 }
 0xaf5   : > { %v2009_v40 = vpop.xlane.xlu1 %2008 }
 0xaf6   : > { %v2011_v30 = vsub.f32 %v2003_v34, %v2009_v40  ;;  %v4046_v40 = vld [vmem:[%s5527_s26] ss:$0 sm:$0xff]  ;;  %s5530_s26 = scalar_lea.vmem %s5461_s9, %s4803_s29 }
 0xaf8   : > { %v2014_v42 = vmul.f32 1.442695, %v2011_v30 }
 0xaf9   : > { %v2029_v43 = vpop.permute.xlu1 %2028 }
 0xafa   : > { %4574 = vpow2.f32 %v2014_v42  ;;  %v2034_v24 = vsel %vm1202_vm5, %v2029_v43, 0 }
 0xafb   : > { %4331 = vmatpush3.bf16.msra.mxu0 %v2034_v24  ;;  %v4047_v24 = vld [vmem:[%s5528_s4] ss:$0 sm:$0xff] }
 0xafc   : > { %4342 = vmatprep.subr.bf16.mxu0 %v4660_v3 }
 0xafe   : > { %4333 = vmatmul.mubr.msk.bf16.vlgmr.msra.gmra.mrb[32].mxu0 %vm1073_vm3, %v2026_v44 }
 0xaff   : > { %4344 = vmatprep.mubr.msk.bf16.mxu0 %vm4661_vm1, %v4660_v3  ;;  %4343 = vmatpush3.bf16.msra.mxu0 %v2135_v47 }
 0xb00   : > { %4356 = vmatprep.subr.bf16.mxu0 %v4660_v3 }
 0xb04   : > { %v4575_v13 = vpop.eup %4574 }
 0xb05   : > { %v2019_v45 = vsel %vm1073_vm3, %v4575_v13, 0.0 }
 0xb06   : > { %2020 = vadd.xlane.f32.xlu0 %v2019_v45 }
 0xb1c   : > { %2076 = vrot.lane.b32.xlu0 %v4929_v16, %s4672_s15 }
 0xb93   : > { %v2021_v48 = vpop.xlane.xlu0 %2020 }
 0xb94   : > { %4576 = vrcp.f32 %v2021_v48 }
 0xb97   : > { %v2077_v49 = vpop.permute.xlu0 %2076 }
 0xb98   : > { %v2082_v50 = vsel %vm1202_vm5, %v2077_v49, 0 }
 0xb99   : > { %4337 = vmatpush3.bf16.msra.mxu1 %v2082_v50 }
 0xb9a   : > { %4348 = vmatprep.subr.bf16.mxu1 %v4660_v3 }
 0xb9e   : > { %v4577_v51 = vpop.eup %4576 }
 0xb9f   : > { %v2025_v52 = vmul.f32 %v4577_v51, %v4575_v13 }
 0xba1   : > { %v2027_v53 = vpack.c.bf16 %v2025_v52, %v2025_v52 }
 0xba3   : > { %4339 = vmatmul.mubr.msk.bf16.vlgmr.msra.gmra.mrb[40].mxu1 %vm1073_vm3, %v2027_v53 }
 0xba4   : > { %4352 = vmatprep.mubr.msk.bf16.mxu1 %vm4661_vm1, %v4660_v3  ;;  %4349 = vmatpush3.bf16.msra.mxu1 %v4538_v32 }
 0xba5   : > { %4350 = vmatprep.subr.bf16.mxu1 %v4660_v3 }
 0xba8   : > { %4351 = vmatpush3.bf16.msra.mxu1 %v4539_v33 }
 0xba9   : > { %4364 = vmatprep.subr.bf16.mxu1 %v4660_v3 }
 0xbd1   : > { %v2070_v16 = vpop.f32.mrb[32].mxu0 }
 0xbd2   : > { %v4334_v54 = vpop.f32.mrb[33].mxu0 }
 0xbd3   : > { %v2073_v55 = vpop.f32.mrb[34].mxu0 }
 0xbd4   : > { %v4335_v56 = vpop.f32.mrb[35].mxu0 }
 0xc76   : > { %v2118_v57 = vpop.f32.mrb[40].mxu1 }
 0xc77   : > { %v4114_v58 = vpack.c.bf16 %v2118_v57, %v2070_v16  ;;  %v4340_v59 = vpop.f32.mrb[41].mxu1  ;;  %v4048_v57 = vld [vmem:[%s5530_s26] ss:$0 sm:$0xff] }
 0xc78   : > { %v2121_v60 = vpop.f32.mrb[42].mxu1 }
 0xc79   : > { %v4341_v61 = vpop.f32.mrb[43].mxu1  ;;  %4345 = vmatmul.mubr.msk.bf16.vlgmr.msra.gmra.mrb[36].mxu0 %vm1073_vm3, %v4114_v58 }
 0xc7a   : > { %4360 = vmatprep.mubr.msk.bf16.mxu0 %vm4661_vm1, %v4660_v3  ;;  %4357 = vmatpush3.bf16.msra.mxu0 %v4536_v25 }
 0xc7b   : > { %4358 = vmatprep.subr.bf16.mxu0 %v4660_v3 }
 0xd4c   : > { %v2171_v62 = vpop.f32.mrb[36].mxu0 }
 0xd4d   : > { %v2178_v0 = vadd.f32 %v2171_v62, %v1900_v26  ;;  %v4346_v1 = vpop.f32.mrb[37].mxu0  ;;  %v4537_v26 = vld [vmem:[%s4844_s19 + $0x8] sm:$0xff]   ;;  %s5529_s19 = scalar_lea.vmem %s5463_s11, %s4803_s29 }
 0xd4e   : > { %v2174_v2 = vpop.f32.mrb[38].mxu0  ;;  %4359 = vmatpush3.bf16.msra.mxu0 %v4537_v26  ;;  %v4053_v47 = vld [vmem:[%s5529_s19] ss:$0 sm:$0xff] }
 0xd4f   : > { %v2187_v4 = vadd.f32 %v4045_v63, %v2178_v0  ;;  %v2179_v7 = vadd.f32 %v2174_v2, %v1901_v31  ;;  %v4347_v8 = vpop.f32.mrb[39].mxu0  ;;  %v4116_v31 = vpack.c.bf16 %v2311_v29, %v2310_v28  ;;  %4370 = vmatprep.subr.bf16.mxu0 %v4660_v3 }
 0xd51   : > { %v2188_v9 = vadd.f32 %v4045_v63, %v2179_v7  ;;  %v2189_v10 = vadd.f32 %v2187_v4, %v4907_v5  ;;  %4361 = vmatmul.mubr.msk.bf16.vlgmr.msra.gmra.mrb[40].mxu0 %vm1014_vm2, %v4116_v31 }
 0xd52   : > { %4372 = vmatprep.mubr.msk.bf16.mxu0 %vm4661_vm1, %v4660_v3 }
 0xd53   : > { %v2193_v11 = vsel %vm1014_vm2, %v2189_v10, 0.0  ;;  %v2190_v12 = vadd.f32 %v2188_v9, %v4909_v6 }
 0xd54   : > { %2194 = vadd.xlane.f32.xlu1 %v2193_v11 }
 0xd55   : > { %v2196_v14 = vsel %vm1014_vm2, %v2190_v12, 0.0 }
 0xd56   : > { %2197 = vadd.xlane.f32.xlu0 %v2196_v14 }
 0xde1   : > { %v2195_v15 = vpop.xlane.xlu1 %2194 }
 0xde2   : > { %v2200_v17 = vmul.f32 0.03125, %v2195_v15 }
 0xde3   : > { %v2198_v18 = vpop.xlane.xlu0 %2197 }
 0xde4   : > { %v2202_v19 = vsub.f32 %v2189_v10, %v2200_v17  ;;  %v2201_v20 = vmul.f32 0.03125, %v2198_v18 }
 0xde6   : > { %v2203_v21 = vsub.f32 %v2190_v12, %v2201_v20  ;;  %v2204_v22 = vmul.f32 %v2202_v19, %v2202_v19 }
 0xde8   : > { %v2206_v23 = vsel %vm1014_vm2, %v2204_v22, 0.0  ;;  %v2205_v5 = vmul.f32 %v2203_v21, %v2203_v21 }
 0xde9   : > { %2207 = vadd.xlane.f32.xlu1 %v2206_v23 }
 0xdea   : > { %v2209_v6 = vsel %vm1014_vm2, %v2205_v5, 0.0 }
 0xdeb   : > { %2210 = vadd.xlane.f32.xlu0 %v2209_v6 }
 0xe24   : > { %v2379_v48 = vpop.f32.mrb[40].mxu0 }
 0xe25   : > { %v2380_v49 = vadd.f32 %v4053_v47, %v2379_v48  ;;  %v4362_v50 = vpop.f32.mrb[41].mxu0 }
 0xe26   : > { %v2382_v51 = vpop.f32.mrb[42].mxu0 }
 0xe27   : > { %v5176_v52 = vpack.c.bf16 %v2380_v49, %v2380_v49  ;;  %v2383_v53 = vadd.f32 %v4053_v47, %v2382_v51  ;;  %v4363_v16 = vpop.f32.mrb[43].mxu0 }
 0xe29   : > { %v5178_v54 = vpack.c.bf16 %v2383_v53, %v2383_v53  ;;  %v2398_v55 = vsel %vm1073_vm3, %v5176_v52, 0 }
 0xe2b   : > { %v2444_v56 = vsel %vm1073_vm3, %v5178_v54, 0 }
 0xe2c   : > { %4371 = vmatpush3.bf16.xpose.msra.mxu0 %v2444_v56 }
 0xe2d   : > { %4382 = vmatprep.subr.bf16.mxu0 %v4660_v3 }
 0xe76   : > { %v2208_v34 = vpop.xlane.xlu1 %2207 }
 0xe77   : > { %v2212_v35 = vmul.f32 0.03125, %v2208_v34 }
 0xe78   : > { %v2211_v36 = vpop.xlane.xlu0 %2210 }
 0xe79   : > { %v2214_v37 = vadd.f32 1e-05, %v2212_v35  ;;  %v2213_v38 = vmul.f32 0.03125, %v2211_v36 }
 0xe7b   : > { %4578 = vrsqrt.f32 %v2214_v37  ;;  %v2215_v39 = vadd.f32 1e-05, %v2213_v38 }
 0xe7d   : > { %4580 = vrsqrt.f32 %v2215_v39 }
 0xe85   : > { %v4579_v27 = vpop.eup %4578 }
 0xe86   : > { %v2218_v30 = vmul.f32 %v4579_v27, %v2202_v19 }
 0xe87   : > { %v4581_v41 = vpop.eup %4580 }
 0xe88   : > { %v2226_v42 = vmul.f32 %v4046_v40, %v2218_v30  ;;  %v2219_v43 = vmul.f32 %v4581_v41, %v2203_v21 }
 0xe8a   : > { %v2227_v44 = vmul.f32 %v4046_v40, %v2219_v43  ;;  %v5162_v13 = vadd.f32 %v4047_v24, %v2226_v42 }
 0xe8c   : > { %v5164_v45 = vadd.f32 %v4047_v24, %v2227_v44 }
 0xe8e   : > { %v4115_v46 = vpack.c.bf16 %v5164_v45, %v5162_v13 }
 0xe90   : > { %4353 = vmatmul.mubr.msk.bf16.vlgmr.msra.gmra.mrb[44].mxu1 %vm1014_vm2, %v4115_v46 }
 0xe91   : > { %4366 = vmatprep.mubr.msk.bf16.mxu1 %vm4661_vm1, %v4660_v3  ;;  %4365 = vmatpush3.bf16.xpose.msra.mxu1 %v2398_v55 }
 0xe92   : > { %4376 = vmatprep.subr.bf16.mxu1 %v4660_v3 }
 0xf63   : > { %v2303_v58 = vpop.f32.mrb[44].mxu1 }
 0xf64   : > { %v2304_v59 = vadd.f32 %v4048_v57, %v2303_v58  ;;  %v4354_v60 = vpop.f32.mrb[45].mxu1 }
 0xf65   : > { %v2306_v61 = vpop.f32.mrb[46].mxu1 }
 0xf66   : > { %v5191_v62 = vpack.c.bf16 %v2304_v59, %v2304_v59  ;;  %v2307_v63 = vadd.f32 %v4048_v57, %v2306_v61  ;;  %v4355_v0 = vpop.f32.mrb[47].mxu1 }
 0xf68   : > { %v5193_v1 = vpack.c.bf16 %v2307_v63, %v2307_v63  ;;  %4367 = vmatmul.mubr.msk.bf16.vlgmr.msra.gmra.mrb[48].mxu1 %vm1073_vm3, %v5191_v62 }
 0xf69   : > { %4378 = vmatprep.mubr.msk.bf16.mxu1 %vm4661_vm1, %v4660_v3 }
 0xf6a   : > { %4373 = vmatmul.mubr.msk.bf16.vlgmr.msra.gmra.mrb[44].mxu0 %vm1073_vm3, %v5193_v1 }
 0xf6b   : > { %4384 = vmatprep.mubr.msk.bf16.mxu0 %vm4661_vm1, %v4660_v3 }
0x103b   : > { %v2434_v2 = vpop.f32.mrb[48].mxu1 }
0x103c   : > { %v4368_v4 = vpop.f32.mrb[49].mxu1  ;;  %v2486_v7 = vsel %vm1073_vm3, %v2434_v2, -inf }
0x103d   : > { %v2480_v8 = vpop.f32.mrb[44].mxu0  ;;  %2487 = vmax.xlane.f32.xlu1 %v2486_v7  ;;  %v2437_v9 = vpop.f32.mrb[50].mxu1 }
0x103e   : > { %v4369_v10 = vpop.f32.mrb[51].mxu1  ;;  %v4374_v11 = vpop.f32.mrb[45].mxu0  ;;  %v2489_v12 = vsel %vm1073_vm3, %v2480_v8, -inf }
0x103f   : > { %2490 = vmax.xlane.f32.xlu0 %v2489_v12  ;;  %v2483_v14 = vpop.f32.mrb[46].mxu0 }
0x1040   : > { %v4375_v15 = vpop.f32.mrb[47].mxu0 }
0x104e   : > { %2511 = vrot.lane.b32.xlu1 %v5176_v52, %s4662_s2 }
0x10ca   : > { %v2488_v17 = vpop.xlane.xlu1 %2487 }
0x10cb   : > { %v2492_v18 = vsub.f32 %v2434_v2, %v2488_v17 }
0x10cc   : > { %v2491_v19 = vpop.xlane.xlu0 %2490 }
0x10cd   : > { %v2494_v20 = vmul.f32 1.442695, %v2492_v18  ;;  %v2493_v21 = vsub.f32 %v2480_v8, %v2491_v19 }
0x10ce   : > { %v2512_v22 = vpop.permute.xlu1 %2511 }
0x10cf   : > { %4582 = vpow2.f32 %v2494_v20  ;;  %v2496_v23 = vmul.f32 1.442695, %v2493_v21  ;;  %v2517_v5 = vsel %vm1202_vm5, %v2512_v22, 0 }
0x10d0   : > { %4377 = vmatpush3.bf16.msra.mxu1 %v2517_v5  ;;  %v2391_v5 = vld [vmem:[%s4853_s23 + $0x4] sm:$0xf] }
0x10d1   : > { %4584 = vpow2.f32 %v2496_v23  ;;  %4388 = vmatprep.subr.bf16.mxu1 %v4660_v3 }
0x10d9   : > { %v4583_v6 = vpop.eup %4582 }
0x10da   : > { %v2498_v25 = vsel %vm1073_vm3, %v4583_v6, 0.0 }
0x10db   : > { %v4585_v26 = vpop.eup %4584  ;;  %2499 = vadd.xlane.f32.xlu1 %v2498_v25 }
0x10dc   : > { %v2501_v28 = vsel %vm1073_vm3, %v4585_v26, 0.0 }
0x10dd   : > { %2502 = vadd.xlane.f32.xlu0 %v2501_v28 }
0x10ec   : > { %2613 = vrot.lane.b32.xlu1 %v5176_v52, %s4665_s30 }
0x10f0   : > { %2664 = vrot.lane.b32.xlu1 %v5178_v54, %s4665_s30 }
0x10f3   : > { %2560 = vrot.lane.b32.xlu0 %v5178_v54, %s4662_s2 }
0x10f4   : > { %2662 = vrot.lane.b32.xlu1 %v5193_v1, %s4665_s30 }
0x10f7   : > { %2611 = vrot.lane.b32.xlu0 %v5191_v62, %s4665_s30  ;;  %s4673_s30 = smov [#allocation2]  }
0x1168   : > { %v2500_v29 = vpop.xlane.xlu1 %2499 }
0x1169   : > { %4586 = vrcp.f32 %v2500_v29  ;;  %v2390_v29 = vld [vmem:[%s4853_s23] sm:$0xf] }
0x116a   : > { %v2503_v31 = vpop.xlane.xlu0 %2502 }
0x116b   : > { %4588 = vrcp.f32 %v2503_v31 }
0x116c   : > { %v2614_v34 = vpop.permute.xlu1 %2613 }
0x116d   : > { %v2619_v40 = vsel %vm1073_vm3, %v2614_v34, 0 }
0x116e   : > { %v2561_v32 = vpop.permute.xlu0 %2560 }
0x116f   : > { %v2566_v33 = vsel %vm1202_vm5, %v2561_v32, 0 }
0x1170   : > { %4383 = vmatpush3.bf16.msra.mxu0 %v2566_v33  ;;  %v2665_v27 = vpop.permute.xlu1 %2664  ;;  %v2895_v33 = vsel %vm1202_vm5, %v2390_v29, 0 }
0x1171   : > { %4394 = vmatprep.subr.bf16.mxu0 %v4660_v3  ;;  %v2670_v41 = vsel %vm1073_vm3, %v2665_v27, 0 }
0x1172   : > { %v2612_v42 = vpop.permute.xlu0 %2611 }
0x1173   : > { %v4587_v35 = vpop.eup %4586 }
0x1174   : > { %v2506_v36 = vmul.f32 %v4587_v35, %v4583_v6  ;;  %v2663_v43 = vpop.permute.xlu1 %2662 }
0x1175   : > { %v4589_v37 = vpop.eup %4588 }
0x1176   : > { %v2507_v38 = vmul.f32 %v4589_v37, %v4585_v26  ;;  %v2508_v39 = vpack.c.bf16 %v2506_v36, %v2506_v36  ;;  %v2843_v26 = vsel %vm1202_vm5, %v2391_v5, 0 }
0x1178   : > { %4379 = vmatmul.mubr.msk.bf16.vlgmr.msra.gmra.mrb[52].mxu1 %vm1073_vm3, %v2508_v39  ;;  %v2509_v30 = vpack.c.bf16 %v2507_v38, %v2507_v38 }
0x1179   : > { %4389 = vmatpush3.bf16.xpose.msra.mxu1 %v2619_v40  ;;  %4390 = vmatprep.mubr.msk.bf16.mxu1 %vm4661_vm1, %v4660_v3 }
0x117a   : > { %4385 = vmatmul.mubr.msk.bf16.vlgmr.msra.gmra.mrb[48].mxu0 %vm1073_vm3, %v2509_v30  ;;  %4400 = vmatprep.subr.bf16.mxu1 %v4660_v3 }
0x117b   : > { %4395 = vmatpush3.bf16.xpose.msra.mxu0 %v2670_v41  ;;  %4396 = vmatprep.mubr.msk.bf16.mxu0 %vm4661_vm1, %v4660_v3 }
0x117c   : > { %4406 = vmatprep.subr.bf16.mxu0 %v4660_v3 }
0x1180   : > { %4391 = vmatmul.mubr.msk.bf16.vlgmr.msra.gmra.mrb[56].mxu1 %vm1073_vm3, %v2612_v42 }
0x1181   : > { %4402 = vmatprep.mubr.msk.bf16.mxu1 %vm4661_vm1, %v4660_v3 }
0x1182   : > { %4397 = vmatmul.mubr.msk.bf16.vlgmr.msra.gmra.mrb[52].mxu0 %vm1073_vm3, %v2663_v43 }
0x1183   : > { %4408 = vmatprep.mubr.msk.bf16.mxu0 %vm4661_vm1, %v4660_v3 }
0x124b   : > { %v5239_v24 = vpop.f32.mrb[52].mxu1 }
0x124c   : > { %v4380_v44 = vpop.f32.mrb[53].mxu1 }
0x124d   : > { %v2556_v46 = vpop.f32.mrb[54].mxu1  ;;  %v5241_v47 = vpop.f32.mrb[48].mxu0 }
0x124e   : > { %v4118_v48 = vpack.c.bf16 %v5241_v47, %v5239_v24  ;;  %v4381_v49 = vpop.f32.mrb[55].mxu1  ;;  %v4386_v50 = vpop.f32.mrb[49].mxu0 }
0x124f   : > { %v2605_v51 = vpop.f32.mrb[50].mxu0 }
0x1250   : > { %v4387_v53 = vpop.f32.mrb[51].mxu0 }
0x1253   : > { %v2655_v16 = vpop.f32.mrb[56].mxu1 }
0x1254   : > { %v4392_v55 = vpop.f32.mrb[57].mxu1  ;;  %v2712_v56 = vsel %vm1073_vm3, %v2655_v16, -inf }
0x1255   : > { %v2706_v57 = vpop.f32.mrb[52].mxu0  ;;  %2713 = vmax.xlane.f32.xlu0 %v2712_v56  ;;  %v2658_v58 = vpop.f32.mrb[58].mxu1 }
0x1256   : > { %v4393_v59 = vpop.f32.mrb[59].mxu1  ;;  %v4398_v60 = vpop.f32.mrb[53].mxu0  ;;  %v2715_v61 = vsel %vm1073_vm3, %v2706_v57, -inf }
0x1257   : > { %2716 = vmax.xlane.f32.xlu1 %v2715_v61  ;;  %v2709_v63 = vpop.f32.mrb[54].mxu0 }
0x1258   : > { %v4399_v0 = vpop.f32.mrb[55].mxu0 }
0x1268   : > { %2736 = vrot.lane.b32.xlu1 %v5176_v52, %s4664_s28 }
0x126c   : > { %2940 = vrot.lane.b32.xlu1 %v5176_v52, %s4667_s24 }
0x1270   : > { %2990 = vrot.lane.b32.xlu1 %v5178_v54, %s4667_s24 }
0x1274   : > { %2988 = vrot.lane.b32.xlu1 %v5193_v1, %s4667_s24 }
0x12e2   : > { %v2714_v2 = vpop.xlane.xlu0 %2713 }
0x12e3   : > { %v2718_v4 = vsub.f32 %v2655_v16, %v2714_v2 }
0x12e4   : > { %v2717_v7 = vpop.xlane.xlu1 %2716 }
0x12e5   : > { %v2720_v8 = vmul.f32 1.442695, %v2718_v4  ;;  %v2719_v9 = vsub.f32 %v2706_v57, %v2717_v7 }
0x12e7   : > { %4590 = vpow2.f32 %v2720_v8  ;;  %v2722_v10 = vmul.f32 1.442695, %v2719_v9 }
0x12e8   : > { %v2737_v11 = vpop.permute.xlu1 %2736 }
0x12e9   : > { %4592 = vpow2.f32 %v2722_v10  ;;  %v2742_v12 = vsel %vm1202_vm5, %v2737_v11, 0 }
0x12ea   : > { %4401 = vmatpush3.bf16.msra.mxu1 %v2742_v12 }
0x12eb   : > { %4412 = vmatprep.subr.bf16.mxu1 %v4660_v3 }
0x12ec   : > { %v2941_v34 = vpop.permute.xlu1 %2940 }
0x12ed   : > { %v2946_v24 = vsel %vm1073_vm3, %v2941_v34, 0 }
0x12f0   : > { %v2991_v35 = vpop.permute.xlu1 %2990 }
0x12f1   : > { %v4591_v14 = vpop.eup %4590  ;;  %v2996_v36 = vsel %vm1073_vm3, %v2991_v35, 0  ;;  %v2392_v35 = vld [vmem:[%s4853_s23 + $0x8] sm:$0xf] }
0x12f2   : > { %v2724_v15 = vsel %vm1073_vm3, %v4591_v14, 0.0 }
0x12f3   : > { %v4593_v17 = vpop.eup %4592  ;;  %2725 = vadd.xlane.f32.xlu0 %v2724_v15 }
0x12f4   : > { %v2727_v18 = vsel %vm1073_vm3, %v4593_v17, 0.0  ;;  %v2989_v37 = vpop.permute.xlu1 %2988 }
0x12f7   : > { %2728 = vadd.xlane.f32.xlu0 %v2727_v18 }
0x130d   : > { %2784 = vrot.lane.b32.xlu0 %v5178_v54, %s4664_s28  ;;  %s5531_s28 = scalar_lea.vmem %s5465_s13, %s4803_s29 }
0x1311   : > { %2938 = vrot.lane.b32.xlu0 %v5191_v62, %s4667_s24  ;;  %s5532_s24 = sld [smem:[#allocation18_spill]] }
0x1380   : > { %v2726_v19 = vpop.xlane.xlu0 %2725 }
0x1381   : > { %4594 = vrcp.f32 %v2726_v19 }
0x1384   : > { %v2729_v20 = vpop.xlane.xlu0 %2728 }
0x1385   : > { %4596 = vrcp.f32 %v2729_v20 }
0x1388   : > { %v2785_v21 = vpop.permute.xlu0 %2784 }
0x1389   : > { %v2790_v22 = vsel %vm1202_vm5, %v2785_v21, 0 }
0x138a   : > { %4407 = vmatpush3.bf16.msra.mxu0 %v2790_v22 }
0x138b   : > { %v4595_v23 = vpop.eup %4594  ;;  %4418 = vmatprep.subr.bf16.mxu0 %v4660_v3 }
0x138c   : > { %v2732_v6 = vmul.f32 %v4595_v23, %v4591_v14 }
0x138e   : > { %v2734_v25 = vpack.c.bf16 %v2732_v6, %v2732_v6 }
0x138f   : > { %v4597_v28 = vpop.eup %4596 }
0x1390   : > { %v2733_v31 = vmul.f32 %v4597_v28, %v4593_v17  ;;  %4403 = vmatmul.mubr.msk.bf16.vlgmr.msra.gmra.mrb[60].mxu1 %vm1073_vm3, %v2734_v25 }
0x1391   : > { %4413 = vmatpush3.bf16.msra.mxu1 %v2843_v26  ;;  %4414 = vmatprep.mubr.msk.bf16.mxu1 %vm4661_vm1, %v4660_v3 }
0x1392   : > { %v2735_v32 = vpack.c.bf16 %v2733_v31, %v2733_v31  ;;  %4424 = vmatprep.subr.bf16.mxu1 %v4660_v3 }
0x1394   : > { %4409 = vmatmul.mubr.msk.bf16.vlgmr.msra.gmra.mrb[56].mxu0 %vm1073_vm3, %v2735_v32 }
0x1395   : > { %4419 = vmatpush3.bf16.msra.mxu0 %v2895_v33  ;;  %4420 = vmatprep.mubr.msk.bf16.mxu0 %vm4661_vm1, %v4660_v3 }
0x1396   : > { %4430 = vmatprep.subr.bf16.mxu0 %v4660_v3 }
0x139c   : > { %4421 = vmatmul.mubr.msk.bf16.vlgmr.msra.gmra.mrb[60].mxu0 %vm1073_vm3, %v4118_v48  ;;  %v2939_v48 = vpop.permute.xlu0 %2938 }
0x139d   : > { %4432 = vmatprep.mubr.msk.bf16.mxu0 %vm4661_vm1, %v4660_v3 }
0x139e   : > { %4431 = vmatpush3.bf16.xpose.msra.mxu0 %v2996_v36  ;;  %v3169_v36 = vsel %vm1202_vm5, %v2392_v35, 0 }
0x139f   : > { %4442 = vmatprep.subr.bf16.mxu0 %v4660_v3 }
0x13a5   : > { %4433 = vmatmul.mubr.msk.bf16.vlgmr.msra.gmra.mrb[64].mxu0 %vm1073_vm3, %v2989_v37 }
0x13a6   : > { %4444 = vmatprep.mubr.msk.bf16.mxu0 %vm4661_vm1, %v4660_v3 }
0x1463   : > { %v2778_v38 = vpop.f32.mrb[60].mxu1 }
0x1464   : > { %v4404_v39 = vpop.f32.mrb[61].mxu1 }
0x1465   : > { %v2781_v27 = vpop.f32.mrb[62].mxu1 }
0x1466   : > { %v4405_v40 = vpop.f32.mrb[63].mxu1 }
0x1467   : > { %v2826_v30 = vpop.f32.mrb[56].mxu0 }
0x1468   : > { %v4117_v41 = vpack.c.bf16 %v2826_v30, %v2778_v38  ;;  %v4410_v42 = vpop.f32.mrb[57].mxu0 }
0x1469   : > { %v2829_v43 = vpop.f32.mrb[58].mxu0 }
0x146a   : > { %v4411_v44 = vpop.f32.mrb[59].mxu0  ;;  %4415 = vmatmul.mubr.msk.bf16.vlgmr.msra.gmra.mrb[64].mxu1 %vm1073_vm3, %v4117_v41 }
0x146b   : > { %4425 = vmatpush3.bf16.xpose.msra.mxu1 %v2946_v24  ;;  %4426 = vmatprep.mubr.msk.bf16.mxu1 %vm4661_vm1, %v4660_v3 }
0x146c   : > { %4436 = vmatprep.subr.bf16.mxu1 %v4660_v3 }
0x146f   : > { %v2931_v46 = vpop.f32.mrb[60].mxu0 }
0x1470   : > { %v4422_v47 = vpop.f32.mrb[61].mxu0 }
0x1471   : > { %v2934_v49 = vpop.f32.mrb[62].mxu0 }
0x1472   : > { %v4423_v50 = vpop.f32.mrb[63].mxu0  ;;  %4427 = vmatmul.mubr.msk.bf16.vlgmr.msra.gmra.mrb[68].mxu1 %vm1073_vm3, %v2939_v48 }
0x1473   : > { %4438 = vmatprep.mubr.msk.bf16.mxu1 %vm4661_vm1, %v4660_v3 }
0x1478   : > { %v3032_v51 = vpop.f32.mrb[64].mxu0 }
0x1479   : > { %v4434_v53 = vpop.f32.mrb[65].mxu0  ;;  %v3041_v16 = vsel %vm1073_vm3, %v3032_v51, -inf }
0x147a   : > { %3042 = vmax.xlane.f32.xlu1 %v3041_v16  ;;  %v3035_v55 = vpop.f32.mrb[66].mxu0 }
0x147b   : > { %v4435_v56 = vpop.f32.mrb[67].mxu0 }
0x148b   : > { %3062 = vrot.lane.b32.xlu1 %v5176_v52, %s4668_s5 }
0x148f   : > { %3216 = vrot.lane.b32.xlu1 %v5176_v52, %s4671_s8 }
0x1493   : > { %3266 = vrot.lane.b32.xlu1 %v5178_v54, %s4671_s8 }
0x1497   : > { %3264 = vrot.lane.b32.xlu1 %v5193_v1, %s4671_s8 }
0x1507   : > { %v3043_v57 = vpop.xlane.xlu1 %3042 }
0x1508   : > { %v3045_v60 = vsub.f32 %v3032_v51, %v3043_v57 }
0x150a   : > { %v3048_v61 = vmul.f32 1.442695, %v3045_v60 }
0x150b   : > { %v3063_v58 = vpop.permute.xlu1 %3062 }
0x150c   : > { %v3068_v59 = vsel %vm1202_vm5, %v3063_v58, 0  ;;  %4598 = vpow2.f32 %v3048_v61 }
0x150d   : > { %4437 = vmatpush3.bf16.msra.mxu1 %v3068_v59 }
0x150e   : > { %4448 = vmatprep.subr.bf16.mxu1 %v4660_v3 }
0x150f   : > { %v3217_v29 = vpop.permute.xlu1 %3216 }
0x1510   : > { %v3222_v32 = vsel %vm1073_vm3, %v3217_v29, 0 }
0x1513   : > { %v3267_v40 = vpop.permute.xlu1 %3266 }
0x1514   : > { %v3272_v24 = vsel %vm1073_vm3, %v3267_v40, 0 }
0x1516   : > { %v4599_v11 = vpop.eup %4598 }
0x1517   : > { %v3053_v15 = vsel %vm1073_vm3, %v4599_v11, 0.0  ;;  %v3265_v51 = vpop.permute.xlu1 %3264 }
0x153d   : > { %v2879_v63 = vpop.f32.mrb[64].mxu1 }
0x153e   : > { %v5307_v0 = vadd.f32 %v2931_v46, %v2879_v63  ;;  %v4416_v2 = vpop.f32.mrb[65].mxu1 }
0x153f   : > { %v2882_v4 = vpop.f32.mrb[66].mxu1 }
0x1540   : > { %v5309_v7 = vadd.f32 %v2934_v49, %v2882_v4  ;;  %v4417_v8 = vpop.f32.mrb[67].mxu1 }
0x1545   : > { %v2982_v9 = vpop.f32.mrb[68].mxu1 }
0x1546   : > { %v4428_v1 = vpop.f32.mrb[69].mxu1  ;;  %v3038_v10 = vsel %vm1073_vm3, %v2982_v9, -inf }
0x1547   : > { %3039 = vmax.xlane.f32.xlu0 %v3038_v10  ;;  %v2985_v12 = vpop.f32.mrb[70].mxu1 }
0x1548   : > { %v4429_v14 = vpop.f32.mrb[71].mxu1 }
0x154b   : > { %3054 = vadd.xlane.f32.xlu0 %v3053_v15 }
0x15d4   : > { %v3040_v17 = vpop.xlane.xlu0 %3039 }
0x15d5   : > { %v3044_v18 = vsub.f32 %v2982_v9, %v3040_v17 }
0x15d7   : > { %v3046_v19 = vmul.f32 1.442695, %v3044_v18 }
0x15d8   : > { %v3055_v22 = vpop.xlane.xlu0 %3054 }
0x15d9   : > { %4600 = vpow2.f32 %v3046_v19 }
0x15da   : > { %4602 = vrcp.f32 %v3055_v22 }
0x15e3   : > { %v4601_v20 = vpop.eup %4600 }
0x15e4   : > { %v3050_v21 = vsel %vm1073_vm3, %v4601_v20, 0.0  ;;  %v4603_v23 = vpop.eup %4602 }
0x15e5   : > { %3051 = vadd.xlane.f32.xlu0 %v3050_v21  ;;  %v3059_v6 = vmul.f32 %v4603_v23, %v4599_v11  ;;  %v2393_v21 = vld [vmem:[%s4853_s23 + $0xc] sm:$0xf] }
0x15e6   : > { %v3445_v22 = vsel %vm1202_vm5, %v2393_v21, 0  ;;  %v4085_v21 = vld [vmem:[%s5536_s3] ss:$0 sm:$0xff] }
0x15e7   : > { %v3061_v28 = vpack.c.bf16 %v3059_v6, %v3059_v6 }
0x15fb   : > { %3110 = vrot.lane.b32.xlu0 %v5178_v54, %s4668_s5  ;;  %s5533_s5 = scalar_lea.vmem %s5532_s24, %s4803_s29  ;;  %s3766_s24 = sshll.u32 %s4673_s30, 4  ;;  %s3767_s24 = int_to_ptr.vmem [resolvable:$true] %s3766_s24 }
0x15fc   : > { %p4629_p9 = scmp.lt.s32.totalorder %s3767_s24, %s3767_s24 }
0x15ff   : > { %3214 = vrot.lane.b32.xlu0 %v5191_v62, %s4671_s8 }
0x1672   : > { %v3052_v5 = vpop.xlane.xlu0 %3051 }
0x1673   : > { %4604 = vrcp.f32 %v3052_v5 }
0x1676   : > { %v3111_v25 = vpop.permute.xlu0 %3110 }
0x1677   : > { %v3116_v26 = vsel %vm1202_vm5, %v3111_v25, 0 }
0x1678   : > { %4443 = vmatpush3.bf16.msra.mxu0 %v3116_v26 }
0x1679   : > { %4454 = vmatprep.subr.bf16.mxu0 %v4660_v3 }
0x167a   : > { %v3215_v34 = vpop.permute.xlu0 %3214 }
0x167b   : > { %4445 = vmatmul.mubr.msk.bf16.vlgmr.msra.gmra.mrb[68].mxu0 %vm1073_vm3, %v3061_v28 }
0x167c   : > { %4456 = vmatprep.mubr.msk.bf16.mxu0 %vm4661_vm1, %v4660_v3 }
0x167d   : > { %v4605_v62 = vpop.eup %4604 }
0x167e   : > { %v3058_v31 = vmul.f32 %v4605_v62, %v4601_v20 }
0x1680   : > { %v3060_v33 = vpack.c.bf16 %v3058_v31, %v3058_v31 }
0x1681   : > { %4455 = vmatpush3.bf16.xpose.msra.mxu0 %v3222_v32 }
0x1682   : > { %4439 = vmatmul.mubr.msk.bf16.vlgmr.msra.gmra.mrb[72].mxu1 %vm1073_vm3, %v3060_v33  ;;  %4466 = vmatprep.subr.bf16.mxu0 %v4660_v3 }
0x1683   : > { %4450 = vmatprep.mubr.msk.bf16.mxu1 %vm4661_vm1, %v4660_v3  ;;  %4449 = vmatpush3.bf16.msra.mxu1 %v3169_v36 }
0x1684   : > { %4460 = vmatprep.subr.bf16.mxu1 %v4660_v3 }
0x1688   : > { %4457 = vmatmul.mubr.msk.bf16.vlgmr.msra.gmra.mrb[72].mxu0 %vm1073_vm3, %v3215_v34 }
0x1689   : > { %4468 = vmatprep.mubr.msk.bf16.mxu0 %vm4661_vm1, %v4660_v3 }
0x174e   : > { %v3152_v37 = vpop.f32.mrb[68].mxu0 }
0x174f   : > { %v4446_v38 = vpop.f32.mrb[69].mxu0 }
0x1750   : > { %v3155_v39 = vpop.f32.mrb[70].mxu0  ;;  %v4082_v38 = vld [vmem:[%s5531_s28] ss:$0 sm:$0xff] }
0x1751   : > { %v4447_v27 = vpop.f32.mrb[71].mxu0 }
0x1755   : > { %v3104_v30 = vpop.f32.mrb[72].mxu1 }
0x1756   : > { %v4119_v41 = vpack.c.bf16 %v3152_v37, %v3104_v30  ;;  %v4440_v42 = vpop.f32.mrb[73].mxu1 }
0x1757   : > { %v3107_v43 = vpop.f32.mrb[74].mxu1 }
0x1758   : > { %v4441_v44 = vpop.f32.mrb[75].mxu1  ;;  %4451 = vmatmul.mubr.msk.bf16.vlgmr.msra.gmra.mrb[76].mxu1 %vm1073_vm3, %v4119_v41 }
0x1759   : > { %4461 = vmatpush3.bf16.xpose.msra.mxu1 %v3272_v24  ;;  %4462 = vmatprep.mubr.msk.bf16.mxu1 %vm4661_vm1, %v4660_v3 }
0x175a   : > { %4472 = vmatprep.subr.bf16.mxu1 %v4660_v3 }
0x175b   : > { %v3258_v46 = vpop.f32.mrb[72].mxu0 }
0x175c   : > { %v4458_v47 = vpop.f32.mrb[73].mxu0  ;;  %v3314_v48 = vsel %vm1073_vm3, %v3258_v46, -inf }
0x175d   : > { %3315 = vmax.xlane.f32.xlu0 %v3314_v48  ;;  %v3261_v49 = vpop.f32.mrb[74].mxu0 }
0x175e   : > { %v4459_v50 = vpop.f32.mrb[75].mxu0 }
0x1760   : > { %4463 = vmatmul.mubr.msk.bf16.vlgmr.msra.gmra.mrb[80].mxu1 %vm1073_vm3, %v3265_v51 }
0x1761   : > { %4474 = vmatprep.mubr.msk.bf16.mxu1 %vm4661_vm1, %v4660_v3 }
0x17ea   : > { %v3316_v53 = vpop.xlane.xlu0 %3315 }
0x17eb   : > { %v3320_v16 = vsub.f32 %v3258_v46, %v3316_v53 }
0x17ed   : > { %v3322_v55 = vmul.f32 1.442695, %v3320_v16 }
0x17ef   : > { %4606 = vpow2.f32 %v3322_v55 }
0x17f9   : > { %v4607_v56 = vpop.eup %4606 }
0x17fa   : > { %v3326_v57 = vsel %vm1073_vm3, %v4607_v56, 0.0 }
0x17fb   : > { %3327 = vadd.xlane.f32.xlu0 %v3326_v57  ;;  %v4540_v57 = vld [vmem:[%s4870_s0] sm:$0xff]  }
0x182b   : > { %v3205_v58 = vpop.f32.mrb[76].mxu1 }
0x182c   : > { %v3212_v59 = vadd.f32 %v3205_v58, %v5307_v0  ;;  %v4452_v60 = vpop.f32.mrb[77].mxu1  ;;  %v4541_v58 = vld [vmem:[%s4870_s0 + $0x8] sm:$0xff]  }
0x182d   : > { %v3208_v61 = vpop.f32.mrb[78].mxu1  ;;  %v4543_v60 = vld [vmem:[%s4880_s20 + $0x8] sm:$0xff]  }
0x182e   : > { %v3213_v63 = vadd.f32 %v3208_v61, %v5309_v7  ;;  %v4453_v2 = vpop.f32.mrb[79].mxu1 }
0x1833   : > { %v3308_v4 = vpop.f32.mrb[80].mxu1 }
0x1834   : > { %v4464_v8 = vpop.f32.mrb[81].mxu1  ;;  %v3317_v9 = vsel %vm1073_vm3, %v3308_v4, -inf }
0x1835   : > { %3318 = vmax.xlane.f32.xlu1 %v3317_v9  ;;  %v3311_v1 = vpop.f32.mrb[82].mxu1 }
0x1836   : > { %v4465_v10 = vpop.f32.mrb[83].mxu1 }
0x1837   : > { %v4083_v10 = vld [vmem:[%s5533_s5] ss:$0 sm:$0xff] }
0x1846   : > { %3338 = vrot.lane.b32.xlu1 %v5176_v52, %s4670_s6 }
0x1888   : > { %v3328_v11 = vpop.xlane.xlu0 %3327 }
0x1889   : > { %4608 = vrcp.f32 %v3328_v11 }
0x1893   : > { %v4609_v12 = vpop.eup %4608 }
0x1894   : > { %v3334_v15 = vmul.f32 %v4609_v12, %v4607_v56 }
0x1896   : > { %v3336_v19 = vpack.c.bf16 %v3334_v15, %v3334_v15  ;;  %v4084_v15 = vld [vmem:[%s5535_s27] ss:$0 sm:$0xff] }
0x18c2   : > { %v3319_v14 = vpop.xlane.xlu1 %3318 }
0x18c3   : > { %v3321_v0 = vsub.f32 %v3308_v4, %v3319_v14 }
0x18c5   : > { %v3324_v17 = vmul.f32 1.442695, %v3321_v0 }
0x18c6   : > { %v3339_v7 = vpop.permute.xlu1 %3338 }
0x18c7   : > { %4610 = vpow2.f32 %v3324_v17  ;;  %v3344_v18 = vsel %vm1202_vm5, %v3339_v7, 0 }
0x18c8   : > { %4467 = vmatpush3.bf16.msra.mxu0 %v3344_v18 }
0x18c9   : > { %4478 = vmatprep.subr.bf16.mxu0 %v4660_v3 }
0x18cb   : > { %4469 = vmatmul.mubr.msk.bf16.vlgmr.msra.gmra.mrb[76].mxu0 %vm1073_vm3, %v3336_v19 }
0x18cc   : > { %4480 = vmatprep.mubr.msk.bf16.mxu0 %vm4661_vm1, %v4660_v3  ;;  %4479 = vmatpush3.bf16.msra.mxu0 %v3445_v22 }
0x18cd   : > { %4492 = vmatprep.subr.bf16.mxu0 %v4660_v3 }
0x18d1   : > { %v4611_v52 = vpop.eup %4610 }
0x18d2   : > { %v3329_v20 = vsel %vm1073_vm3, %v4611_v52, 0.0 }
0x18d3   : > { %3330 = vadd.xlane.f32.xlu0 %v3329_v20  ;;  %v4545_v20 = vld [vmem:[%s4880_s20 + $0x18] sm:$0xff]  }
0x18e9   : > { %3386 = vrot.lane.b32.xlu0 %v5178_v54, %s4670_s6 }
0x1960   : > { %v3331_v23 = vpop.xlane.xlu0 %3330 }
0x1961   : > { %4612 = vrcp.f32 %v3331_v23 }
0x1964   : > { %v3387_v5 = vpop.permute.xlu0 %3386 }
0x1965   : > { %v3392_v6 = vsel %vm1202_vm5, %v3387_v5, 0 }
0x1966   : > { %4473 = vmatpush3.bf16.msra.mxu1 %v3392_v6 }
0x1967   : > { %4484 = vmatprep.subr.bf16.mxu1 %v4660_v3 }
0x196b   : > { %v4613_v25 = vpop.eup %4612 }
0x196c   : > { %v3335_v26 = vmul.f32 %v4613_v25, %v4611_v52  ;;  %v4544_v52 = vld [vmem:[%s4880_s20 + $0x10] sm:$0xff]  }
0x196e   : > { %v3337_v28 = vpack.c.bf16 %v3335_v26, %v3335_v26 }
0x1970   : > { %4475 = vmatmul.mubr.msk.bf16.vlgmr.msra.gmra.mrb[84].mxu1 %vm1073_vm3, %v3337_v28 }
0x1971   : > { %4488 = vmatprep.mubr.msk.bf16.mxu1 %vm4661_vm1, %v4660_v3  ;;  %4485 = vmatpush3.bf16.msra.mxu1 %v4540_v57  ;;  %v4098_v57 = vld [vmem:[%s971_s14] ss:$0 sm:$0xff] }
0x1972   : > { %4486 = vmatprep.subr.bf16.mxu1 %v4660_v3 }
0x1975   : > { %4487 = vmatpush3.bf16.msra.mxu1 %v4541_v58 }
0x199e   : > { %v3380_v54 = vpop.f32.mrb[76].mxu0 }
0x199f   : > { %v4470_v62 = vpop.f32.mrb[77].mxu0 }
0x19a0   : > { %v3383_v29 = vpop.f32.mrb[78].mxu0 }
0x19a1   : > { %v4471_v31 = vpop.f32.mrb[79].mxu0 }
0x1a43   : > { %v3428_v32 = vpop.f32.mrb[84].mxu1 }
0x1a44   : > { %v4120_v33 = vpack.c.bf16 %v3428_v32, %v3380_v54  ;;  %v4476_v34 = vpop.f32.mrb[85].mxu1 }
0x1a45   : > { %v3431_v35 = vpop.f32.mrb[86].mxu1 }
0x1a46   : > { %v4477_v36 = vpop.f32.mrb[87].mxu1  ;;  %4481 = vmatmul.mubr.msk.bf16.vlgmr.msra.gmra.mrb[80].mxu0 %vm1073_vm3, %v4120_v33 }
0x1a47   : > { %4500 = vmatprep.mubr.msk.bf16.mxu0 %vm4661_vm1, %v4660_v3 }
0x1b19   : > { %v3481_v37 = vpop.f32.mrb[80].mxu0 }
0x1b1a   : > { %v3488_v39 = vadd.f32 %v3481_v37, %v3212_v59  ;;  %v4482_v27 = vpop.f32.mrb[81].mxu0  ;;  %v4542_v59 = vld [vmem:[%s4880_s20] sm:$0xff]  }
0x1b1b   : > { %v3484_v40 = vpop.f32.mrb[82].mxu0  ;;  %4493 = vmatpush3.bf16.msra.mxu0 %v4542_v59 }
0x1b1c   : > { %v3497_v30 = vadd.f32 %v4082_v38, %v3488_v39  ;;  %v3489_v41 = vadd.f32 %v3484_v40, %v3213_v63  ;;  %v4483_v42 = vpop.f32.mrb[83].mxu0  ;;  %4494 = vmatprep.subr.bf16.mxu0 %v4660_v3 }
0x1b1e   : > { %v3498_v43 = vadd.f32 %v4082_v38, %v3489_v41  ;;  %v3499_v24 = vadd.f32 %v3497_v30, %v5162_v13 }
0x1b1f   : > { %4495 = vmatpush3.bf16.msra.mxu0 %v4543_v60 }
0x1b20   : > { %v3503_v44 = vsel %vm1014_vm2, %v3499_v24, 0.0  ;;  %v3500_v46 = vadd.f32 %v3498_v43, %v5164_v45  ;;  %4496 = vmatprep.subr.bf16.mxu0 %v4660_v3 }
0x1b21   : > { %3504 = vadd.xlane.f32.xlu1 %v3503_v44 }
0x1b22   : > { %v3506_v47 = vsel %vm1014_vm2, %v3500_v46, 0.0 }
0x1b23   : > { %3507 = vadd.xlane.f32.xlu0 %v3506_v47  ;;  %4497 = vmatpush3.bf16.msra.mxu0 %v4544_v52 }
0x1b24   : > { %4498 = vmatprep.subr.bf16.mxu0 %v4660_v3  ;;  %v4090_v3 = vld [vmem:[%s965_s21] ss:$0 sm:$0xff]  ;;  %s5538_s21 = sld [smem:[#allocation6_spill]] }
0x1b27   : > { %4499 = vmatpush3.bf16.msra.mxu0 %v4545_v20 }
0x1b2a   : > { %p4508_p5 = scmp.eq.s32.totalorder %s5538_s21, 1 }
0x1bae   : > { %v3505_v48 = vpop.xlane.xlu1 %3504 }
0x1baf   : > { %v3509_v49 = vmul.f32 0.03125, %v3505_v48 }
0x1bb0   : > { %v3508_v50 = vpop.xlane.xlu0 %3507 }
0x1bb1   : > { %v3511_v51 = vsub.f32 %v3499_v24, %v3509_v49  ;;  %v3510_v53 = vmul.f32 0.03125, %v3508_v50 }
0x1bb3   : > { %v3512_v16 = vsub.f32 %v3500_v46, %v3510_v53  ;;  %v3513_v55 = vmul.f32 %v3511_v51, %v3511_v51 }
0x1bb5   : > { %v3515_v13 = vsel %vm1014_vm2, %v3513_v55, 0.0  ;;  %v3514_v56 = vmul.f32 %v3512_v16, %v3512_v16 }
0x1bb6   : > { %3516 = vadd.xlane.f32.xlu1 %v3515_v13  ;;  %v4097_v13 = vld [vmem:[%s968_s10] ss:$0 sm:$0xff]  ;;  %s4622_s10 = scalar_lea.vmem %s3767_s24, 256 }
0x1bb7   : > { %v3518_v45 = vsel %vm1014_vm2, %v3514_v56, 0.0  ;;  %p4623_p6 = scmp.ne.s32.totalorder %s3767_s24, %s4622_s10  ;;  %p4630_p10 = scmp.lt.s32.totalorder %s4622_s10, %s4622_s10 }
0x1bb8   : > { %3519 = vadd.xlane.f32.xlu0 %v3518_v45 }
0x1bb9   : > { %p4624_p7 = pnand %p4623_p6, %p4508_p5  ;;  %p4631_p11 = por %p4630_p10, %p4629_p9 }
0x1bbb   : > { %p4625_p8 = pneg %p4624_p7 }
0x1bbd   : > { %p4632_p12 = pnand %p4631_p11, %p4625_p8 }
0x1c43   : > { %v3517_v61 = vpop.xlane.xlu1 %3516 }
0x1c44   : > { %v3521_v63 = vmul.f32 0.03125, %v3517_v61 }
0x1c45   : > { %v3520_v2 = vpop.xlane.xlu0 %3519 }
0x1c46   : > { %v3523_v4 = vadd.f32 1e-05, %v3521_v63  ;;  %v3522_v8 = vmul.f32 0.03125, %v3520_v2 }
0x1c48   : > { %4614 = vrsqrt.f32 %v3523_v4  ;;  %v3524_v9 = vadd.f32 1e-05, %v3522_v8 }
0x1c4a   : > { %4616 = vrsqrt.f32 %v3524_v9 }
0x1c52   : > { %v4615_v1 = vpop.eup %4614 }
0x1c53   : > { %v3527_v11 = vmul.f32 %v4615_v1, %v3511_v51 }
0x1c54   : > { %v4617_v12 = vpop.eup %4616 }
0x1c55   : > { %v3535_v14 = vmul.f32 %v4083_v10, %v3527_v11  ;;  %v3528_v0 = vmul.f32 %v4617_v12, %v3512_v16 }
0x1c57   : > { %v3536_v17 = vmul.f32 %v4083_v10, %v3528_v0  ;;  %v3543_v7 = vadd.f32 %v4084_v15, %v3535_v14 }
0x1c59   : > { %v3544_v18 = vadd.f32 %v4084_v15, %v3536_v17 }
0x1c5b   : > { %v4121_v19 = vpack.c.bf16 %v3544_v18, %v3543_v7 }
0x1c5d   : > { %4489 = vmatmul.mubr.msk.bf16.vlgmr.msra.gmra.mrb[88].mxu1 %vm1014_vm2, %v4121_v19 }
0x1d30   : > { %v3623_v22 = vpop.f32.mrb[88].mxu1 }
0x1d31   : > { %v3624_v23 = vadd.f32 %v4085_v21, %v3623_v22  ;;  %v4490_v5 = vpop.f32.mrb[89].mxu1 }
0x1d32   : > { %v3626_v6 = vpop.f32.mrb[90].mxu1 }
0x1d33   : > { %v3627_v25 = vadd.f32 %v4085_v21, %v3626_v6  ;;  %v4491_v26 = vpop.f32.mrb[91].mxu1  ;;  %v3630_v28 = vmax.f32 %v3624_v23, 0.0 }
0x1d35   : > { %v3631_v54 = vmax.f32 %v3627_v25, 0.0 }
0x1d37   : > { %v4122_v62 = vpack.c.bf16 %v3631_v54, %v3630_v28 }
0x1d39   : > { %4501 = vmatmul.mubr.msk.bf16.vlgmr.msra.gmra.mrb[84].mxu0 %vm3669_vm6, %v4122_v62 }
0x1e0c   : > { %v3707_v29 = vpop.f32.mrb[84].mxu0 }
0x1e0d   : > { %v3708_v31 = vadd.f32 %v4090_v3, %v3707_v29  ;;  %v4502_v32 = vpop.f32.mrb[85].mxu0 }
0x1e0e   : > { %v3710_v33 = vpop.f32.mrb[86].mxu0 }
0x1e0f   : > { %v3711_v34 = vadd.f32 %v4090_v3, %v3710_v33  ;;  %v4503_v35 = vpop.f32.mrb[87].mxu0  ;;  %v3714_v36 = vadd.f32 %v3708_v31, %v3543_v7 }
0x1e11   : > { %v3716_v37 = vsel %vm1014_vm2, %v3714_v36, 0.0  ;;  %v3715_v38 = vadd.f32 %v3711_v34, %v3544_v18 }
0x1e12   : > { %3717 = vadd.xlane.f32.xlu1 %v3716_v37 }
0x1e13   : > { %v3719_v39 = vsel %vm1014_vm2, %v3715_v38, 0.0 }
0x1e14   : > { %3720 = vadd.xlane.f32.xlu0 %v3719_v39 }
0x1e9f   : > { %v3718_v27 = vpop.xlane.xlu1 %3717 }
0x1ea0   : > { %v3722_v40 = vmul.f32 0.03125, %v3718_v27 }
0x1ea1   : > { %v3721_v30 = vpop.xlane.xlu0 %3720 }
0x1ea2   : > { %v3724_v41 = vsub.f32 %v3714_v36, %v3722_v40  ;;  %v3723_v42 = vmul.f32 0.03125, %v3721_v30 }
0x1ea4   : > { %v3725_v43 = vsub.f32 %v3715_v38, %v3723_v42  ;;  %v3726_v24 = vmul.f32 %v3724_v41, %v3724_v41 }
0x1ea6   : > { %v3728_v44 = vsel %vm1014_vm2, %v3726_v24, 0.0  ;;  %v3727_v46 = vmul.f32 %v3725_v43, %v3725_v43 }
0x1ea7   : > { %3729 = vadd.xlane.f32.xlu1 %v3728_v44 }
0x1ea8   : > { %v3731_v47 = vsel %vm1014_vm2, %v3727_v46, 0.0 }
0x1ea9   : > { %3732 = vadd.xlane.f32.xlu0 %v3731_v47 }
0x1f34   : > { %v3730_v48 = vpop.xlane.xlu1 %3729 }
0x1f35   : > { %v3734_v49 = vmul.f32 0.03125, %v3730_v48 }
0x1f36   : > { %v3733_v50 = vpop.xlane.xlu0 %3732 }
0x1f37   : > { %v3736_v51 = vadd.f32 1e-05, %v3734_v49  ;;  %v3735_v53 = vmul.f32 0.03125, %v3733_v50 }
0x1f39   : > { %4618 = vrsqrt.f32 %v3736_v51  ;;  %v3737_v16 = vadd.f32 1e-05, %v3735_v53 }
0x1f3b   : > { %4620 = vrsqrt.f32 %v3737_v16 }
0x1f43   : > { %v4619_v55 = vpop.eup %4618 }
0x1f44   : > { %v3740_v56 = vmul.f32 %v4619_v55, %v3724_v41 }
0x1f45   : > { %v4621_v45 = vpop.eup %4620 }
0x1f46   : > { %v3748_v58 = vmul.f32 %v4097_v13, %v3740_v56  ;;  %v3741_v59 = vmul.f32 %v4621_v45, %v3725_v43 }
0x1f48   : > { %v3749_v60 = vmul.f32 %v4097_v13, %v3741_v59  ;;  %v3756_v61 = vadd.f32 %v4098_v57, %v3748_v58 }
0x1f4a   : > { %v3757_v63 = vadd.f32 %v4098_v57, %v3749_v60  ;;  %3758 = vst.msk [vmem:[#allocation2] sm:$0xff] %vm1014_vm2, %v3756_v61 }
0x1f4c   : > { %3759 = vst.msk [vmem:[#allocation2 + $0x8] sm:$0xff] %vm1014_vm2, %v3757_v63 }
0x1f4d   : > { %4635 = shalt.err (!%p4632_p12)
}
0x1f4e   : > { %s5541_s5 = sld [smem:[#allocation24_spill]] }
0x1f54   : > { %s4636_s6 = scalar_lea.hbm %s5541_s5, 256 }
0x1f55   : > { %p4637_p13 = scmp.ne.s32.totalorder %s5541_s5, %s4636_s6  ;;  %p4642_p2 = scmp.lt.u32.totalorder %s4636_s6, %s5541_s5 }
0x1f57   : > { %p4638_p0 = pnand %p4637_p13, %p4508_p5 }
0x1f59   : > { %p4639_p1 = pneg %p4638_p0 }
0x1f5b   : > { %p4644_p3 = pnand %p4642_p2, %p4639_p1 }
0x1f5d   : > { %4647 = shalt.err (!%p4644_p3)
}
0x1f5e   : > { %s4674_s15 = smov 128   ;;  %s4675_s3 = smov 8  }
0x1f5f   : > { %4505 = dma.vmem_to_hbm [thread:$0]  (%p4508_p5), %s3767_s24, 256, %s5541_s5, [#allocation3], %s4674_s15, %s4674_s15, %s4675_s3  }
0x1f60   : > { %4653 = dma.done.wait (%p4508_p5), [#allocation3], 256  }
0x1f61   : > { %4655 = vsyncadd (%p4508_p5), [#allocation3], 4294967040 }
0x1f62 PF: > { %s5542_s20 = sld [smem:[#allocation5_spill]] }
0x1f68   : > { %s33_s3 = sadd.s32 1, %s5542_s20  }
0x1f69   : > { %p30_p4 = scmp.ge.s32.totalorder %s33_s3, 4  }
0x1f6b   :  { %32 = sbr.rel (!%p30_p4) target bundleno = 19 (0x13), region = 196 }
0x1f72   :  { %3782 = vsyncpa [#allocation3], 1 }
0x1f73   :  { %3784 = vsyncpa [#allocation3 + $0x1], 1 }

</bundles_post_ra>
